<compile_context>
chip_gen: v7x
topology: tpu7x:2x2x1
jax: 0.10.0
libtpu: 0.0.40
codegen_flags: <defaults>
</compile_context>

<pallas_src>
import math

import jax
import jax.numpy as jnp
from jax.experimental import pallas as pl
from jax.experimental.pallas import tpu as pltpu  # noqa: F401  (kept for TPU backend symmetry)

# ---------------- small synthetic ViT config ----------------
IMG = 16          # image height/width
PATCH = 8         # patch size (Conv2d kernel == stride)
CHANNELS = 3
HIDDEN = 32
HEADS = 4
HEAD_DIM = HIDDEN // HEADS
LAYERS = 2
MLP = 64
NUM_LABELS = 3
LN_EPS = 1e-12    # HF ViT LayerNorm eps
NUM_PATCHES = (IMG // PATCH) ** 2
SEQ = NUM_PATCHES + 1            # +1 for [CLS]
PATCH_DIM = CHANNELS * PATCH * PATCH


def _fullspec(shape):
    """Whole-array block (no grid): block_shape == array shape."""
    n = len(shape)
    return pl.BlockSpec(shape, lambda *_: (0,) * n)


# ---------------- in-kernel helpers (operate on values, not refs) ----------------
def _layer_norm(x, g, b):
    mu = jnp.mean(x, axis=-1, keepdims=True)
    var = jnp.mean(jnp.square(x - mu), axis=-1, keepdims=True)
    return (x - mu) * jax.lax.rsqrt(var + LN_EPS) * g + b


def _gelu(x):
    # TODO(synk): HF ViT uses exact erf-GELU; tanh approximation used here.
    return 0.5 * x * (1.0 + jnp.tanh(0.7978845608028654 * (x + 0.044715 * x * x * x)))


# ---------------- fused forward kernel ----------------
def _vit_fused_kernel(
    patches_ref, onehot_ref, cls_mask_ref, attn_bias_ref, cls_sel_ref, pos_ref, cls_tok_ref,
    patch_w_ref, patch_b_ref,
    ln1_g_ref, ln1_b_ref,
    q_w_ref, q_b_ref, k_w_ref, k_b_ref, v_w_ref, v_b_ref,
    proj_w_ref, proj_b_ref,
    ln2_g_ref, ln2_b_ref,
    fc1_w_ref, fc1_b_ref, fc2_w_ref, fc2_b_ref,
    ln_f_g_ref, ln_f_b_ref, cls_w_ref, cls_b_ref,
    logits_ref, loss_ref,
):
    f32 = jnp.float32
    scale = 1.0 / math.sqrt(HEAD_DIM)

    # --- patch embedding (+ [CLS] token blend + position embeddings) ---
    emb = jnp.dot(patches_ref[...], patch_w_ref[...],
                  preferred_element_type=f32) + patch_b_ref[...]          # (BS, H)
    cmask = cls_mask_ref[...]                                             # (BS, 1)
    h = cmask * cls_tok_ref[...] + (1.0 - cmask) * emb + pos_ref[...]     # (BS, H)

    attn_bias = attn_bias_ref[...]                                        # (BS, BS)

    # --- transformer encoder: layers and heads fully unrolled, all data in VMEM/vregs ---
    for l in range(LAYERS):
        # attention block (pre-LN)
        x1 = _layer_norm(h, ln1_g_ref[l], ln1_b_ref[l])
        attn_out = jnp.zeros_like(h)
        for hh in range(HEADS):
            i = l * HEADS + hh
            qh = jnp.dot(x1, q_w_ref[i], preferred_element_type=f32) + q_b_ref[i]   # (BS, Dh)
            kh = jnp.dot(x1, k_w_ref[i], preferred_element_type=f32) + k_b_ref[i]
            vh = jnp.dot(x1, v_w_ref[i], preferred_element_type=f32) + v_b_ref[i]
            # q @ k^T without materializing a transpose (contract on the head dim)
            s = jax.lax.dot_general(qh, kh, (((1,), (1,)), ((), ())),
                                    preferred_element_type=f32) * scale + attn_bias  # (BS, BS)
            m = jnp.max(s, axis=-1, keepdims=True)
            p = jnp.exp(s - m)
            p = p * pl.reciprocal(jnp.sum(p, axis=-1, keepdims=True), approx=True)
            ctx = jnp.dot(p, vh, preferred_element_type=f32)                          # (BS, Dh)
            # fold the output projection per head: concat_h(ctx_h) @ Wp == sum_h ctx_h @ Wp_h
            attn_out = attn_out + jnp.dot(ctx, proj_w_ref[i], preferred_element_type=f32)
        h = h + attn_out + proj_b_ref[l]

        # MLP block (pre-LN)
        x2 = _layer_norm(h, ln2_g_ref[l], ln2_b_ref[l])
        mid = _gelu(jnp.dot(x2, fc1_w_ref[l], preferred_element_type=f32) + fc1_b_ref[l])
        h = h + jnp.dot(mid, fc2_w_ref[l], preferred_element_type=f32) + fc2_b_ref[l]

    # --- final LayerNorm, take [CLS] rows via selection matmul, classifier ---
    hf = _layer_norm(h, ln_f_g_ref[...], ln_f_b_ref[...])                 # (BS, H)
    cls_out = jnp.dot(cls_sel_ref[...], hf, preferred_element_type=f32)   # (B, H)
    # dropout(p=0.1) is identity in eval mode
    logits = jnp.dot(cls_out, cls_w_ref[...], preferred_element_type=f32) + cls_b_ref[...]
    logits_ref[...] = logits.astype(logits_ref.dtype)

    # --- CrossEntropyLoss (mean over batch), exact math ---
    z = logits
    m = jnp.max(z, axis=-1, keepdims=True)
    lse = m + jnp.log(jnp.sum(jnp.exp(z - m), axis=-1, keepdims=True))
    nll = lse - jnp.sum(onehot_ref[...] * z, axis=-1, keepdims=True)      # (B, 1)
    loss_ref[...] = jnp.sum(nll, axis=0, keepdims=True) / z.shape[0]      # (1, 1)


# ---------------- parameters (deterministic synthetic init) ----------------
def init_params(key):
    ks = jax.random.split(key, 10)

    def nrm(k, shape, std=0.02):
        return std * jax.random.normal(k, shape, jnp.float32)

    LH = LAYERS * HEADS
    return {
        # Conv2d(C, HIDDEN, k=P, s=P) folded into a matmul weight (C*P*P, HIDDEN)
        "patch_w": nrm(ks[0], (PATCH_DIM, HIDDEN)),
        "patch_b": jnp.zeros((1, HIDDEN), jnp.float32),
        "cls": nrm(ks[1], (1, HIDDEN)),
        "pos": nrm(ks[2], (SEQ, HIDDEN)),
        # per-layer params stacked on a leading layer axis; q/k/v/proj additionally split
        # per head on a leading (LAYERS*HEADS) axis so the kernel never lane-slices values
        "ln1_g": jnp.ones((LAYERS, 1, HIDDEN), jnp.float32),
        "ln1_b": jnp.zeros((LAYERS, 1, HIDDEN), jnp.float32),
        "q_w": nrm(ks[3], (LH, HIDDEN, HEAD_DIM)),
        "q_b": jnp.zeros((LH, 1, HEAD_DIM), jnp.float32),
        "k_w": nrm(ks[4], (LH, HIDDEN, HEAD_DIM)),
        "k_b": jnp.zeros((LH, 1, HEAD_DIM), jnp.float32),
        "v_w": nrm(ks[5], (LH, HIDDEN, HEAD_DIM)),
        "v_b": jnp.zeros((LH, 1, HEAD_DIM), jnp.float32),
        "proj_w": nrm(ks[6], (LH, HEAD_DIM, HIDDEN)),
        "proj_b": jnp.zeros((LAYERS, 1, HIDDEN), jnp.float32),
        "ln2_g": jnp.ones((LAYERS, 1, HIDDEN), jnp.float32),
        "ln2_b": jnp.zeros((LAYERS, 1, HIDDEN), jnp.float32),
        "fc1_w": nrm(ks[7], (LAYERS, HIDDEN, MLP)),
        "fc1_b": jnp.zeros((LAYERS, 1, MLP), jnp.float32),
        "fc2_w": nrm(ks[8], (LAYERS, MLP, HIDDEN)),
        "fc2_b": jnp.zeros((LAYERS, 1, HIDDEN), jnp.float32),
        "ln_f_g": jnp.ones((1, HIDDEN), jnp.float32),
        "ln_f_b": jnp.zeros((1, HIDDEN), jnp.float32),
        "cls_w": nrm(ks[9], (HIDDEN, NUM_LABELS)),
        "cls_b": jnp.zeros((1, NUM_LABELS), jnp.float32),
    }


# ---------------- forward pass (one fused pallas_call) ----------------
def vit_forward(params, pixel_values, labels):
    B = pixel_values.shape[0]
    BS = B * SEQ

    # --- host glue: im2col patch extraction + tiny constants (no hot-path compute) ---
    x = pixel_values.reshape(B, CHANNELS, IMG // PATCH, PATCH, IMG // PATCH, PATCH)
    patches = x.transpose(0, 2, 4, 1, 3, 5).reshape(B, NUM_PATCHES, PATCH_DIM)
    # prepend a zero row per image for the [CLS] slot -> flat (B*SEQ, C*P*P) token slab
    patches_full = jnp.concatenate(
        [jnp.zeros((B, 1, PATCH_DIM), jnp.float32), patches], axis=1).reshape(BS, PATCH_DIM)

    onehot = jax.nn.one_hot(labels, NUM_LABELS, dtype=jnp.float32)

    rows = jnp.arange(BS)
    cls_mask = (rows % SEQ == 0).astype(jnp.float32).reshape(BS, 1)          # 1 on [CLS] rows
    same_batch = (rows[:, None] // SEQ) == (rows[None, :] // SEQ)
    attn_bias = jnp.where(same_batch, 0.0, -1e30).astype(jnp.float32)        # block-diag mask
    cls_sel = (rows[None, :] == (jnp.arange(B) * SEQ)[:, None]).astype(jnp.float32)  # (B, BS)
    pos_full = jnp.tile(params["pos"], (B, 1))                               # (BS, HIDDEN)

    inputs = [
        patches_full, onehot, cls_mask, attn_bias, cls_sel, pos_full, params["cls"],
        params["patch_w"], params["patch_b"],
        params["ln1_g"], params["ln1_b"],
        params["q_w"], params["q_b"], params["k_w"], params["k_b"],
        params["v_w"], params["v_b"],
        params["proj_w"], params["proj_b"],
        params["ln2_g"], params["ln2_b"],
        params["fc1_w"], params["fc1_b"], params["fc2_w"], params["fc2_b"],
        params["ln_f_g"], params["ln_f_b"], params["cls_w"], params["cls_b"],
    ]

    logits, loss = pl.pallas_call(
        _vit_fused_kernel,
        out_shape=(jax.ShapeDtypeStruct((B, NUM_LABELS), jnp.float32),
                   jax.ShapeDtypeStruct((1, 1), jnp.float32)),
        in_specs=[_fullspec(a.shape) for a in inputs],
        out_specs=(_fullspec((B, NUM_LABELS)), _fullspec((1, 1))),
    )(*inputs)
    return logits, loss[0, 0]


if __name__ == "__main__":
    key = jax.random.PRNGKey(0)
    pkey, xkey, lkey = jax.random.split(key, 3)

    params = init_params(pkey)
    pixel_values = jax.random.normal(xkey, (2, CHANNELS, IMG, IMG), jnp.float32)
    labels = jax.random.randint(lkey, (2,), 0, NUM_LABELS)

    fwd = jax.jit(vit_forward)
    logits, loss = fwd(params, pixel_values, labels)
    logits = jax.block_until_ready(logits)
    loss = jax.block_until_ready(loss)
    loss_val = float(loss)  # mirrors loss.item()

    assert logits.shape == (2, NUM_LABELS)
    assert math.isfinite(loss_val)
    print("KERNEL_OK")
</pallas_src>

<mosaic_0001>
module attributes {stable_mosaic.version = 11 : i64} {
  func.func @_vit_fused_kernel(%arg0: memref<10x192xf32, #tpu.memory_space<vmem>>, %arg1: memref<2x3xf32, #tpu.memory_space<vmem>>, %arg2: memref<10x1xf32, #tpu.memory_space<vmem>>, %arg3: memref<10x10xf32, #tpu.memory_space<vmem>>, %arg4: memref<2x10xf32, #tpu.memory_space<vmem>>, %arg5: memref<10x32xf32, #tpu.memory_space<vmem>>, %arg6: memref<1x32xf32, #tpu.memory_space<vmem>>, %arg7: memref<192x32xf32, #tpu.memory_space<vmem>>, %arg8: memref<1x32xf32, #tpu.memory_space<vmem>>, %arg9: memref<2x1x32xf32, #tpu.memory_space<vmem>>, %arg10: memref<2x1x32xf32, #tpu.memory_space<vmem>>, %arg11: memref<8x32x8xf32, #tpu.memory_space<vmem>>, %arg12: memref<8x1x8xf32, #tpu.memory_space<vmem>>, %arg13: memref<8x32x8xf32, #tpu.memory_space<vmem>>, %arg14: memref<8x1x8xf32, #tpu.memory_space<vmem>>, %arg15: memref<8x32x8xf32, #tpu.memory_space<vmem>>, %arg16: memref<8x1x8xf32, #tpu.memory_space<vmem>>, %arg17: memref<8x8x32xf32, #tpu.memory_space<vmem>>, %arg18: memref<2x1x32xf32, #tpu.memory_space<vmem>>, %arg19: memref<2x1x32xf32, #tpu.memory_space<vmem>>, %arg20: memref<2x1x32xf32, #tpu.memory_space<vmem>>, %arg21: memref<2x32x64xf32, #tpu.memory_space<vmem>>, %arg22: memref<2x1x64xf32, #tpu.memory_space<vmem>>, %arg23: memref<2x64x32xf32, #tpu.memory_space<vmem>>, %arg24: memref<2x1x32xf32, #tpu.memory_space<vmem>>, %arg25: memref<1x32xf32, #tpu.memory_space<vmem>>, %arg26: memref<1x32xf32, #tpu.memory_space<vmem>>, %arg27: memref<32x3xf32, #tpu.memory_space<vmem>>, %arg28: memref<1x3xf32, #tpu.memory_space<vmem>>, %arg29: memref<2x3xf32, #tpu.memory_space<vmem>>, %arg30: memref<1x1xf32, #tpu.memory_space<vmem>>) attributes {dimension_semantics = [], scalar_prefetch = 0 : i64, scratch_operands = 0 : i64, tpu.core_type = #tpu.core_type<tc>} {
    %c0 = arith.constant 0 : index
    %c0_0 = arith.constant 0 : index
    %0 = vector.load %arg0[%c0, %c0_0] : memref<10x192xf32, #tpu.memory_space<vmem>>, vector<10x192xf32>
    %c0_1 = arith.constant 0 : index
    %c0_2 = arith.constant 0 : index
    %1 = vector.load %arg7[%c0_1, %c0_2] : memref<192x32xf32, #tpu.memory_space<vmem>>, vector<192x32xf32>
    %cst = arith.constant dense<0.000000e+00> : vector<10x32xf32>
    %2 = tpu.matmul %0, %1, %cst {dimension_numbers = #tpu.dot_dimension_numbers<[1], [0], [0], [1], [0, 0, 1, 1], [], []>} : vector<10x192xf32>, vector<192x32xf32>, vector<10x32xf32> -> vector<10x32xf32>
    %c0_3 = arith.constant 0 : index
    %c0_4 = arith.constant 0 : index
    %3 = vector.load %arg8[%c0_3, %c0_4] : memref<1x32xf32, #tpu.memory_space<vmem>>, vector<1x32xf32>
    %4 = vector.broadcast %3 : vector<1x32xf32> to vector<10x32xf32>
    %5 = arith.addf %2, %4 : vector<10x32xf32>
    %c0_5 = arith.constant 0 : index
    %c0_6 = arith.constant 0 : index
    %6 = vector.load %arg2[%c0_5, %c0_6] : memref<10x1xf32, #tpu.memory_space<vmem>>, vector<10x1xf32>
    %c0_7 = arith.constant 0 : index
    %c0_8 = arith.constant 0 : index
    %7 = vector.load %arg6[%c0_7, %c0_8] : memref<1x32xf32, #tpu.memory_space<vmem>>, vector<1x32xf32>
    %8 = vector.broadcast %6 : vector<10x1xf32> to vector<10x32xf32>
    %9 = vector.broadcast %7 : vector<1x32xf32> to vector<10x32xf32>
    %10 = arith.mulf %8, %9 : vector<10x32xf32>
    %cst_9 = arith.constant 1.000000e+00 : f32
    %11 = vector.broadcast %cst_9 : f32 to vector<10x1xf32>
    %12 = arith.subf %11, %6 : vector<10x1xf32>
    %13 = vector.broadcast %12 : vector<10x1xf32> to vector<10x32xf32>
    %14 = arith.mulf %13, %5 : vector<10x32xf32>
    %15 = arith.addf %10, %14 : vector<10x32xf32>
    %c0_10 = arith.constant 0 : index
    %c0_11 = arith.constant 0 : index
    %16 = vector.load %arg5[%c0_10, %c0_11] : memref<10x32xf32, #tpu.memory_space<vmem>>, vector<10x32xf32>
    %17 = arith.addf %15, %16 : vector<10x32xf32>
    %c0_12 = arith.constant 0 : index
    %c0_13 = arith.constant 0 : index
    %18 = vector.load %arg3[%c0_12, %c0_13] : memref<10x10xf32, #tpu.memory_space<vmem>>, vector<10x10xf32>
    %c0_14 = arith.constant 0 : index
    %c0_15 = arith.constant 0 : index
    %c0_16 = arith.constant 0 : index
    %19 = vector.load %arg9[%c0_14, %c0_15, %c0_16] : memref<2x1x32xf32, #tpu.memory_space<vmem>>, vector<1x1x32xf32>
    %20 = vector.shape_cast %19 : vector<1x1x32xf32> to vector<1x32xf32>
    %c0_17 = arith.constant 0 : index
    %c0_18 = arith.constant 0 : index
    %c0_19 = arith.constant 0 : index
    %21 = vector.load %arg10[%c0_17, %c0_18, %c0_19] : memref<2x1x32xf32, #tpu.memory_space<vmem>>, vector<1x1x32xf32>
    %22 = vector.shape_cast %21 : vector<1x1x32xf32> to vector<1x32xf32>
    %cst_20 = arith.constant dense<0.000000e+00> : vector<10xf32>
    %23 = vector.multi_reduction <add>, %17, %cst_20 [1] : vector<10x32xf32> to vector<10xf32>
    %24 = vector.shape_cast %23 : vector<10xf32> to vector<10x1xf32>
    %cst_21 = arith.constant 3.200000e+01 : f32
    %25 = vector.broadcast %cst_21 : f32 to vector<10x1xf32>
    %26 = arith.divf %24, %25 : vector<10x1xf32>
    %27 = vector.broadcast %26 : vector<10x1xf32> to vector<10x32xf32>
    %28 = arith.subf %17, %27 : vector<10x32xf32>
    %29 = arith.mulf %28, %28 : vector<10x32xf32>
    %cst_22 = arith.constant dense<0.000000e+00> : vector<10xf32>
    %30 = vector.multi_reduction <add>, %29, %cst_22 [1] : vector<10x32xf32> to vector<10xf32>
    %31 = vector.shape_cast %30 : vector<10xf32> to vector<10x1xf32>
    %cst_23 = arith.constant 3.200000e+01 : f32
    %32 = vector.broadcast %cst_23 : f32 to vector<10x1xf32>
    %33 = arith.divf %31, %32 : vector<10x1xf32>
    %34 = vector.broadcast %26 : vector<10x1xf32> to vector<10x32xf32>
    %35 = arith.subf %17, %34 : vector<10x32xf32>
    %cst_24 = arith.constant 9.99999996E-13 : f32
    %36 = vector.broadcast %cst_24 : f32 to vector<10x1xf32>
    %37 = arith.addf %33, %36 : vector<10x1xf32>
    %38 = math.rsqrt %37 : vector<10x1xf32>
    %39 = vector.broadcast %38 : vector<10x1xf32> to vector<10x32xf32>
    %40 = arith.mulf %35, %39 : vector<10x32xf32>
    %41 = vector.broadcast %20 : vector<1x32xf32> to vector<10x32xf32>
    %42 = arith.mulf %40, %41 : vector<10x32xf32>
    %43 = vector.broadcast %22 : vector<1x32xf32> to vector<10x32xf32>
    %44 = arith.addf %42, %43 : vector<10x32xf32>
    %cst_25 = arith.constant 0.000000e+00 : f32
    %45 = vector.broadcast %cst_25 : f32 to vector<10x32xf32>
    %c0_26 = arith.constant 0 : index
    %c0_27 = arith.constant 0 : index
    %c0_28 = arith.constant 0 : index
    %46 = vector.load %arg11[%c0_26, %c0_27, %c0_28] : memref<8x32x8xf32, #tpu.memory_space<vmem>>, vector<1x32x8xf32>
    %47 = vector.shape_cast %46 : vector<1x32x8xf32> to vector<32x8xf32>
    %cst_29 = arith.constant dense<0.000000e+00> : vector<10x8xf32>
    %48 = tpu.matmul %44, %47, %cst_29 {dimension_numbers = #tpu.dot_dimension_numbers<[1], [0], [0], [1], [0, 0, 1, 1], [], []>} : vector<10x32xf32>, vector<32x8xf32>, vector<10x8xf32> -> vector<10x8xf32>
    %c0_30 = arith.constant 0 : index
    %c0_31 = arith.constant 0 : index
    %c0_32 = arith.constant 0 : index
    %49 = vector.load %arg12[%c0_30, %c0_31, %c0_32] : memref<8x1x8xf32, #tpu.memory_space<vmem>>, vector<1x1x8xf32>
    %50 = vector.shape_cast %49 : vector<1x1x8xf32> to vector<1x8xf32>
    %51 = vector.broadcast %50 : vector<1x8xf32> to vector<10x8xf32>
    %52 = arith.addf %48, %51 : vector<10x8xf32>
    %c0_33 = arith.constant 0 : index
    %c0_34 = arith.constant 0 : index
    %c0_35 = arith.constant 0 : index
    %53 = vector.load %arg13[%c0_33, %c0_34, %c0_35] : memref<8x32x8xf32, #tpu.memory_space<vmem>>, vector<1x32x8xf32>
    %54 = vector.shape_cast %53 : vector<1x32x8xf32> to vector<32x8xf32>
    %cst_36 = arith.constant dense<0.000000e+00> : vector<10x8xf32>
    %55 = tpu.matmul %44, %54, %cst_36 {dimension_numbers = #tpu.dot_dimension_numbers<[1], [0], [0], [1], [0, 0, 1, 1], [], []>} : vector<10x32xf32>, vector<32x8xf32>, vector<10x8xf32> -> vector<10x8xf32>
    %c0_37 = arith.constant 0 : index
    %c0_38 = arith.constant 0 : index
    %c0_39 = arith.constant 0 : index
    %56 = vector.load %arg14[%c0_37, %c0_38, %c0_39] : memref<8x1x8xf32, #tpu.memory_space<vmem>>, vector<1x1x8xf32>
    %57 = vector.shape_cast %56 : vector<1x1x8xf32> to vector<1x8xf32>
    %58 = vector.broadcast %57 : vector<1x8xf32> to vector<10x8xf32>
    %59 = arith.addf %55, %58 : vector<10x8xf32>
    %c0_40 = arith.constant 0 : index
    %c0_41 = arith.constant 0 : index
    %c0_42 = arith.constant 0 : index
    %60 = vector.load %arg15[%c0_40, %c0_41, %c0_42] : memref<8x32x8xf32, #tpu.memory_space<vmem>>, vector<1x32x8xf32>
    %61 = vector.shape_cast %60 : vector<1x32x8xf32> to vector<32x8xf32>
    %cst_43 = arith.constant dense<0.000000e+00> : vector<10x8xf32>
    %62 = tpu.matmul %44, %61, %cst_43 {dimension_numbers = #tpu.dot_dimension_numbers<[1], [0], [0], [1], [0, 0, 1, 1], [], []>} : vector<10x32xf32>, vector<32x8xf32>, vector<10x8xf32> -> vector<10x8xf32>
    %c0_44 = arith.constant 0 : index
    %c0_45 = arith.constant 0 : index
    %c0_46 = arith.constant 0 : index
    %63 = vector.load %arg16[%c0_44, %c0_45, %c0_46] : memref<8x1x8xf32, #tpu.memory_space<vmem>>, vector<1x1x8xf32>
    %64 = vector.shape_cast %63 : vector<1x1x8xf32> to vector<1x8xf32>
    %65 = vector.broadcast %64 : vector<1x8xf32> to vector<10x8xf32>
    %66 = arith.addf %62, %65 : vector<10x8xf32>
    %cst_47 = arith.constant dense<0.000000e+00> : vector<10x10xf32>
    %67 = tpu.matmul %52, %59, %cst_47 {dimension_numbers = #tpu.dot_dimension_numbers<[1], [1], [0], [0], [0, 0, 1, 0], [], []>} : vector<10x8xf32>, vector<10x8xf32>, vector<10x10xf32> -> vector<10x10xf32>
    %cst_48 = arith.constant 0.353553385 : f32
    %68 = vector.broadcast %cst_48 : f32 to vector<10x10xf32>
    %69 = arith.mulf %67, %68 : vector<10x10xf32>
    %70 = arith.addf %69, %18 : vector<10x10xf32>
    %cst_49 = arith.constant dense<0xFF800000> : vector<10xf32>
    %71 = vector.multi_reduction <maximumf>, %70, %cst_49 [1] : vector<10x10xf32> to vector<10xf32>
    %72 = vector.shape_cast %71 : vector<10xf32> to vector<10x1xf32>
    %73 = vector.broadcast %72 : vector<10x1xf32> to vector<10x10xf32>
    %74 = arith.subf %70, %73 : vector<10x10xf32>
    %75 = math.exp %74 : vector<10x10xf32>
    %cst_50 = arith.constant dense<0.000000e+00> : vector<10xf32>
    %76 = vector.multi_reduction <add>, %75, %cst_50 [1] : vector<10x10xf32> to vector<10xf32>
    %77 = vector.shape_cast %76 : vector<10xf32> to vector<10x1xf32>
    %78 = tpu.reciprocal %77 {approx = true} : vector<10x1xf32> -> vector<10x1xf32>
    %79 = vector.broadcast %78 : vector<10x1xf32> to vector<10x10xf32>
    %80 = arith.mulf %75, %79 : vector<10x10xf32>
    %cst_51 = arith.constant dense<0.000000e+00> : vector<10x8xf32>
    %81 = tpu.matmul %80, %66, %cst_51 {dimension_numbers = #tpu.dot_dimension_numbers<[1], [0], [0], [1], [0, 0, 1, 1], [], []>} : vector<10x10xf32>, vector<10x8xf32>, vector<10x8xf32> -> vector<10x8xf32>
    %c0_52 = arith.constant 0 : index
    %c0_53 = arith.constant 0 : index
    %c0_54 = arith.constant 0 : index
    %82 = vector.load %arg17[%c0_52, %c0_53, %c0_54] : memref<8x8x32xf32, #tpu.memory_space<vmem>>, vector<1x8x32xf32>
    %83 = vector.shape_cast %82 : vector<1x8x32xf32> to vector<8x32xf32>
    %cst_55 = arith.constant dense<0.000000e+00> : vector<10x32xf32>
    %84 = tpu.matmul %81, %83, %cst_55 {dimension_numbers = #tpu.dot_dimension_numbers<[1], [0], [0], [1], [0, 0, 1, 1], [], []>} : vector<10x8xf32>, vector<8x32xf32>, vector<10x32xf32> -> vector<10x32xf32>
    %85 = arith.addf %45, %84 : vector<10x32xf32>
    %c1 = arith.constant 1 : index
    %c0_56 = arith.constant 0 : index
    %c0_57 = arith.constant 0 : index
    %86 = vector.load %arg11[%c1, %c0_56, %c0_57] : memref<8x32x8xf32, #tpu.memory_space<vmem>>, vector<1x32x8xf32>
    %87 = vector.shape_cast %86 : vector<1x32x8xf32> to vector<32x8xf32>
    %cst_58 = arith.constant dense<0.000000e+00> : vector<10x8xf32>
    %88 = tpu.matmul %44, %87, %cst_58 {dimension_numbers = #tpu.dot_dimension_numbers<[1], [0], [0], [1], [0, 0, 1, 1], [], []>} : vector<10x32xf32>, vector<32x8xf32>, vector<10x8xf32> -> vector<10x8xf32>
    %c1_59 = arith.constant 1 : index
    %c0_60 = arith.constant 0 : index
    %c0_61 = arith.constant 0 : index
    %89 = vector.load %arg12[%c1_59, %c0_60, %c0_61] : memref<8x1x8xf32, #tpu.memory_space<vmem>>, vector<1x1x8xf32>
    %90 = vector.shape_cast %89 : vector<1x1x8xf32> to vector<1x8xf32>
    %91 = vector.broadcast %90 : vector<1x8xf32> to vector<10x8xf32>
    %92 = arith.addf %88, %91 : vector<10x8xf32>
    %c1_62 = arith.constant 1 : index
    %c0_63 = arith.constant 0 : index
    %c0_64 = arith.constant 0 : index
    %93 = vector.load %arg13[%c1_62, %c0_63, %c0_64] : memref<8x32x8xf32, #tpu.memory_space<vmem>>, vector<1x32x8xf32>
    %94 = vector.shape_cast %93 : vector<1x32x8xf32> to vector<32x8xf32>
    %cst_65 = arith.constant dense<0.000000e+00> : vector<10x8xf32>
    %95 = tpu.matmul %44, %94, %cst_65 {dimension_numbers = #tpu.dot_dimension_numbers<[1], [0], [0], [1], [0, 0, 1, 1], [], []>} : vector<10x32xf32>, vector<32x8xf32>, vector<10x8xf32> -> vector<10x8xf32>
    %c1_66 = arith.constant 1 : index
    %c0_67 = arith.constant 0 : index
    %c0_68 = arith.constant 0 : index
    %96 = vector.load %arg14[%c1_66, %c0_67, %c0_68] : memref<8x1x8xf32, #tpu.memory_space<vmem>>, vector<1x1x8xf32>
    %97 = vector.shape_cast %96 : vector<1x1x8xf32> to vector<1x8xf32>
    %98 = vector.broadcast %97 : vector<1x8xf32> to vector<10x8xf32>
    %99 = arith.addf %95, %98 : vector<10x8xf32>
    %c1_69 = arith.constant 1 : index
    %c0_70 = arith.constant 0 : index
    %c0_71 = arith.constant 0 : index
    %100 = vector.load %arg15[%c1_69, %c0_70, %c0_71] : memref<8x32x8xf32, #tpu.memory_space<vmem>>, vector<1x32x8xf32>
    %101 = vector.shape_cast %100 : vector<1x32x8xf32> to vector<32x8xf32>
    %cst_72 = arith.constant dense<0.000000e+00> : vector<10x8xf32>
    %102 = tpu.matmul %44, %101, %cst_72 {dimension_numbers = #tpu.dot_dimension_numbers<[1], [0], [0], [1], [0, 0, 1, 1], [], []>} : vector<10x32xf32>, vector<32x8xf32>, vector<10x8xf32> -> vector<10x8xf32>
    %c1_73 = arith.constant 1 : index
    %c0_74 = arith.constant 0 : index
    %c0_75 = arith.constant 0 : index
    %103 = vector.load %arg16[%c1_73, %c0_74, %c0_75] : memref<8x1x8xf32, #tpu.memory_space<vmem>>, vector<1x1x8xf32>
    %104 = vector.shape_cast %103 : vector<1x1x8xf32> to vector<1x8xf32>
    %105 = vector.broadcast %104 : vector<1x8xf32> to vector<10x8xf32>
    %106 = arith.addf %102, %105 : vector<10x8xf32>
    %cst_76 = arith.constant dense<0.000000e+00> : vector<10x10xf32>
    %107 = tpu.matmul %92, %99, %cst_76 {dimension_numbers = #tpu.dot_dimension_numbers<[1], [1], [0], [0], [0, 0, 1, 0], [], []>} : vector<10x8xf32>, vector<10x8xf32>, vector<10x10xf32> -> vector<10x10xf32>
    %cst_77 = arith.constant 0.353553385 : f32
    %108 = vector.broadcast %cst_77 : f32 to vector<10x10xf32>
    %109 = arith.mulf %107, %108 : vector<10x10xf32>
    %110 = arith.addf %109, %18 : vector<10x10xf32>
    %cst_78 = arith.constant dense<0xFF800000> : vector<10xf32>
    %111 = vector.multi_reduction <maximumf>, %110, %cst_78 [1] : vector<10x10xf32> to vector<10xf32>
    %112 = vector.shape_cast %111 : vector<10xf32> to vector<10x1xf32>
    %113 = vector.broadcast %112 : vector<10x1xf32> to vector<10x10xf32>
    %114 = arith.subf %110, %113 : vector<10x10xf32>
    %115 = math.exp %114 : vector<10x10xf32>
    %cst_79 = arith.constant dense<0.000000e+00> : vector<10xf32>
    %116 = vector.multi_reduction <add>, %115, %cst_79 [1] : vector<10x10xf32> to vector<10xf32>
    %117 = vector.shape_cast %116 : vector<10xf32> to vector<10x1xf32>
    %118 = tpu.reciprocal %117 {approx = true} : vector<10x1xf32> -> vector<10x1xf32>
    %119 = vector.broadcast %118 : vector<10x1xf32> to vector<10x10xf32>
    %120 = arith.mulf %115, %119 : vector<10x10xf32>
    %cst_80 = arith.constant dense<0.000000e+00> : vector<10x8xf32>
    %121 = tpu.matmul %120, %106, %cst_80 {dimension_numbers = #tpu.dot_dimension_numbers<[1], [0], [0], [1], [0, 0, 1, 1], [], []>} : vector<10x10xf32>, vector<10x8xf32>, vector<10x8xf32> -> vector<10x8xf32>
    %c1_81 = arith.constant 1 : index
    %c0_82 = arith.constant 0 : index
    %c0_83 = arith.constant 0 : index
    %122 = vector.load %arg17[%c1_81, %c0_82, %c0_83] : memref<8x8x32xf32, #tpu.memory_space<vmem>>, vector<1x8x32xf32>
    %123 = vector.shape_cast %122 : vector<1x8x32xf32> to vector<8x32xf32>
    %cst_84 = arith.constant dense<0.000000e+00> : vector<10x32xf32>
    %124 = tpu.matmul %121, %123, %cst_84 {dimension_numbers = #tpu.dot_dimension_numbers<[1], [0], [0], [1], [0, 0, 1, 1], [], []>} : vector<10x8xf32>, vector<8x32xf32>, vector<10x32xf32> -> vector<10x32xf32>
    %125 = arith.addf %85, %124 : vector<10x32xf32>
    %c2 = arith.constant 2 : index
    %c0_85 = arith.constant 0 : index
    %c0_86 = arith.constant 0 : index
    %126 = vector.load %arg11[%c2, %c0_85, %c0_86] : memref<8x32x8xf32, #tpu.memory_space<vmem>>, vector<1x32x8xf32>
    %127 = vector.shape_cast %126 : vector<1x32x8xf32> to vector<32x8xf32>
    %cst_87 = arith.constant dense<0.000000e+00> : vector<10x8xf32>
    %128 = tpu.matmul %44, %127, %cst_87 {dimension_numbers = #tpu.dot_dimension_numbers<[1], [0], [0], [1], [0, 0, 1, 1], [], []>} : vector<10x32xf32>, vector<32x8xf32>, vector<10x8xf32> -> vector<10x8xf32>
    %c2_88 = arith.constant 2 : index
    %c0_89 = arith.constant 0 : index
    %c0_90 = arith.constant 0 : index
    %129 = vector.load %arg12[%c2_88, %c0_89, %c0_90] : memref<8x1x8xf32, #tpu.memory_space<vmem>>, vector<1x1x8xf32>
    %130 = vector.shape_cast %129 : vector<1x1x8xf32> to vector<1x8xf32>
    %131 = vector.broadcast %130 : vector<1x8xf32> to vector<10x8xf32>
    %132 = arith.addf %128, %131 : vector<10x8xf32>
    %c2_91 = arith.constant 2 : index
    %c0_92 = arith.constant 0 : index
    %c0_93 = arith.constant 0 : index
    %133 = vector.load %arg13[%c2_91, %c0_92, %c0_93] : memref<8x32x8xf32, #tpu.memory_space<vmem>>, vector<1x32x8xf32>
    %134 = vector.shape_cast %133 : vector<1x32x8xf32> to vector<32x8xf32>
    %cst_94 = arith.constant dense<0.000000e+00> : vector<10x8xf32>
    %135 = tpu.matmul %44, %134, %cst_94 {dimension_numbers = #tpu.dot_dimension_numbers<[1], [0], [0], [1], [0, 0, 1, 1], [], []>} : vector<10x32xf32>, vector<32x8xf32>, vector<10x8xf32> -> vector<10x8xf32>
    %c2_95 = arith.constant 2 : index
    %c0_96 = arith.constant 0 : index
    %c0_97 = arith.constant 0 : index
    %136 = vector.load %arg14[%c2_95, %c0_96, %c0_97] : memref<8x1x8xf32, #tpu.memory_space<vmem>>, vector<1x1x8xf32>
    %137 = vector.shape_cast %136 : vector<1x1x8xf32> to vector<1x8xf32>
    %138 = vector.broadcast %137 : vector<1x8xf32> to vector<10x8xf32>
    %139 = arith.addf %135, %138 : vector<10x8xf32>
    %c2_98 = arith.constant 2 : index
    %c0_99 = arith.constant 0 : index
    %c0_100 = arith.constant 0 : index
    %140 = vector.load %arg15[%c2_98, %c0_99, %c0_100] : memref<8x32x8xf32, #tpu.memory_space<vmem>>, vector<1x32x8xf32>
    %141 = vector.shape_cast %140 : vector<1x32x8xf32> to vector<32x8xf32>
    %cst_101 = arith.constant dense<0.000000e+00> : vector<10x8xf32>
    %142 = tpu.matmul %44, %141, %cst_101 {dimension_numbers = #tpu.dot_dimension_numbers<[1], [0], [0], [1], [0, 0, 1, 1], [], []>} : vector<10x32xf32>, vector<32x8xf32>, vector<10x8xf32> -> vector<10x8xf32>
    %c2_102 = arith.constant 2 : index
    %c0_103 = arith.constant 0 : index
    %c0_104 = arith.constant 0 : index
    %143 = vector.load %arg16[%c2_102, %c0_103, %c0_104] : memref<8x1x8xf32, #tpu.memory_space<vmem>>, vector<1x1x8xf32>
    %144 = vector.shape_cast %143 : vector<1x1x8xf32> to vector<1x8xf32>
    %145 = vector.broadcast %144 : vector<1x8xf32> to vector<10x8xf32>
    %146 = arith.addf %142, %145 : vector<10x8xf32>
    %cst_105 = arith.constant dense<0.000000e+00> : vector<10x10xf32>
    %147 = tpu.matmul %132, %139, %cst_105 {dimension_numbers = #tpu.dot_dimension_numbers<[1], [1], [0], [0], [0, 0, 1, 0], [], []>} : vector<10x8xf32>, vector<10x8xf32>, vector<10x10xf32> -> vector<10x10xf32>
    %cst_106 = arith.constant 0.353553385 : f32
    %148 = vector.broadcast %cst_106 : f32 to vector<10x10xf32>
    %149 = arith.mulf %147, %148 : vector<10x10xf32>
    %150 = arith.addf %149, %18 : vector<10x10xf32>
    %cst_107 = arith.constant dense<0xFF800000> : vector<10xf32>
    %151 = vector.multi_reduction <maximumf>, %150, %cst_107 [1] : vector<10x10xf32> to vector<10xf32>
    %152 = vector.shape_cast %151 : vector<10xf32> to vector<10x1xf32>
    %153 = vector.broadcast %152 : vector<10x1xf32> to vector<10x10xf32>
    %154 = arith.subf %150, %153 : vector<10x10xf32>
    %155 = math.exp %154 : vector<10x10xf32>
    %cst_108 = arith.constant dense<0.000000e+00> : vector<10xf32>
    %156 = vector.multi_reduction <add>, %155, %cst_108 [1] : vector<10x10xf32> to vector<10xf32>
    %157 = vector.shape_cast %156 : vector<10xf32> to vector<10x1xf32>
    %158 = tpu.reciprocal %157 {approx = true} : vector<10x1xf32> -> vector<10x1xf32>
    %159 = vector.broadcast %158 : vector<10x1xf32> to vector<10x10xf32>
    %160 = arith.mulf %155, %159 : vector<10x10xf32>
    %cst_109 = arith.constant dense<0.000000e+00> : vector<10x8xf32>
    %161 = tpu.matmul %160, %146, %cst_109 {dimension_numbers = #tpu.dot_dimension_numbers<[1], [0], [0], [1], [0, 0, 1, 1], [], []>} : vector<10x10xf32>, vector<10x8xf32>, vector<10x8xf32> -> vector<10x8xf32>
    %c2_110 = arith.constant 2 : index
    %c0_111 = arith.constant 0 : index
    %c0_112 = arith.constant 0 : index
    %162 = vector.load %arg17[%c2_110, %c0_111, %c0_112] : memref<8x8x32xf32, #tpu.memory_space<vmem>>, vector<1x8x32xf32>
    %163 = vector.shape_cast %162 : vector<1x8x32xf32> to vector<8x32xf32>
    %cst_113 = arith.constant dense<0.000000e+00> : vector<10x32xf32>
    %164 = tpu.matmul %161, %163, %cst_113 {dimension_numbers = #tpu.dot_dimension_numbers<[1], [0], [0], [1], [0, 0, 1, 1], [], []>} : vector<10x8xf32>, vector<8x32xf32>, vector<10x32xf32> -> vector<10x32xf32>
    %165 = arith.addf %125, %164 : vector<10x32xf32>
    %c3 = arith.constant 3 : index
    %c0_114 = arith.constant 0 : index
    %c0_115 = arith.constant 0 : index
    %166 = vector.load %arg11[%c3, %c0_114, %c0_115] : memref<8x32x8xf32, #tpu.memory_space<vmem>>, vector<1x32x8xf32>
    %167 = vector.shape_cast %166 : vector<1x32x8xf32> to vector<32x8xf32>
    %cst_116 = arith.constant dense<0.000000e+00> : vector<10x8xf32>
    %168 = tpu.matmul %44, %167, %cst_116 {dimension_numbers = #tpu.dot_dimension_numbers<[1], [0], [0], [1], [0, 0, 1, 1], [], []>} : vector<10x32xf32>, vector<32x8xf32>, vector<10x8xf32> -> vector<10x8xf32>
    %c3_117 = arith.constant 3 : index
    %c0_118 = arith.constant 0 : index
    %c0_119 = arith.constant 0 : index
    %169 = vector.load %arg12[%c3_117, %c0_118, %c0_119] : memref<8x1x8xf32, #tpu.memory_space<vmem>>, vector<1x1x8xf32>
    %170 = vector.shape_cast %169 : vector<1x1x8xf32> to vector<1x8xf32>
    %171 = vector.broadcast %170 : vector<1x8xf32> to vector<10x8xf32>
    %172 = arith.addf %168, %171 : vector<10x8xf32>
    %c3_120 = arith.constant 3 : index
    %c0_121 = arith.constant 0 : index
    %c0_122 = arith.constant 0 : index
    %173 = vector.load %arg13[%c3_120, %c0_121, %c0_122] : memref<8x32x8xf32, #tpu.memory_space<vmem>>, vector<1x32x8xf32>
    %174 = vector.shape_cast %173 : vector<1x32x8xf32> to vector<32x8xf32>
    %cst_123 = arith.constant dense<0.000000e+00> : vector<10x8xf32>
    %175 = tpu.matmul %44, %174, %cst_123 {dimension_numbers = #tpu.dot_dimension_numbers<[1], [0], [0], [1], [0, 0, 1, 1], [], []>} : vector<10x32xf32>, vector<32x8xf32>, vector<10x8xf32> -> vector<10x8xf32>
    %c3_124 = arith.constant 3 : index
    %c0_125 = arith.constant 0 : index
    %c0_126 = arith.constant 0 : index
    %176 = vector.load %arg14[%c3_124, %c0_125, %c0_126] : memref<8x1x8xf32, #tpu.memory_space<vmem>>, vector<1x1x8xf32>
    %177 = vector.shape_cast %176 : vector<1x1x8xf32> to vector<1x8xf32>
    %178 = vector.broadcast %177 : vector<1x8xf32> to vector<10x8xf32>
    %179 = arith.addf %175, %178 : vector<10x8xf32>
    %c3_127 = arith.constant 3 : index
    %c0_128 = arith.constant 0 : index
    %c0_129 = arith.constant 0 : index
    %180 = vector.load %arg15[%c3_127, %c0_128, %c0_129] : memref<8x32x8xf32, #tpu.memory_space<vmem>>, vector<1x32x8xf32>
    %181 = vector.shape_cast %180 : vector<1x32x8xf32> to vector<32x8xf32>
    %cst_130 = arith.constant dense<0.000000e+00> : vector<10x8xf32>
    %182 = tpu.matmul %44, %181, %cst_130 {dimension_numbers = #tpu.dot_dimension_numbers<[1], [0], [0], [1], [0, 0, 1, 1], [], []>} : vector<10x32xf32>, vector<32x8xf32>, vector<10x8xf32> -> vector<10x8xf32>
    %c3_131 = arith.constant 3 : index
    %c0_132 = arith.constant 0 : index
    %c0_133 = arith.constant 0 : index
    %183 = vector.load %arg16[%c3_131, %c0_132, %c0_133] : memref<8x1x8xf32, #tpu.memory_space<vmem>>, vector<1x1x8xf32>
    %184 = vector.shape_cast %183 : vector<1x1x8xf32> to vector<1x8xf32>
    %185 = vector.broadcast %184 : vector<1x8xf32> to vector<10x8xf32>
    %186 = arith.addf %182, %185 : vector<10x8xf32>
    %cst_134 = arith.constant dense<0.000000e+00> : vector<10x10xf32>
    %187 = tpu.matmul %172, %179, %cst_134 {dimension_numbers = #tpu.dot_dimension_numbers<[1], [1], [0], [0], [0, 0, 1, 0], [], []>} : vector<10x8xf32>, vector<10x8xf32>, vector<10x10xf32> -> vector<10x10xf32>
    %cst_135 = arith.constant 0.353553385 : f32
    %188 = vector.broadcast %cst_135 : f32 to vector<10x10xf32>
    %189 = arith.mulf %187, %188 : vector<10x10xf32>
    %190 = arith.addf %189, %18 : vector<10x10xf32>
    %cst_136 = arith.constant dense<0xFF800000> : vector<10xf32>
    %191 = vector.multi_reduction <maximumf>, %190, %cst_136 [1] : vector<10x10xf32> to vector<10xf32>
    %192 = vector.shape_cast %191 : vector<10xf32> to vector<10x1xf32>
    %193 = vector.broadcast %192 : vector<10x1xf32> to vector<10x10xf32>
    %194 = arith.subf %190, %193 : vector<10x10xf32>
    %195 = math.exp %194 : vector<10x10xf32>
    %cst_137 = arith.constant dense<0.000000e+00> : vector<10xf32>
    %196 = vector.multi_reduction <add>, %195, %cst_137 [1] : vector<10x10xf32> to vector<10xf32>
    %197 = vector.shape_cast %196 : vector<10xf32> to vector<10x1xf32>
    %198 = tpu.reciprocal %197 {approx = true} : vector<10x1xf32> -> vector<10x1xf32>
    %199 = vector.broadcast %198 : vector<10x1xf32> to vector<10x10xf32>
    %200 = arith.mulf %195, %199 : vector<10x10xf32>
    %cst_138 = arith.constant dense<0.000000e+00> : vector<10x8xf32>
    %201 = tpu.matmul %200, %186, %cst_138 {dimension_numbers = #tpu.dot_dimension_numbers<[1], [0], [0], [1], [0, 0, 1, 1], [], []>} : vector<10x10xf32>, vector<10x8xf32>, vector<10x8xf32> -> vector<10x8xf32>
    %c3_139 = arith.constant 3 : index
    %c0_140 = arith.constant 0 : index
    %c0_141 = arith.constant 0 : index
    %202 = vector.load %arg17[%c3_139, %c0_140, %c0_141] : memref<8x8x32xf32, #tpu.memory_space<vmem>>, vector<1x8x32xf32>
    %203 = vector.shape_cast %202 : vector<1x8x32xf32> to vector<8x32xf32>
    %cst_142 = arith.constant dense<0.000000e+00> : vector<10x32xf32>
    %204 = tpu.matmul %201, %203, %cst_142 {dimension_numbers = #tpu.dot_dimension_numbers<[1], [0], [0], [1], [0, 0, 1, 1], [], []>} : vector<10x8xf32>, vector<8x32xf32>, vector<10x32xf32> -> vector<10x32xf32>
    %205 = arith.addf %165, %204 : vector<10x32xf32>
    %206 = arith.addf %17, %205 : vector<10x32xf32>
    %c0_143 = arith.constant 0 : index
    %c0_144 = arith.constant 0 : index
    %c0_145 = arith.constant 0 : index
    %207 = vector.load %arg18[%c0_143, %c0_144, %c0_145] : memref<2x1x32xf32, #tpu.memory_space<vmem>>, vector<1x1x32xf32>
    %208 = vector.shape_cast %207 : vector<1x1x32xf32> to vector<1x32xf32>
    %209 = vector.broadcast %208 : vector<1x32xf32> to vector<10x32xf32>
    %210 = arith.addf %206, %209 : vector<10x32xf32>
    %c0_146 = arith.constant 0 : index
    %c0_147 = arith.constant 0 : index
    %c0_148 = arith.constant 0 : index
    %211 = vector.load %arg19[%c0_146, %c0_147, %c0_148] : memref<2x1x32xf32, #tpu.memory_space<vmem>>, vector<1x1x32xf32>
    %212 = vector.shape_cast %211 : vector<1x1x32xf32> to vector<1x32xf32>
    %c0_149 = arith.constant 0 : index
    %c0_150 = arith.constant 0 : index
    %c0_151 = arith.constant 0 : index
    %213 = vector.load %arg20[%c0_149, %c0_150, %c0_151] : memref<2x1x32xf32, #tpu.memory_space<vmem>>, vector<1x1x32xf32>
    %214 = vector.shape_cast %213 : vector<1x1x32xf32> to vector<1x32xf32>
    %cst_152 = arith.constant dense<0.000000e+00> : vector<10xf32>
    %215 = vector.multi_reduction <add>, %210, %cst_152 [1] : vector<10x32xf32> to vector<10xf32>
    %216 = vector.shape_cast %215 : vector<10xf32> to vector<10x1xf32>
    %cst_153 = arith.constant 3.200000e+01 : f32
    %217 = vector.broadcast %cst_153 : f32 to vector<10x1xf32>
    %218 = arith.divf %216, %217 : vector<10x1xf32>
    %219 = vector.broadcast %218 : vector<10x1xf32> to vector<10x32xf32>
    %220 = arith.subf %210, %219 : vector<10x32xf32>
    %221 = arith.mulf %220, %220 : vector<10x32xf32>
    %cst_154 = arith.constant dense<0.000000e+00> : vector<10xf32>
    %222 = vector.multi_reduction <add>, %221, %cst_154 [1] : vector<10x32xf32> to vector<10xf32>
    %223 = vector.shape_cast %222 : vector<10xf32> to vector<10x1xf32>
    %cst_155 = arith.constant 3.200000e+01 : f32
    %224 = vector.broadcast %cst_155 : f32 to vector<10x1xf32>
    %225 = arith.divf %223, %224 : vector<10x1xf32>
    %226 = vector.broadcast %218 : vector<10x1xf32> to vector<10x32xf32>
    %227 = arith.subf %210, %226 : vector<10x32xf32>
    %cst_156 = arith.constant 9.99999996E-13 : f32
    %228 = vector.broadcast %cst_156 : f32 to vector<10x1xf32>
    %229 = arith.addf %225, %228 : vector<10x1xf32>
    %230 = math.rsqrt %229 : vector<10x1xf32>
    %231 = vector.broadcast %230 : vector<10x1xf32> to vector<10x32xf32>
    %232 = arith.mulf %227, %231 : vector<10x32xf32>
    %233 = vector.broadcast %212 : vector<1x32xf32> to vector<10x32xf32>
    %234 = arith.mulf %232, %233 : vector<10x32xf32>
    %235 = vector.broadcast %214 : vector<1x32xf32> to vector<10x32xf32>
    %236 = arith.addf %234, %235 : vector<10x32xf32>
    %c0_157 = arith.constant 0 : index
    %c0_158 = arith.constant 0 : index
    %c0_159 = arith.constant 0 : index
    %237 = vector.load %arg21[%c0_157, %c0_158, %c0_159] : memref<2x32x64xf32, #tpu.memory_space<vmem>>, vector<1x32x64xf32>
    %238 = vector.shape_cast %237 : vector<1x32x64xf32> to vector<32x64xf32>
    %cst_160 = arith.constant dense<0.000000e+00> : vector<10x64xf32>
    %239 = tpu.matmul %236, %238, %cst_160 {dimension_numbers = #tpu.dot_dimension_numbers<[1], [0], [0], [1], [0, 0, 1, 1], [], []>} : vector<10x32xf32>, vector<32x64xf32>, vector<10x64xf32> -> vector<10x64xf32>
    %c0_161 = arith.constant 0 : index
    %c0_162 = arith.constant 0 : index
    %c0_163 = arith.constant 0 : index
    %240 = vector.load %arg22[%c0_161, %c0_162, %c0_163] : memref<2x1x64xf32, #tpu.memory_space<vmem>>, vector<1x1x64xf32>
    %241 = vector.shape_cast %240 : vector<1x1x64xf32> to vector<1x64xf32>
    %242 = vector.broadcast %241 : vector<1x64xf32> to vector<10x64xf32>
    %243 = arith.addf %239, %242 : vector<10x64xf32>
    %cst_164 = arith.constant 5.000000e-01 : f32
    %244 = vector.broadcast %cst_164 : f32 to vector<10x64xf32>
    %245 = arith.mulf %244, %243 : vector<10x64xf32>
    %cst_165 = arith.constant 4.471500e-02 : f32
    %246 = vector.broadcast %cst_165 : f32 to vector<10x64xf32>
    %247 = arith.mulf %246, %243 : vector<10x64xf32>
    %248 = arith.mulf %247, %243 : vector<10x64xf32>
    %249 = arith.mulf %248, %243 : vector<10x64xf32>
    %250 = arith.addf %243, %249 : vector<10x64xf32>
    %cst_166 = arith.constant 0.797884583 : f32
    %251 = vector.broadcast %cst_166 : f32 to vector<10x64xf32>
    %252 = arith.mulf %251, %250 : vector<10x64xf32>
    %253 = math.tanh %252 : vector<10x64xf32>
    %cst_167 = arith.constant 1.000000e+00 : f32
    %254 = vector.broadcast %cst_167 : f32 to vector<10x64xf32>
    %255 = arith.addf %254, %253 : vector<10x64xf32>
    %256 = arith.mulf %245, %255 : vector<10x64xf32>
    %c0_168 = arith.constant 0 : index
    %c0_169 = arith.constant 0 : index
    %c0_170 = arith.constant 0 : index
    %257 = vector.load %arg23[%c0_168, %c0_169, %c0_170] : memref<2x64x32xf32, #tpu.memory_space<vmem>>, vector<1x64x32xf32>
    %258 = vector.shape_cast %257 : vector<1x64x32xf32> to vector<64x32xf32>
    %cst_171 = arith.constant dense<0.000000e+00> : vector<10x32xf32>
    %259 = tpu.matmul %256, %258, %cst_171 {dimension_numbers = #tpu.dot_dimension_numbers<[1], [0], [0], [1], [0, 0, 1, 1], [], []>} : vector<10x64xf32>, vector<64x32xf32>, vector<10x32xf32> -> vector<10x32xf32>
    %260 = arith.addf %210, %259 : vector<10x32xf32>
    %c0_172 = arith.constant 0 : index
    %c0_173 = arith.constant 0 : index
    %c0_174 = arith.constant 0 : index
    %261 = vector.load %arg24[%c0_172, %c0_173, %c0_174] : memref<2x1x32xf32, #tpu.memory_space<vmem>>, vector<1x1x32xf32>
    %262 = vector.shape_cast %261 : vector<1x1x32xf32> to vector<1x32xf32>
    %263 = vector.broadcast %262 : vector<1x32xf32> to vector<10x32xf32>
    %264 = arith.addf %260, %263 : vector<10x32xf32>
    %c1_175 = arith.constant 1 : index
    %c0_176 = arith.constant 0 : index
    %c0_177 = arith.constant 0 : index
    %265 = vector.load %arg9[%c1_175, %c0_176, %c0_177] : memref<2x1x32xf32, #tpu.memory_space<vmem>>, vector<1x1x32xf32>
    %266 = vector.shape_cast %265 : vector<1x1x32xf32> to vector<1x32xf32>
    %c1_178 = arith.constant 1 : index
    %c0_179 = arith.constant 0 : index
    %c0_180 = arith.constant 0 : index
    %267 = vector.load %arg10[%c1_178, %c0_179, %c0_180] : memref<2x1x32xf32, #tpu.memory_space<vmem>>, vector<1x1x32xf32>
    %268 = vector.shape_cast %267 : vector<1x1x32xf32> to vector<1x32xf32>
    %cst_181 = arith.constant dense<0.000000e+00> : vector<10xf32>
    %269 = vector.multi_reduction <add>, %264, %cst_181 [1] : vector<10x32xf32> to vector<10xf32>
    %270 = vector.shape_cast %269 : vector<10xf32> to vector<10x1xf32>
    %cst_182 = arith.constant 3.200000e+01 : f32
    %271 = vector.broadcast %cst_182 : f32 to vector<10x1xf32>
    %272 = arith.divf %270, %271 : vector<10x1xf32>
    %273 = vector.broadcast %272 : vector<10x1xf32> to vector<10x32xf32>
    %274 = arith.subf %264, %273 : vector<10x32xf32>
    %275 = arith.mulf %274, %274 : vector<10x32xf32>
    %cst_183 = arith.constant dense<0.000000e+00> : vector<10xf32>
    %276 = vector.multi_reduction <add>, %275, %cst_183 [1] : vector<10x32xf32> to vector<10xf32>
    %277 = vector.shape_cast %276 : vector<10xf32> to vector<10x1xf32>
    %cst_184 = arith.constant 3.200000e+01 : f32
    %278 = vector.broadcast %cst_184 : f32 to vector<10x1xf32>
    %279 = arith.divf %277, %278 : vector<10x1xf32>
    %280 = vector.broadcast %272 : vector<10x1xf32> to vector<10x32xf32>
    %281 = arith.subf %264, %280 : vector<10x32xf32>
    %cst_185 = arith.constant 9.99999996E-13 : f32
    %282 = vector.broadcast %cst_185 : f32 to vector<10x1xf32>
    %283 = arith.addf %279, %282 : vector<10x1xf32>
    %284 = math.rsqrt %283 : vector<10x1xf32>
    %285 = vector.broadcast %284 : vector<10x1xf32> to vector<10x32xf32>
    %286 = arith.mulf %281, %285 : vector<10x32xf32>
    %287 = vector.broadcast %266 : vector<1x32xf32> to vector<10x32xf32>
    %288 = arith.mulf %286, %287 : vector<10x32xf32>
    %289 = vector.broadcast %268 : vector<1x32xf32> to vector<10x32xf32>
    %290 = arith.addf %288, %289 : vector<10x32xf32>
    %cst_186 = arith.constant 0.000000e+00 : f32
    %291 = vector.broadcast %cst_186 : f32 to vector<10x32xf32>
    %c4 = arith.constant 4 : index
    %c0_187 = arith.constant 0 : index
    %c0_188 = arith.constant 0 : index
    %292 = vector.load %arg11[%c4, %c0_187, %c0_188] : memref<8x32x8xf32, #tpu.memory_space<vmem>>, vector<1x32x8xf32>
    %293 = vector.shape_cast %292 : vector<1x32x8xf32> to vector<32x8xf32>
    %cst_189 = arith.constant dense<0.000000e+00> : vector<10x8xf32>
    %294 = tpu.matmul %290, %293, %cst_189 {dimension_numbers = #tpu.dot_dimension_numbers<[1], [0], [0], [1], [0, 0, 1, 1], [], []>} : vector<10x32xf32>, vector<32x8xf32>, vector<10x8xf32> -> vector<10x8xf32>
    %c4_190 = arith.constant 4 : index
    %c0_191 = arith.constant 0 : index
    %c0_192 = arith.constant 0 : index
    %295 = vector.load %arg12[%c4_190, %c0_191, %c0_192] : memref<8x1x8xf32, #tpu.memory_space<vmem>>, vector<1x1x8xf32>
    %296 = vector.shape_cast %295 : vector<1x1x8xf32> to vector<1x8xf32>
    %297 = vector.broadcast %296 : vector<1x8xf32> to vector<10x8xf32>
    %298 = arith.addf %294, %297 : vector<10x8xf32>
    %c4_193 = arith.constant 4 : index
    %c0_194 = arith.constant 0 : index
    %c0_195 = arith.constant 0 : index
    %299 = vector.load %arg13[%c4_193, %c0_194, %c0_195] : memref<8x32x8xf32, #tpu.memory_space<vmem>>, vector<1x32x8xf32>
    %300 = vector.shape_cast %299 : vector<1x32x8xf32> to vector<32x8xf32>
    %cst_196 = arith.constant dense<0.000000e+00> : vector<10x8xf32>
    %301 = tpu.matmul %290, %300, %cst_196 {dimension_numbers = #tpu.dot_dimension_numbers<[1], [0], [0], [1], [0, 0, 1, 1], [], []>} : vector<10x32xf32>, vector<32x8xf32>, vector<10x8xf32> -> vector<10x8xf32>
    %c4_197 = arith.constant 4 : index
    %c0_198 = arith.constant 0 : index
    %c0_199 = arith.constant 0 : index
    %302 = vector.load %arg14[%c4_197, %c0_198, %c0_199] : memref<8x1x8xf32, #tpu.memory_space<vmem>>, vector<1x1x8xf32>
    %303 = vector.shape_cast %302 : vector<1x1x8xf32> to vector<1x8xf32>
    %304 = vector.broadcast %303 : vector<1x8xf32> to vector<10x8xf32>
    %305 = arith.addf %301, %304 : vector<10x8xf32>
    %c4_200 = arith.constant 4 : index
    %c0_201 = arith.constant 0 : index
    %c0_202 = arith.constant 0 : index
    %306 = vector.load %arg15[%c4_200, %c0_201, %c0_202] : memref<8x32x8xf32, #tpu.memory_space<vmem>>, vector<1x32x8xf32>
    %307 = vector.shape_cast %306 : vector<1x32x8xf32> to vector<32x8xf32>
    %cst_203 = arith.constant dense<0.000000e+00> : vector<10x8xf32>
    %308 = tpu.matmul %290, %307, %cst_203 {dimension_numbers = #tpu.dot_dimension_numbers<[1], [0], [0], [1], [0, 0, 1, 1], [], []>} : vector<10x32xf32>, vector<32x8xf32>, vector<10x8xf32> -> vector<10x8xf32>
    %c4_204 = arith.constant 4 : index
    %c0_205 = arith.constant 0 : index
    %c0_206 = arith.constant 0 : index
    %309 = vector.load %arg16[%c4_204, %c0_205, %c0_206] : memref<8x1x8xf32, #tpu.memory_space<vmem>>, vector<1x1x8xf32>
    %310 = vector.shape_cast %309 : vector<1x1x8xf32> to vector<1x8xf32>
    %311 = vector.broadcast %310 : vector<1x8xf32> to vector<10x8xf32>
    %312 = arith.addf %308, %311 : vector<10x8xf32>
    %cst_207 = arith.constant dense<0.000000e+00> : vector<10x10xf32>
    %313 = tpu.matmul %298, %305, %cst_207 {dimension_numbers = #tpu.dot_dimension_numbers<[1], [1], [0], [0], [0, 0, 1, 0], [], []>} : vector<10x8xf32>, vector<10x8xf32>, vector<10x10xf32> -> vector<10x10xf32>
    %cst_208 = arith.constant 0.353553385 : f32
    %314 = vector.broadcast %cst_208 : f32 to vector<10x10xf32>
    %315 = arith.mulf %313, %314 : vector<10x10xf32>
    %316 = arith.addf %315, %18 : vector<10x10xf32>
    %cst_209 = arith.constant dense<0xFF800000> : vector<10xf32>
    %317 = vector.multi_reduction <maximumf>, %316, %cst_209 [1] : vector<10x10xf32> to vector<10xf32>
    %318 = vector.shape_cast %317 : vector<10xf32> to vector<10x1xf32>
    %319 = vector.broadcast %318 : vector<10x1xf32> to vector<10x10xf32>
    %320 = arith.subf %316, %319 : vector<10x10xf32>
    %321 = math.exp %320 : vector<10x10xf32>
    %cst_210 = arith.constant dense<0.000000e+00> : vector<10xf32>
    %322 = vector.multi_reduction <add>, %321, %cst_210 [1] : vector<10x10xf32> to vector<10xf32>
    %323 = vector.shape_cast %322 : vector<10xf32> to vector<10x1xf32>
    %324 = tpu.reciprocal %323 {approx = true} : vector<10x1xf32> -> vector<10x1xf32>
    %325 = vector.broadcast %324 : vector<10x1xf32> to vector<10x10xf32>
    %326 = arith.mulf %321, %325 : vector<10x10xf32>
    %cst_211 = arith.constant dense<0.000000e+00> : vector<10x8xf32>
    %327 = tpu.matmul %326, %312, %cst_211 {dimension_numbers = #tpu.dot_dimension_numbers<[1], [0], [0], [1], [0, 0, 1, 1], [], []>} : vector<10x10xf32>, vector<10x8xf32>, vector<10x8xf32> -> vector<10x8xf32>
    %c4_212 = arith.constant 4 : index
    %c0_213 = arith.constant 0 : index
    %c0_214 = arith.constant 0 : index
    %328 = vector.load %arg17[%c4_212, %c0_213, %c0_214] : memref<8x8x32xf32, #tpu.memory_space<vmem>>, vector<1x8x32xf32>
    %329 = vector.shape_cast %328 : vector<1x8x32xf32> to vector<8x32xf32>
    %cst_215 = arith.constant dense<0.000000e+00> : vector<10x32xf32>
    %330 = tpu.matmul %327, %329, %cst_215 {dimension_numbers = #tpu.dot_dimension_numbers<[1], [0], [0], [1], [0, 0, 1, 1], [], []>} : vector<10x8xf32>, vector<8x32xf32>, vector<10x32xf32> -> vector<10x32xf32>
    %331 = arith.addf %291, %330 : vector<10x32xf32>
    %c5 = arith.constant 5 : index
    %c0_216 = arith.constant 0 : index
    %c0_217 = arith.constant 0 : index
    %332 = vector.load %arg11[%c5, %c0_216, %c0_217] : memref<8x32x8xf32, #tpu.memory_space<vmem>>, vector<1x32x8xf32>
    %333 = vector.shape_cast %332 : vector<1x32x8xf32> to vector<32x8xf32>
    %cst_218 = arith.constant dense<0.000000e+00> : vector<10x8xf32>
    %334 = tpu.matmul %290, %333, %cst_218 {dimension_numbers = #tpu.dot_dimension_numbers<[1], [0], [0], [1], [0, 0, 1, 1], [], []>} : vector<10x32xf32>, vector<32x8xf32>, vector<10x8xf32> -> vector<10x8xf32>
    %c5_219 = arith.constant 5 : index
    %c0_220 = arith.constant 0 : index
    %c0_221 = arith.constant 0 : index
    %335 = vector.load %arg12[%c5_219, %c0_220, %c0_221] : memref<8x1x8xf32, #tpu.memory_space<vmem>>, vector<1x1x8xf32>
    %336 = vector.shape_cast %335 : vector<1x1x8xf32> to vector<1x8xf32>
    %337 = vector.broadcast %336 : vector<1x8xf32> to vector<10x8xf32>
    %338 = arith.addf %334, %337 : vector<10x8xf32>
    %c5_222 = arith.constant 5 : index
    %c0_223 = arith.constant 0 : index
    %c0_224 = arith.constant 0 : index
    %339 = vector.load %arg13[%c5_222, %c0_223, %c0_224] : memref<8x32x8xf32, #tpu.memory_space<vmem>>, vector<1x32x8xf32>
    %340 = vector.shape_cast %339 : vector<1x32x8xf32> to vector<32x8xf32>
    %cst_225 = arith.constant dense<0.000000e+00> : vector<10x8xf32>
    %341 = tpu.matmul %290, %340, %cst_225 {dimension_numbers = #tpu.dot_dimension_numbers<[1], [0], [0], [1], [0, 0, 1, 1], [], []>} : vector<10x32xf32>, vector<32x8xf32>, vector<10x8xf32> -> vector<10x8xf32>
    %c5_226 = arith.constant 5 : index
    %c0_227 = arith.constant 0 : index
    %c0_228 = arith.constant 0 : index
    %342 = vector.load %arg14[%c5_226, %c0_227, %c0_228] : memref<8x1x8xf32, #tpu.memory_space<vmem>>, vector<1x1x8xf32>
    %343 = vector.shape_cast %342 : vector<1x1x8xf32> to vector<1x8xf32>
    %344 = vector.broadcast %343 : vector<1x8xf32> to vector<10x8xf32>
    %345 = arith.addf %341, %344 : vector<10x8xf32>
    %c5_229 = arith.constant 5 : index
    %c0_230 = arith.constant 0 : index
    %c0_231 = arith.constant 0 : index
    %346 = vector.load %arg15[%c5_229, %c0_230, %c0_231] : memref<8x32x8xf32, #tpu.memory_space<vmem>>, vector<1x32x8xf32>
    %347 = vector.shape_cast %346 : vector<1x32x8xf32> to vector<32x8xf32>
    %cst_232 = arith.constant dense<0.000000e+00> : vector<10x8xf32>
    %348 = tpu.matmul %290, %347, %cst_232 {dimension_numbers = #tpu.dot_dimension_numbers<[1], [0], [0], [1], [0, 0, 1, 1], [], []>} : vector<10x32xf32>, vector<32x8xf32>, vector<10x8xf32> -> vector<10x8xf32>
    %c5_233 = arith.constant 5 : index
    %c0_234 = arith.constant 0 : index
    %c0_235 = arith.constant 0 : index
    %349 = vector.load %arg16[%c5_233, %c0_234, %c0_235] : memref<8x1x8xf32, #tpu.memory_space<vmem>>, vector<1x1x8xf32>
    %350 = vector.shape_cast %349 : vector<1x1x8xf32> to vector<1x8xf32>
    %351 = vector.broadcast %350 : vector<1x8xf32> to vector<10x8xf32>
    %352 = arith.addf %348, %351 : vector<10x8xf32>
    %cst_236 = arith.constant dense<0.000000e+00> : vector<10x10xf32>
    %353 = tpu.matmul %338, %345, %cst_236 {dimension_numbers = #tpu.dot_dimension_numbers<[1], [1], [0], [0], [0, 0, 1, 0], [], []>} : vector<10x8xf32>, vector<10x8xf32>, vector<10x10xf32> -> vector<10x10xf32>
    %cst_237 = arith.constant 0.353553385 : f32
    %354 = vector.broadcast %cst_237 : f32 to vector<10x10xf32>
    %355 = arith.mulf %353, %354 : vector<10x10xf32>
    %356 = arith.addf %355, %18 : vector<10x10xf32>
    %cst_238 = arith.constant dense<0xFF800000> : vector<10xf32>
    %357 = vector.multi_reduction <maximumf>, %356, %cst_238 [1] : vector<10x10xf32> to vector<10xf32>
    %358 = vector.shape_cast %357 : vector<10xf32> to vector<10x1xf32>
    %359 = vector.broadcast %358 : vector<10x1xf32> to vector<10x10xf32>
    %360 = arith.subf %356, %359 : vector<10x10xf32>
    %361 = math.exp %360 : vector<10x10xf32>
    %cst_239 = arith.constant dense<0.000000e+00> : vector<10xf32>
    %362 = vector.multi_reduction <add>, %361, %cst_239 [1] : vector<10x10xf32> to vector<10xf32>
    %363 = vector.shape_cast %362 : vector<10xf32> to vector<10x1xf32>
    %364 = tpu.reciprocal %363 {approx = true} : vector<10x1xf32> -> vector<10x1xf32>
    %365 = vector.broadcast %364 : vector<10x1xf32> to vector<10x10xf32>
    %366 = arith.mulf %361, %365 : vector<10x10xf32>
    %cst_240 = arith.constant dense<0.000000e+00> : vector<10x8xf32>
    %367 = tpu.matmul %366, %352, %cst_240 {dimension_numbers = #tpu.dot_dimension_numbers<[1], [0], [0], [1], [0, 0, 1, 1], [], []>} : vector<10x10xf32>, vector<10x8xf32>, vector<10x8xf32> -> vector<10x8xf32>
    %c5_241 = arith.constant 5 : index
    %c0_242 = arith.constant 0 : index
    %c0_243 = arith.constant 0 : index
    %368 = vector.load %arg17[%c5_241, %c0_242, %c0_243] : memref<8x8x32xf32, #tpu.memory_space<vmem>>, vector<1x8x32xf32>
    %369 = vector.shape_cast %368 : vector<1x8x32xf32> to vector<8x32xf32>
    %cst_244 = arith.constant dense<0.000000e+00> : vector<10x32xf32>
    %370 = tpu.matmul %367, %369, %cst_244 {dimension_numbers = #tpu.dot_dimension_numbers<[1], [0], [0], [1], [0, 0, 1, 1], [], []>} : vector<10x8xf32>, vector<8x32xf32>, vector<10x32xf32> -> vector<10x32xf32>
    %371 = arith.addf %331, %370 : vector<10x32xf32>
    %c6 = arith.constant 6 : index
    %c0_245 = arith.constant 0 : index
    %c0_246 = arith.constant 0 : index
    %372 = vector.load %arg11[%c6, %c0_245, %c0_246] : memref<8x32x8xf32, #tpu.memory_space<vmem>>, vector<1x32x8xf32>
    %373 = vector.shape_cast %372 : vector<1x32x8xf32> to vector<32x8xf32>
    %cst_247 = arith.constant dense<0.000000e+00> : vector<10x8xf32>
    %374 = tpu.matmul %290, %373, %cst_247 {dimension_numbers = #tpu.dot_dimension_numbers<[1], [0], [0], [1], [0, 0, 1, 1], [], []>} : vector<10x32xf32>, vector<32x8xf32>, vector<10x8xf32> -> vector<10x8xf32>
    %c6_248 = arith.constant 6 : index
    %c0_249 = arith.constant 0 : index
    %c0_250 = arith.constant 0 : index
    %375 = vector.load %arg12[%c6_248, %c0_249, %c0_250] : memref<8x1x8xf32, #tpu.memory_space<vmem>>, vector<1x1x8xf32>
    %376 = vector.shape_cast %375 : vector<1x1x8xf32> to vector<1x8xf32>
    %377 = vector.broadcast %376 : vector<1x8xf32> to vector<10x8xf32>
    %378 = arith.addf %374, %377 : vector<10x8xf32>
    %c6_251 = arith.constant 6 : index
    %c0_252 = arith.constant 0 : index
    %c0_253 = arith.constant 0 : index
    %379 = vector.load %arg13[%c6_251, %c0_252, %c0_253] : memref<8x32x8xf32, #tpu.memory_space<vmem>>, vector<1x32x8xf32>
    %380 = vector.shape_cast %379 : vector<1x32x8xf32> to vector<32x8xf32>
    %cst_254 = arith.constant dense<0.000000e+00> : vector<10x8xf32>
    %381 = tpu.matmul %290, %380, %cst_254 {dimension_numbers = #tpu.dot_dimension_numbers<[1], [0], [0], [1], [0, 0, 1, 1], [], []>} : vector<10x32xf32>, vector<32x8xf32>, vector<10x8xf32> -> vector<10x8xf32>
    %c6_255 = arith.constant 6 : index
    %c0_256 = arith.constant 0 : index
    %c0_257 = arith.constant 0 : index
    %382 = vector.load %arg14[%c6_255, %c0_256, %c0_257] : memref<8x1x8xf32, #tpu.memory_space<vmem>>, vector<1x1x8xf32>
    %383 = vector.shape_cast %382 : vector<1x1x8xf32> to vector<1x8xf32>
    %384 = vector.broadcast %383 : vector<1x8xf32> to vector<10x8xf32>
    %385 = arith.addf %381, %384 : vector<10x8xf32>
    %c6_258 = arith.constant 6 : index
    %c0_259 = arith.constant 0 : index
    %c0_260 = arith.constant 0 : index
    %386 = vector.load %arg15[%c6_258, %c0_259, %c0_260] : memref<8x32x8xf32, #tpu.memory_space<vmem>>, vector<1x32x8xf32>
    %387 = vector.shape_cast %386 : vector<1x32x8xf32> to vector<32x8xf32>
    %cst_261 = arith.constant dense<0.000000e+00> : vector<10x8xf32>
    %388 = tpu.matmul %290, %387, %cst_261 {dimension_numbers = #tpu.dot_dimension_numbers<[1], [0], [0], [1], [0, 0, 1, 1], [], []>} : vector<10x32xf32>, vector<32x8xf32>, vector<10x8xf32> -> vector<10x8xf32>
    %c6_262 = arith.constant 6 : index
    %c0_263 = arith.constant 0 : index
    %c0_264 = arith.constant 0 : index
    %389 = vector.load %arg16[%c6_262, %c0_263, %c0_264] : memref<8x1x8xf32, #tpu.memory_space<vmem>>, vector<1x1x8xf32>
    %390 = vector.shape_cast %389 : vector<1x1x8xf32> to vector<1x8xf32>
    %391 = vector.broadcast %390 : vector<1x8xf32> to vector<10x8xf32>
    %392 = arith.addf %388, %391 : vector<10x8xf32>
    %cst_265 = arith.constant dense<0.000000e+00> : vector<10x10xf32>
    %393 = tpu.matmul %378, %385, %cst_265 {dimension_numbers = #tpu.dot_dimension_numbers<[1], [1], [0], [0], [0, 0, 1, 0], [], []>} : vector<10x8xf32>, vector<10x8xf32>, vector<10x10xf32> -> vector<10x10xf32>
    %cst_266 = arith.constant 0.353553385 : f32
    %394 = vector.broadcast %cst_266 : f32 to vector<10x10xf32>
    %395 = arith.mulf %393, %394 : vector<10x10xf32>
    %396 = arith.addf %395, %18 : vector<10x10xf32>
    %cst_267 = arith.constant dense<0xFF800000> : vector<10xf32>
    %397 = vector.multi_reduction <maximumf>, %396, %cst_267 [1] : vector<10x10xf32> to vector<10xf32>
    %398 = vector.shape_cast %397 : vector<10xf32> to vector<10x1xf32>
    %399 = vector.broadcast %398 : vector<10x1xf32> to vector<10x10xf32>
    %400 = arith.subf %396, %399 : vector<10x10xf32>
    %401 = math.exp %400 : vector<10x10xf32>
    %cst_268 = arith.constant dense<0.000000e+00> : vector<10xf32>
    %402 = vector.multi_reduction <add>, %401, %cst_268 [1] : vector<10x10xf32> to vector<10xf32>
    %403 = vector.shape_cast %402 : vector<10xf32> to vector<10x1xf32>
    %404 = tpu.reciprocal %403 {approx = true} : vector<10x1xf32> -> vector<10x1xf32>
    %405 = vector.broadcast %404 : vector<10x1xf32> to vector<10x10xf32>
    %406 = arith.mulf %401, %405 : vector<10x10xf32>
    %cst_269 = arith.constant dense<0.000000e+00> : vector<10x8xf32>
    %407 = tpu.matmul %406, %392, %cst_269 {dimension_numbers = #tpu.dot_dimension_numbers<[1], [0], [0], [1], [0, 0, 1, 1], [], []>} : vector<10x10xf32>, vector<10x8xf32>, vector<10x8xf32> -> vector<10x8xf32>
    %c6_270 = arith.constant 6 : index
    %c0_271 = arith.constant 0 : index
    %c0_272 = arith.constant 0 : index
    %408 = vector.load %arg17[%c6_270, %c0_271, %c0_272] : memref<8x8x32xf32, #tpu.memory_space<vmem>>, vector<1x8x32xf32>
    %409 = vector.shape_cast %408 : vector<1x8x32xf32> to vector<8x32xf32>
    %cst_273 = arith.constant dense<0.000000e+00> : vector<10x32xf32>
    %410 = tpu.matmul %407, %409, %cst_273 {dimension_numbers = #tpu.dot_dimension_numbers<[1], [0], [0], [1], [0, 0, 1, 1], [], []>} : vector<10x8xf32>, vector<8x32xf32>, vector<10x32xf32> -> vector<10x32xf32>
    %411 = arith.addf %371, %410 : vector<10x32xf32>
    %c7 = arith.constant 7 : index
    %c0_274 = arith.constant 0 : index
    %c0_275 = arith.constant 0 : index
    %412 = vector.load %arg11[%c7, %c0_274, %c0_275] : memref<8x32x8xf32, #tpu.memory_space<vmem>>, vector<1x32x8xf32>
    %413 = vector.shape_cast %412 : vector<1x32x8xf32> to vector<32x8xf32>
    %cst_276 = arith.constant dense<0.000000e+00> : vector<10x8xf32>
    %414 = tpu.matmul %290, %413, %cst_276 {dimension_numbers = #tpu.dot_dimension_numbers<[1], [0], [0], [1], [0, 0, 1, 1], [], []>} : vector<10x32xf32>, vector<32x8xf32>, vector<10x8xf32> -> vector<10x8xf32>
    %c7_277 = arith.constant 7 : index
    %c0_278 = arith.constant 0 : index
    %c0_279 = arith.constant 0 : index
    %415 = vector.load %arg12[%c7_277, %c0_278, %c0_279] : memref<8x1x8xf32, #tpu.memory_space<vmem>>, vector<1x1x8xf32>
    %416 = vector.shape_cast %415 : vector<1x1x8xf32> to vector<1x8xf32>
    %417 = vector.broadcast %416 : vector<1x8xf32> to vector<10x8xf32>
    %418 = arith.addf %414, %417 : vector<10x8xf32>
    %c7_280 = arith.constant 7 : index
    %c0_281 = arith.constant 0 : index
    %c0_282 = arith.constant 0 : index
    %419 = vector.load %arg13[%c7_280, %c0_281, %c0_282] : memref<8x32x8xf32, #tpu.memory_space<vmem>>, vector<1x32x8xf32>
    %420 = vector.shape_cast %419 : vector<1x32x8xf32> to vector<32x8xf32>
    %cst_283 = arith.constant dense<0.000000e+00> : vector<10x8xf32>
    %421 = tpu.matmul %290, %420, %cst_283 {dimension_numbers = #tpu.dot_dimension_numbers<[1], [0], [0], [1], [0, 0, 1, 1], [], []>} : vector<10x32xf32>, vector<32x8xf32>, vector<10x8xf32> -> vector<10x8xf32>
    %c7_284 = arith.constant 7 : index
    %c0_285 = arith.constant 0 : index
    %c0_286 = arith.constant 0 : index
    %422 = vector.load %arg14[%c7_284, %c0_285, %c0_286] : memref<8x1x8xf32, #tpu.memory_space<vmem>>, vector<1x1x8xf32>
    %423 = vector.shape_cast %422 : vector<1x1x8xf32> to vector<1x8xf32>
    %424 = vector.broadcast %423 : vector<1x8xf32> to vector<10x8xf32>
    %425 = arith.addf %421, %424 : vector<10x8xf32>
    %c7_287 = arith.constant 7 : index
    %c0_288 = arith.constant 0 : index
    %c0_289 = arith.constant 0 : index
    %426 = vector.load %arg15[%c7_287, %c0_288, %c0_289] : memref<8x32x8xf32, #tpu.memory_space<vmem>>, vector<1x32x8xf32>
    %427 = vector.shape_cast %426 : vector<1x32x8xf32> to vector<32x8xf32>
    %cst_290 = arith.constant dense<0.000000e+00> : vector<10x8xf32>
    %428 = tpu.matmul %290, %427, %cst_290 {dimension_numbers = #tpu.dot_dimension_numbers<[1], [0], [0], [1], [0, 0, 1, 1], [], []>} : vector<10x32xf32>, vector<32x8xf32>, vector<10x8xf32> -> vector<10x8xf32>
    %c7_291 = arith.constant 7 : index
    %c0_292 = arith.constant 0 : index
    %c0_293 = arith.constant 0 : index
    %429 = vector.load %arg16[%c7_291, %c0_292, %c0_293] : memref<8x1x8xf32, #tpu.memory_space<vmem>>, vector<1x1x8xf32>
    %430 = vector.shape_cast %429 : vector<1x1x8xf32> to vector<1x8xf32>
    %431 = vector.broadcast %430 : vector<1x8xf32> to vector<10x8xf32>
    %432 = arith.addf %428, %431 : vector<10x8xf32>
    %cst_294 = arith.constant dense<0.000000e+00> : vector<10x10xf32>
    %433 = tpu.matmul %418, %425, %cst_294 {dimension_numbers = #tpu.dot_dimension_numbers<[1], [1], [0], [0], [0, 0, 1, 0], [], []>} : vector<10x8xf32>, vector<10x8xf32>, vector<10x10xf32> -> vector<10x10xf32>
    %cst_295 = arith.constant 0.353553385 : f32
    %434 = vector.broadcast %cst_295 : f32 to vector<10x10xf32>
    %435 = arith.mulf %433, %434 : vector<10x10xf32>
    %436 = arith.addf %435, %18 : vector<10x10xf32>
    %cst_296 = arith.constant dense<0xFF800000> : vector<10xf32>
    %437 = vector.multi_reduction <maximumf>, %436, %cst_296 [1] : vector<10x10xf32> to vector<10xf32>
    %438 = vector.shape_cast %437 : vector<10xf32> to vector<10x1xf32>
    %439 = vector.broadcast %438 : vector<10x1xf32> to vector<10x10xf32>
    %440 = arith.subf %436, %439 : vector<10x10xf32>
    %441 = math.exp %440 : vector<10x10xf32>
    %cst_297 = arith.constant dense<0.000000e+00> : vector<10xf32>
    %442 = vector.multi_reduction <add>, %441, %cst_297 [1] : vector<10x10xf32> to vector<10xf32>
    %443 = vector.shape_cast %442 : vector<10xf32> to vector<10x1xf32>
    %444 = tpu.reciprocal %443 {approx = true} : vector<10x1xf32> -> vector<10x1xf32>
    %445 = vector.broadcast %444 : vector<10x1xf32> to vector<10x10xf32>
    %446 = arith.mulf %441, %445 : vector<10x10xf32>
    %cst_298 = arith.constant dense<0.000000e+00> : vector<10x8xf32>
    %447 = tpu.matmul %446, %432, %cst_298 {dimension_numbers = #tpu.dot_dimension_numbers<[1], [0], [0], [1], [0, 0, 1, 1], [], []>} : vector<10x10xf32>, vector<10x8xf32>, vector<10x8xf32> -> vector<10x8xf32>
    %c7_299 = arith.constant 7 : index
    %c0_300 = arith.constant 0 : index
    %c0_301 = arith.constant 0 : index
    %448 = vector.load %arg17[%c7_299, %c0_300, %c0_301] : memref<8x8x32xf32, #tpu.memory_space<vmem>>, vector<1x8x32xf32>
    %449 = vector.shape_cast %448 : vector<1x8x32xf32> to vector<8x32xf32>
    %cst_302 = arith.constant dense<0.000000e+00> : vector<10x32xf32>
    %450 = tpu.matmul %447, %449, %cst_302 {dimension_numbers = #tpu.dot_dimension_numbers<[1], [0], [0], [1], [0, 0, 1, 1], [], []>} : vector<10x8xf32>, vector<8x32xf32>, vector<10x32xf32> -> vector<10x32xf32>
    %451 = arith.addf %411, %450 : vector<10x32xf32>
    %452 = arith.addf %264, %451 : vector<10x32xf32>
    %c1_303 = arith.constant 1 : index
    %c0_304 = arith.constant 0 : index
    %c0_305 = arith.constant 0 : index
    %453 = vector.load %arg18[%c1_303, %c0_304, %c0_305] : memref<2x1x32xf32, #tpu.memory_space<vmem>>, vector<1x1x32xf32>
    %454 = vector.shape_cast %453 : vector<1x1x32xf32> to vector<1x32xf32>
    %455 = vector.broadcast %454 : vector<1x32xf32> to vector<10x32xf32>
    %456 = arith.addf %452, %455 : vector<10x32xf32>
    %c1_306 = arith.constant 1 : index
    %c0_307 = arith.constant 0 : index
    %c0_308 = arith.constant 0 : index
    %457 = vector.load %arg19[%c1_306, %c0_307, %c0_308] : memref<2x1x32xf32, #tpu.memory_space<vmem>>, vector<1x1x32xf32>
    %458 = vector.shape_cast %457 : vector<1x1x32xf32> to vector<1x32xf32>
    %c1_309 = arith.constant 1 : index
    %c0_310 = arith.constant 0 : index
    %c0_311 = arith.constant 0 : index
    %459 = vector.load %arg20[%c1_309, %c0_310, %c0_311] : memref<2x1x32xf32, #tpu.memory_space<vmem>>, vector<1x1x32xf32>
    %460 = vector.shape_cast %459 : vector<1x1x32xf32> to vector<1x32xf32>
    %cst_312 = arith.constant dense<0.000000e+00> : vector<10xf32>
    %461 = vector.multi_reduction <add>, %456, %cst_312 [1] : vector<10x32xf32> to vector<10xf32>
    %462 = vector.shape_cast %461 : vector<10xf32> to vector<10x1xf32>
    %cst_313 = arith.constant 3.200000e+01 : f32
    %463 = vector.broadcast %cst_313 : f32 to vector<10x1xf32>
    %464 = arith.divf %462, %463 : vector<10x1xf32>
    %465 = vector.broadcast %464 : vector<10x1xf32> to vector<10x32xf32>
    %466 = arith.subf %456, %465 : vector<10x32xf32>
    %467 = arith.mulf %466, %466 : vector<10x32xf32>
    %cst_314 = arith.constant dense<0.000000e+00> : vector<10xf32>
    %468 = vector.multi_reduction <add>, %467, %cst_314 [1] : vector<10x32xf32> to vector<10xf32>
    %469 = vector.shape_cast %468 : vector<10xf32> to vector<10x1xf32>
    %cst_315 = arith.constant 3.200000e+01 : f32
    %470 = vector.broadcast %cst_315 : f32 to vector<10x1xf32>
    %471 = arith.divf %469, %470 : vector<10x1xf32>
    %472 = vector.broadcast %464 : vector<10x1xf32> to vector<10x32xf32>
    %473 = arith.subf %456, %472 : vector<10x32xf32>
    %cst_316 = arith.constant 9.99999996E-13 : f32
    %474 = vector.broadcast %cst_316 : f32 to vector<10x1xf32>
    %475 = arith.addf %471, %474 : vector<10x1xf32>
    %476 = math.rsqrt %475 : vector<10x1xf32>
    %477 = vector.broadcast %476 : vector<10x1xf32> to vector<10x32xf32>
    %478 = arith.mulf %473, %477 : vector<10x32xf32>
    %479 = vector.broadcast %458 : vector<1x32xf32> to vector<10x32xf32>
    %480 = arith.mulf %478, %479 : vector<10x32xf32>
    %481 = vector.broadcast %460 : vector<1x32xf32> to vector<10x32xf32>
    %482 = arith.addf %480, %481 : vector<10x32xf32>
    %c1_317 = arith.constant 1 : index
    %c0_318 = arith.constant 0 : index
    %c0_319 = arith.constant 0 : index
    %483 = vector.load %arg21[%c1_317, %c0_318, %c0_319] : memref<2x32x64xf32, #tpu.memory_space<vmem>>, vector<1x32x64xf32>
    %484 = vector.shape_cast %483 : vector<1x32x64xf32> to vector<32x64xf32>
    %cst_320 = arith.constant dense<0.000000e+00> : vector<10x64xf32>
    %485 = tpu.matmul %482, %484, %cst_320 {dimension_numbers = #tpu.dot_dimension_numbers<[1], [0], [0], [1], [0, 0, 1, 1], [], []>} : vector<10x32xf32>, vector<32x64xf32>, vector<10x64xf32> -> vector<10x64xf32>
    %c1_321 = arith.constant 1 : index
    %c0_322 = arith.constant 0 : index
    %c0_323 = arith.constant 0 : index
    %486 = vector.load %arg22[%c1_321, %c0_322, %c0_323] : memref<2x1x64xf32, #tpu.memory_space<vmem>>, vector<1x1x64xf32>
    %487 = vector.shape_cast %486 : vector<1x1x64xf32> to vector<1x64xf32>
    %488 = vector.broadcast %487 : vector<1x64xf32> to vector<10x64xf32>
    %489 = arith.addf %485, %488 : vector<10x64xf32>
    %cst_324 = arith.constant 5.000000e-01 : f32
    %490 = vector.broadcast %cst_324 : f32 to vector<10x64xf32>
    %491 = arith.mulf %490, %489 : vector<10x64xf32>
    %cst_325 = arith.constant 4.471500e-02 : f32
    %492 = vector.broadcast %cst_325 : f32 to vector<10x64xf32>
    %493 = arith.mulf %492, %489 : vector<10x64xf32>
    %494 = arith.mulf %493, %489 : vector<10x64xf32>
    %495 = arith.mulf %494, %489 : vector<10x64xf32>
    %496 = arith.addf %489, %495 : vector<10x64xf32>
    %cst_326 = arith.constant 0.797884583 : f32
    %497 = vector.broadcast %cst_326 : f32 to vector<10x64xf32>
    %498 = arith.mulf %497, %496 : vector<10x64xf32>
    %499 = math.tanh %498 : vector<10x64xf32>
    %cst_327 = arith.constant 1.000000e+00 : f32
    %500 = vector.broadcast %cst_327 : f32 to vector<10x64xf32>
    %501 = arith.addf %500, %499 : vector<10x64xf32>
    %502 = arith.mulf %491, %501 : vector<10x64xf32>
    %c1_328 = arith.constant 1 : index
    %c0_329 = arith.constant 0 : index
    %c0_330 = arith.constant 0 : index
    %503 = vector.load %arg23[%c1_328, %c0_329, %c0_330] : memref<2x64x32xf32, #tpu.memory_space<vmem>>, vector<1x64x32xf32>
    %504 = vector.shape_cast %503 : vector<1x64x32xf32> to vector<64x32xf32>
    %cst_331 = arith.constant dense<0.000000e+00> : vector<10x32xf32>
    %505 = tpu.matmul %502, %504, %cst_331 {dimension_numbers = #tpu.dot_dimension_numbers<[1], [0], [0], [1], [0, 0, 1, 1], [], []>} : vector<10x64xf32>, vector<64x32xf32>, vector<10x32xf32> -> vector<10x32xf32>
    %506 = arith.addf %456, %505 : vector<10x32xf32>
    %c1_332 = arith.constant 1 : index
    %c0_333 = arith.constant 0 : index
    %c0_334 = arith.constant 0 : index
    %507 = vector.load %arg24[%c1_332, %c0_333, %c0_334] : memref<2x1x32xf32, #tpu.memory_space<vmem>>, vector<1x1x32xf32>
    %508 = vector.shape_cast %507 : vector<1x1x32xf32> to vector<1x32xf32>
    %509 = vector.broadcast %508 : vector<1x32xf32> to vector<10x32xf32>
    %510 = arith.addf %506, %509 : vector<10x32xf32>
    %c0_335 = arith.constant 0 : index
    %c0_336 = arith.constant 0 : index
    %511 = vector.load %arg25[%c0_335, %c0_336] : memref<1x32xf32, #tpu.memory_space<vmem>>, vector<1x32xf32>
    %c0_337 = arith.constant 0 : index
    %c0_338 = arith.constant 0 : index
    %512 = vector.load %arg26[%c0_337, %c0_338] : memref<1x32xf32, #tpu.memory_space<vmem>>, vector<1x32xf32>
    %cst_339 = arith.constant dense<0.000000e+00> : vector<10xf32>
    %513 = vector.multi_reduction <add>, %510, %cst_339 [1] : vector<10x32xf32> to vector<10xf32>
    %514 = vector.shape_cast %513 : vector<10xf32> to vector<10x1xf32>
    %cst_340 = arith.constant 3.200000e+01 : f32
    %515 = vector.broadcast %cst_340 : f32 to vector<10x1xf32>
    %516 = arith.divf %514, %515 : vector<10x1xf32>
    %517 = vector.broadcast %516 : vector<10x1xf32> to vector<10x32xf32>
    %518 = arith.subf %510, %517 : vector<10x32xf32>
    %519 = arith.mulf %518, %518 : vector<10x32xf32>
    %cst_341 = arith.constant dense<0.000000e+00> : vector<10xf32>
    %520 = vector.multi_reduction <add>, %519, %cst_341 [1] : vector<10x32xf32> to vector<10xf32>
    %521 = vector.shape_cast %520 : vector<10xf32> to vector<10x1xf32>
    %cst_342 = arith.constant 3.200000e+01 : f32
    %522 = vector.broadcast %cst_342 : f32 to vector<10x1xf32>
    %523 = arith.divf %521, %522 : vector<10x1xf32>
    %524 = vector.broadcast %516 : vector<10x1xf32> to vector<10x32xf32>
    %525 = arith.subf %510, %524 : vector<10x32xf32>
    %cst_343 = arith.constant 9.99999996E-13 : f32
    %526 = vector.broadcast %cst_343 : f32 to vector<10x1xf32>
    %527 = arith.addf %523, %526 : vector<10x1xf32>
    %528 = math.rsqrt %527 : vector<10x1xf32>
    %529 = vector.broadcast %528 : vector<10x1xf32> to vector<10x32xf32>
    %530 = arith.mulf %525, %529 : vector<10x32xf32>
    %531 = vector.broadcast %511 : vector<1x32xf32> to vector<10x32xf32>
    %532 = arith.mulf %530, %531 : vector<10x32xf32>
    %533 = vector.broadcast %512 : vector<1x32xf32> to vector<10x32xf32>
    %534 = arith.addf %532, %533 : vector<10x32xf32>
    %c0_344 = arith.constant 0 : index
    %c0_345 = arith.constant 0 : index
    %535 = vector.load %arg4[%c0_344, %c0_345] : memref<2x10xf32, #tpu.memory_space<vmem>>, vector<2x10xf32>
    %cst_346 = arith.constant dense<0.000000e+00> : vector<2x32xf32>
    %536 = tpu.matmul %535, %534, %cst_346 {dimension_numbers = #tpu.dot_dimension_numbers<[1], [0], [0], [1], [0, 0, 1, 1], [], []>} : vector<2x10xf32>, vector<10x32xf32>, vector<2x32xf32> -> vector<2x32xf32>
    %c0_347 = arith.constant 0 : index
    %c0_348 = arith.constant 0 : index
    %537 = vector.load %arg27[%c0_347, %c0_348] : memref<32x3xf32, #tpu.memory_space<vmem>>, vector<32x3xf32>
    %cst_349 = arith.constant dense<0.000000e+00> : vector<2x3xf32>
    %538 = tpu.matmul %536, %537, %cst_349 {dimension_numbers = #tpu.dot_dimension_numbers<[1], [0], [0], [1], [0, 0, 1, 1], [], []>} : vector<2x32xf32>, vector<32x3xf32>, vector<2x3xf32> -> vector<2x3xf32>
    %c0_350 = arith.constant 0 : index
    %c0_351 = arith.constant 0 : index
    %539 = vector.load %arg28[%c0_350, %c0_351] : memref<1x3xf32, #tpu.memory_space<vmem>>, vector<1x3xf32>
    %540 = vector.broadcast %539 : vector<1x3xf32> to vector<2x3xf32>
    %541 = arith.addf %538, %540 : vector<2x3xf32>
    %c0_352 = arith.constant 0 : index
    %c0_353 = arith.constant 0 : index
    %542 = vector.load %arg29[%c0_352, %c0_353] : memref<2x3xf32, #tpu.memory_space<vmem>>, vector<2x3xf32>
    tpu.vector_store %arg29[%c0_352, %c0_353], %541 {strides = array<i32>} : memref<2x3xf32, #tpu.memory_space<vmem>>, vector<2x3xf32>,
    %cst_354 = arith.constant dense<0xFF800000> : vector<2xf32>
    %543 = vector.multi_reduction <maximumf>, %541, %cst_354 [1] : vector<2x3xf32> to vector<2xf32>
    %544 = vector.shape_cast %543 : vector<2xf32> to vector<2x1xf32>
    %545 = vector.broadcast %544 : vector<2x1xf32> to vector<2x3xf32>
    %546 = arith.subf %541, %545 : vector<2x3xf32>
    %547 = math.exp %546 : vector<2x3xf32>
    %cst_355 = arith.constant dense<0.000000e+00> : vector<2xf32>
    %548 = vector.multi_reduction <add>, %547, %cst_355 [1] : vector<2x3xf32> to vector<2xf32>
    %549 = vector.shape_cast %548 : vector<2xf32> to vector<2x1xf32>
    %550 = math.log %549 : vector<2x1xf32>
    %551 = arith.addf %544, %550 : vector<2x1xf32>
    %c0_356 = arith.constant 0 : index
    %c0_357 = arith.constant 0 : index
    %552 = vector.load %arg1[%c0_356, %c0_357] : memref<2x3xf32, #tpu.memory_space<vmem>>, vector<2x3xf32>
    %553 = arith.mulf %552, %541 : vector<2x3xf32>
    %cst_358 = arith.constant dense<0.000000e+00> : vector<2xf32>
    %554 = vector.multi_reduction <add>, %553, %cst_358 [1] : vector<2x3xf32> to vector<2xf32>
    %555 = vector.shape_cast %554 : vector<2xf32> to vector<2x1xf32>
    %556 = arith.subf %551, %555 : vector<2x1xf32>
    %cst_359 = arith.constant dense<0.000000e+00> : vector<1xf32>
    %557 = vector.multi_reduction <add>, %556, %cst_359 [0] : vector<2x1xf32> to vector<1xf32>
    %558 = vector.shape_cast %557 : vector<1xf32> to vector<1x1xf32>
    %cst_360 = arith.constant 2.000000e+00 : f32
    %559 = vector.broadcast %cst_360 : f32 to vector<1x1xf32>
    %560 = arith.divf %558, %559 : vector<1x1xf32>
    %c0_361 = arith.constant 0 : index
    %c0_362 = arith.constant 0 : index
    %561 = vector.load %arg30[%c0_361, %c0_362] : memref<1x1xf32, #tpu.memory_space<vmem>>, vector<1x1xf32>
    tpu.vector_store %arg30[%c0_361, %c0_362], %560 {strides = array<i32>} : memref<1x1xf32, #tpu.memory_space<vmem>>, vector<1x1xf32>,
    return
  }
}

</mosaic_0001>

<bundles_post_ra>
// kernel: tile.9
= control target key start
LH: loop header
LB: loop body
LE: loop exit
PB: predicated region body
PF: predicated region fallthrough
CT: control target
= control target key end

     0   :  { %vm3_vm0 = vcmask 261120   ;;  %s34_s0 = inlined_call_operand.vmem [shape: f32[2,5,32], index: 0, kind: input, shape index: {}]   ;;  %s35_s1 = inlined_call_operand.vmem [shape: f32[10,32], index: 1, kind: output, shape index: {}]  }
   0x1   :  { %v2_v0 = vld [vmem:[%s34_s0] sm:$0x1f]   ;;  %v10_v1 = vld [vmem:[%s34_s0 + $0x8] sm:$0x1f]  }
   0x2   :  { %4 = vst.msk [vmem:[%s35_s1] sm:$0x1f] %vm3_vm0, %v2_v0   ;;  %11 = vst.msk [vmem:[%s35_s1 + $0x5] sm:$0x1f] %vm3_vm0, %v10_v1  }

// kernel: vit_forward.1
= control target key start
LH: loop header
LB: loop body
LE: loop exit
PB: predicated region body
PF: predicated region fallthrough
CT: control target
= control target key end

     0   :  { %s7232_s6 = smov 1   ;;  %s7233_s10 = smov 2   ;;  %s8040_s0 = inlined_call_operand.smem [shape: u32[31], index: -1, kind: input, shape index: {}] }
   0x1   :  { %s7277_s5 = sld [smem:[%s8040_s0]]   ;;  %s7234_s14 = smov 3  }
   0x2   :  { %s7282_s9 = sld [smem:[%s8040_s0 + %s7232_s6]]   ;;  %s7235_s18 = smov 4  }
   0x3   :  { %s7287_s13 = sld [smem:[%s8040_s0 + %s7233_s10]]   ;;  %s7236_s22 = smov 5  }
   0x4   :  { %s7292_s17 = sld [smem:[%s8040_s0 + %s7234_s14]]   ;;  %s7237_s26 = smov 6  }
   0x5   :  { %s7297_s21 = sld [smem:[%s8040_s0 + %s7235_s18]]   ;;  %s7238_s30 = smov 7  }
   0x6   :  { %s7302_s25 = sld [smem:[%s8040_s0 + %s7236_s22]]   ;;  %s7239_s4 = smov 8  }
   0x7   :  { %s7307_s29 = sld [smem:[%s8040_s0 + %s7237_s26]]   ;;  %s7240_s10 = smov 9  }
   0x8   :  { %8050 = sst [smem:[#allocation8_spill]] %s7282_s9  ;;  %s7241_s15 = smov 10  }
   0x9   :  { %s7312_s3 = sld [smem:[%s8040_s0 + %s7238_s30]]   ;;  %s7242_s20 = smov 11  }
   0xa   :  { %8051 = sst [smem:[#allocation9_spill]] %s7292_s17  ;;  %s7243_s26 = smov 12  }
   0xb   :  { %8052 = sst [smem:[#allocation10_spill]] %s7297_s21  ;;  %s7244_s1 = smov 13  }
   0xc   :  { %s7317_s8 = sld [smem:[%s8040_s0 + %s7239_s4]]   ;;  %s7245_s7 = smov 14  }
   0xd   :  { %s7322_s14 = sld [smem:[%s8040_s0 + %s7240_s10]]   ;;  %s7247_s22 = smov 16  }
   0xe   :  { %s7327_s19 = sld [smem:[%s8040_s0 + %s7241_s15]]   ;;  %s7246_s15 = smov 15  }
   0xf   :  { %s7332_s24 = sld [smem:[%s8040_s0 + %s7242_s20]]   ;;  %s7248_s28 = smov 17  }
  0x10   :  { %s7337_s30 = sld [smem:[%s8040_s0 + %s7243_s26]]  }
  0x11   :  { %s7342_s6 = sld [smem:[%s8040_s0 + %s7244_s1]]  }
  0x12   :  { %s7347_s12 = sld [smem:[%s8040_s0 + %s7245_s7]]   ;;  %s7249_s7 = smov 18  }
  0x13   :  { %s7352_s20 = sld [smem:[%s8040_s0 + %s7246_s15]]   ;;  %s7250_s15 = smov 19  }
  0x14   :  { %s7357_s27 = sld [smem:[%s8040_s0 + %s7247_s22]]   ;;  %s7251_s22 = smov 20  }
  0x15   :  { %s7362_s4 = sld [smem:[%s8040_s0 + %s7248_s28]]   ;;  %s7252_s28 = smov 21  }
  0x16   :  { %s7367_s9 = sld [smem:[%s8040_s0 + %s7249_s7]]   ;;  %s7253_s7 = smov 22  }
  0x17   :  { %s7372_s21 = sld [smem:[%s8040_s0 + %s7250_s15]]   ;;  %s7254_s15 = smov 23  }
  0x18   :  { %s7377_s17 = sld [smem:[%s8040_s0 + %s7251_s22]]   ;;  %s7255_s22 = smov 24  }
  0x1b   :  { %8053 = sst [smem:[#allocation11_spill]] %s7362_s4 }
  0x1c   :  { %8054 = sst [smem:[#allocation12_spill]] %s7367_s9 }
  0x1d   :  { %8055 = sst [smem:[#allocation13_spill]] %s7372_s21 }
  0x1e   :  { %8056 = sst [smem:[#allocation14_spill]] %s7377_s17 }
  0x1f   :  { %s7382_s4 = sld [smem:[%s8040_s0 + %s7252_s28]]   ;;  %s7256_s28 = smov 25  }
  0x20   :  { %s7387_s9 = sld [smem:[%s8040_s0 + %s7253_s7]]   ;;  %s7257_s7 = smov 26  }
  0x21   :  { %s7392_s21 = sld [smem:[%s8040_s0 + %s7254_s15]]   ;;  %s7258_s15 = smov 27  }
  0x22   :  { %s7397_s17 = sld [smem:[%s8040_s0 + %s7255_s22]]   ;;  %s7259_s22 = smov 28  }
  0x25   :  { %8057 = sst [smem:[#allocation15_spill]] %s7382_s4 }
  0x26   :  { %8058 = sst [smem:[#allocation16_spill]] %s7387_s9 }
  0x27   :  { %8059 = sst [smem:[#allocation17_spill]] %s7392_s21 }
  0x28   :  { %8060 = sst [smem:[#allocation18_spill]] %s7397_s17 }
  0x29   :  { %s7402_s4 = sld [smem:[%s8040_s0 + %s7256_s28]]   ;;  %s7260_s28 = smov 29  }
  0x2a   :  { %s7407_s9 = sld [smem:[%s8040_s0 + %s7257_s7]]   ;;  %s7261_s7 = smov 30  }
  0x2b   :  { %s7412_s21 = sld [smem:[%s8040_s0 + %s7258_s15]]  }
  0x2c   :  { %s7417_s17 = sld [smem:[%s8040_s0 + %s7259_s22]]  }
  0x2f   :  { %8061 = sst [smem:[#allocation19_spill]] %s7402_s4 }
  0x30   :  { %8062 = sst [smem:[#allocation20_spill]] %s7407_s9 }
  0x31   :  { %s7422_s4 = sld [smem:[%s8040_s0 + %s7260_s28]]  }
  0x32   :  { %s7427_s9 = sld [smem:[%s8040_s0 + %s7261_s7]]  }
  0x33   :  { %67 = vsyncpa [#allocation3], 0  ;;  %v131_v0 = vld [vmem:[%s7312_s3] sm:$0xff]  ;;  %v132_v1 = vld [vmem:[%s7312_s3 + $0x8] sm:$0xff]  ;;  %v7262_v3 = vmov 0.0|0.0   ;;  %v7263_v6 = vmov 0  }
  0x34   :  { %v133_v2 = vld [vmem:[%s7312_s3 + $0x10] sm:$0xff]  ;;  %6653 = vmatprep.subr.bf16.mxu0 %v7262_v3  ;;  %v6654_v4 = vpack.c.bf16 %v132_v1, %v131_v0  ;;  %v134_v5 = vld [vmem:[%s7312_s3 + $0x18] sm:$0xff]  ;;  %7084 = vset.pattern.permute.xlu0 %v7263_v6  ;;  %v135_v8 = vld [vmem:[%s7312_s3 + $0x20] sm:$0xff]  ;;  %vm162_vm0 = vcmask 523264  }
  0x35   :  { %7085 = vset.pattern.permute.xlu1 %v7263_v6  ;;  %v6657_v7 = vpack.c.bf16 %v134_v5, %v133_v2  ;;  %v136_v9 = vld [vmem:[%s7312_s3 + $0x28] sm:$0xff]  ;;  %v137_v11 = vld [vmem:[%s7312_s3 + $0x30] sm:$0xff]  ;;  %v138_v12 = vld [vmem:[%s7312_s3 + $0x38] sm:$0xff] }
  0x36   :  { %6655 = vmatpush1.bf16.msra.mxu0 %v6654_v4  ;;  %v6660_v10 = vpack.c.bf16 %v136_v9, %v135_v8  ;;  %v128_v13 = vld [vmem:[%s7277_s5 + $0x8] sm:$0xff]  ;;  %v244_v14 = vld [vmem:[%s7287_s13] sm:$0xff] }
  0x37   :  { %6656 = vmatprep.subr.bf16.mxu0 %v7262_v3  ;;  %5581 = vmatprep.mubr.msk.f32.mxu0 %vm162_vm0, %v128_v13  ;;  %v245_v15 = vld [vmem:[%s7287_s13 + $0x8] sm:$0x3]  ;;  %v265_v16 = vsub.f32 1.0, %v244_v14 }
  0x38   :  { %249 = vperm.xlu0 %7084, %v244_v14   ;;  %254 = vperm.xlu1 %7085, %v245_v15   ;;  %v266_v17 = vsub.f32 1.0, %v245_v15 }
  0x3a   :  { %6658 = vmatpush1.bf16.msra.mxu0 %v6657_v7 }
  0x3b   :  { %6659 = vmatprep.subr.bf16.mxu0 %v7262_v3 }
  0x3c   :  { %68 = vsyncpa [#allocation5], 0  ;;  %v6663_v18 = vpack.c.bf16 %v138_v12, %v137_v11  ;;  %v139_v19 = vld [vmem:[%s7312_s3 + $0x40] sm:$0xff]  ;;  %v140_v20 = vld [vmem:[%s7312_s3 + $0x48] sm:$0xff]  ;;  %269 = vperm.xlu0 %7084, %v265_v16   ;;  %274 = vperm.xlu1 %7085, %v266_v17   ;;  %vm289_vm1 = vcmask 261120   ;;  %vm293_vm2 = vcmask 254976  }
  0x3d   :  { %v6666_v21 = vpack.c.bf16 %v140_v20, %v139_v19  ;;  %v141_v22 = vld [vmem:[%s7312_s3 + $0x50] sm:$0xff]  ;;  %v142_v23 = vld [vmem:[%s7312_s3 + $0x58] sm:$0xff]  ;;  %v143_v25 = vld [vmem:[%s7312_s3 + $0x60] sm:$0xff]  ;;  %vm720_vm3 = vcmask 1041408   ;;  %vm598_vm4 = vcmask 64512   ;;  %vm7264_vm5 = vmmov 1  }
  0x3e   :  { %6661 = vmatpush1.bf16.msra.mxu0 %v6660_v10  ;;  %v6669_v24 = vpack.c.bf16 %v142_v23, %v141_v22  ;;  %v144_v26 = vld [vmem:[%s7312_s3 + $0x68] sm:$0xff]  ;;  %v145_v28 = vld [vmem:[%s7312_s3 + $0x70] sm:$0xff]  ;;  %v146_v29 = vld [vmem:[%s7312_s3 + $0x78] sm:$0xff]  ;;  %s8065_s0 = sld [smem:[#allocation9_spill]]  ;;  %vm694_vm8 = vcmask 74752   ;;  %vm690_vm9 = vcmask 80896  }
  0x3f   :  { %6662 = vmatprep.subr.bf16.mxu0 %v7262_v3  ;;  %v6672_v27 = vpack.c.bf16 %v144_v26, %v143_v25  ;;  %v6675_v30 = vpack.c.bf16 %v146_v29, %v145_v28  ;;  %v147_v31 = vld [vmem:[%s7312_s3 + $0x80] sm:$0xff]  ;;  %v148_v32 = vld [vmem:[%s7312_s3 + $0x88] sm:$0xff]  ;;  %v149_v34 = vld [vmem:[%s7312_s3 + $0x90] sm:$0xff]  ;;  %s8069_s13 = sld [smem:[#allocation12_spill]]  ;;  %s8074_s15 = sld [smem:[#allocation16_spill]]  ;;  %vm7265_vm10 = vmmov 0  }
  0x40   :  { %v6678_v33 = vpack.c.bf16 %v148_v32, %v147_v31  ;;  %v150_v35 = vld [vmem:[%s7312_s3 + $0x98] sm:$0xff]  ;;  %v151_v37 = vld [vmem:[%s7312_s3 + $0xa0] sm:$0xff]  ;;  %v152_v38 = vld [vmem:[%s7312_s3 + $0xa8] sm:$0xff]  ;;  %s8075_s16 = sld [smem:[#allocation18_spill]]  ;;  %vm5491_vm11 = vcmask 17408  }
  0x41   :  { %v6681_v36 = vpack.c.bf16 %v150_v35, %v149_v34  ;;  %v6684_v39 = vpack.c.bf16 %v152_v38, %v151_v37  ;;  %v153_v40 = vld [vmem:[%s7312_s3 + $0xb0] sm:$0xff]  ;;  %v154_v41 = vld [vmem:[%s7312_s3 + $0xb8] sm:$0xff]  ;;  %v127_v43 = vld [vmem:[%s7277_s5] sm:$0xff]  ;;  %s8072_s3 = sld [smem:[#allocation14_spill]] }
  0x42   :  { %6664 = vmatpush1.bf16.msra.mxu0 %v6663_v18  ;;  %v6687_v42 = vpack.c.bf16 %v154_v41, %v153_v40  ;;  %v130_v44 = vld [vmem:[%s7277_s5 + $0x18] sm:$0x3]  ;;  %v129_v45 = vld [vmem:[%s7277_s5 + $0x10] sm:$0x3]  ;;  %v5580_v47 = vld [vmem:[%s7317_s8] ss:$0 sm:$0xff] }
  0x43   :  { %6665 = vmatprep.subr.bf16.mxu0 %v7262_v3  ;;  %v5583_v48 = vld [vmem:[%s7307_s29] ss:$0 sm:$0xff]  ;;  %v282_v1 = vld [vmem:[%s7302_s25 + $0x8] sm:$0x3]  ;;  %v336_v23 = vld [vmem:[%s7332_s24 + $0x10] sm:$0xff]  ;;  %s8068_s5 = sld [smem:[#allocation11_spill]] }
  0x44   :  { %v281_v57 = vld [vmem:[%s7302_s25] sm:$0xff]  ;;  %v335_v18 = vld [vmem:[%s7332_s24 + $0x8] sm:$0xff]  ;;  %v5620_v26 = vld [vmem:[%s7352_s20 + $0x30] sm:$0xff]  ;;  %s8070_s25 = sld [smem:[#allocation15_spill]]  ;;  %s8071_s29 = sld [smem:[#allocation13_spill]] }
  0x45   :  { %v334_v17 = vld [vmem:[%s7332_s24] sm:$0xff]  ;;  %vm7530_vm6 = vmpackc.low %vm720_vm3, %vm7264_vm5  ;;  %s8073_s8 = sld [smem:[#allocation17_spill]] }
  0x46   :  { %6667 = vmatpush1.bf16.msra.mxu0 %v6666_v21  ;;  %v6689_v19 = vpack.c.bf16 %v335_v18, %v334_v17  ;;  %v5618_v20 = vld [vmem:[%s7352_s20 + $0x20] sm:$0xff]  ;;  %v5619_v21 = vld [vmem:[%s7352_s20 + $0x28] sm:$0xff]  ;;  %vm7542_vm7 = vmpackc.low %vm598_vm4, %vm598_vm4 }
  0x47   :  { %6668 = vmatprep.subr.bf16.mxu0 %v7262_v3  ;;  %v6741_v22 = vpack.c.bf16 %v5619_v21, %v5618_v20  ;;  %v426_v29 = vld [vmem:[%s7342_s6] sm:$0xff] }
  0x48   :  { %6690 = vmatprep.subr.bf16.mxu1 %v6689_v19  ;;  %v5585_v41 = vld [vmem:[%s7327_s19] ss:$0 sm:$0xff] }
  0x49   :  { %6692 = vmatpush3.bf16.msra.mxu1 %v6689_v19 }
  0x4a   :  { %6670 = vmatpush1.bf16.msra.mxu0 %v6669_v24  ;;  %v337_v24 = vld [vmem:[%s7332_s24 + $0x18] sm:$0xff] }
  0x4b   :  { %6671 = vmatprep.subr.bf16.mxu0 %v7262_v3  ;;  %v6693_v25 = vpack.c.bf16 %v337_v24, %v336_v23 }
  0x4d   :  { %6694 = vmatprep.subr.bf16.mxu1 %v6693_v25 }
  0x4e   :  { %6673 = vmatpush1.bf16.msra.mxu0 %v6672_v27  ;;  %v5621_v27 = vld [vmem:[%s7352_s20 + $0x38] sm:$0xff]  ;;  %6696 = vmatpush3.bf16.msra.mxu1 %v6693_v25  ;;  %v7560_v25 = vld [vmem:[%s8065_s0] sm:$0xff] }
  0x4f   :  { %6674 = vmatprep.subr.bf16.mxu0 %v7262_v3  ;;  %v6745_v28 = vpack.c.bf16 %v5621_v27, %v5620_v26 }
  0x52   :  { %6676 = vmatpush1.bf16.msra.mxu0 %v6675_v30  ;;  %v427_v30 = vld [vmem:[%s7342_s6 + $0x8] sm:$0xff] }
  0x53   :  { %6677 = vmatprep.subr.bf16.mxu0 %v7262_v3  ;;  %v6697_v31 = vpack.c.bf16 %v427_v30, %v426_v29 }
  0x55   :  { %6698 = vmatprep.subr.bf16.mxu1 %v6697_v31 }
  0x56   :  { %6679 = vmatpush1.bf16.msra.mxu0 %v6678_v33 }
  0x57   :  { %6680 = vmatprep.subr.bf16.mxu0 %v7262_v3 }
  0x5a   :  { %6682 = vmatpush1.bf16.msra.mxu0 %v6681_v36 }
  0x5b   :  { %6683 = vmatprep.subr.bf16.mxu0 %v7262_v3 }
  0x5e   :  { %6685 = vmatpush1.bf16.msra.mxu0 %v6684_v39  ;;  %v5584_v39 = vld [vmem:[%s7322_s14] ss:$0 sm:$0xff] }
  0x5f   :  { %6686 = vmatprep.subr.bf16.mxu0 %v7262_v3 }
  0x62   :  { %6688 = vmatpush1.bf16.msra.mxu0 %v6687_v42 }
  0x63   :  { %6742 = vmatprep.subr.bf16.mxu0 %v6741_v22 }
  0x65   :  { %234 = vmatmul.mubr.f32.vlgmr.msra.gmra.mrb[0].mxu0 %v127_v43 }
  0x66   :  { %5582 = vmatprep.mubr.msk.f32.mxu0 %vm162_vm0, %v130_v44  ;;  %6744 = vmatpush3.bf16.msra.mxu0 %v6741_v22  ;;  %v7557_v22 = vld [vmem:[%s8065_s0 + $0x8] sm:$0x3] }
  0x67   :  { %6746 = vmatprep.subr.bf16.mxu0 %v6745_v28 }
  0x69   :  { %239 = vmatmul.mubr.f32.gmra.mrb[2].mxu0 %v129_v45 }
  0x6a   :  { %6748 = vmatpush3.bf16.msra.mxu0 %v6745_v28 }
  0xb7   :  { %v250_v46 = vpop.permute.xlu0 %249  ;;  %v255_v49 = vpop.permute.xlu1 %254 }
  0xb8   :  { %v263_v54 = vmul.f32 %v5583_v48, %v250_v46  ;;  %v264_v62 = vmul.f32 %v5583_v48, %v255_v49  ;;  %v428_v46 = vld [vmem:[%s7342_s6 + $0x10] sm:$0xff] }
  0xbb   :  { %v270_v53 = vpop.permute.xlu0 %269  ;;  %v275_v61 = vpop.permute.xlu1 %274 }
 0x138   :  { %v235_v50 = vpop.f32.mrb[0].mxu0 }
 0x139   :  { %v236_v51 = vadd.f32 %v5580_v47, %v235_v50  ;;  %v237_v52 = vpop.f32.mrb[1].mxu0 }
 0x13a   :  { %v513_v52 = vld [vmem:[%s7352_s20 + $0x8] sm:$0xff] }
 0x13b   :  { %v277_v55 = vmul.f32 %v270_v53, %v236_v51  ;;  %v512_v51 = vld [vmem:[%s7352_s20] sm:$0xff] }
 0x13c   :  { %v240_v56 = vpop.f32.mrb[2].mxu0  ;;  %v6705_v53 = vpack.c.bf16 %v513_v52, %v512_v51 }
 0x13d   :  { %v279_v58 = vadd.f32 %v277_v55, %v263_v54  ;;  %v241_v59 = vadd.f32 %v5580_v47, %v240_v56  ;;  %v242_v60 = vpop.f32.mrb[3].mxu0  ;;  %v429_v47 = vld [vmem:[%s7342_s6 + $0x18] sm:$0xff]  ;;  %v514_v54 = vld [vmem:[%s7352_s20 + $0x10] sm:$0xff] }
 0x13e   :  { %v6701_v50 = vpack.c.bf16 %v429_v47, %v428_v46  ;;  %v515_v55 = vld [vmem:[%s7352_s20 + $0x18] sm:$0xff] }
 0x13f   :  { %v278_v63 = vmul.f32 %v275_v61, %v241_v59  ;;  %v7476_v0 = vadd.f32 %v281_v57, %v279_v58  ;;  %v6709_v56 = vpack.c.bf16 %v515_v55, %v514_v54  ;;  %v5623_v57 = vld [vmem:[%s7357_s27 + $0x1] ss:$0 sm:$0xff]  ;;  %v5586_v58 = vld [vmem:[%s7337_s30] ss:$0 sm:$0xff] }
 0x140   :  { %v5610_v55 = vld [vmem:[%s7342_s6 + $0x20] sm:$0xff] }
 0x141   :  { %v280_v2 = vadd.f32 %v278_v63, %v264_v62  ;;  %v290_v4 = vsel %vm289_vm1, %v7476_v0, 0.0 }
 0x142   :  { %291 = vadd.xlane.f32.xlu0 %v290_v4 }
 0x143   :  { %v7481_v5 = vadd.f32 %v282_v1, %v280_v2 }
 0x145   :  { %v294_v6 = vsel %vm293_vm2, %v7481_v5, 0.0 }
 0x146   :  { %295 = vadd.xlane.f32.xlu1 %v294_v6 }
 0x1cf   :  { %v292_v7 = vpop.xlane.xlu0 %291 }
 0x1d0   :  { %v298_v8 = vmul.f32 0.03125, %v292_v7  ;;  %v5589_v7 = vld [vmem:[%s7347_s12] ss:$0 sm:$0xff] }
 0x1d2   :  { %v300_v9 = vsub.f32 %v7476_v0, %v298_v8 }
 0x1d3   :  { %v296_v10 = vpop.xlane.xlu1 %295 }
 0x1d4   :  { %v299_v11 = vmul.f32 0.03125, %v296_v10  ;;  %v302_v12 = vmul.f32 %v300_v9, %v300_v9 }
 0x1d6   :  { %v301_v13 = vsub.f32 %v7481_v5, %v299_v11  ;;  %v304_v14 = vsel %vm289_vm1, %v302_v12, 0.0 }
 0x1d7   :  { %305 = vadd.xlane.f32.xlu0 %v304_v14  ;;  %v5592_v14 = vld [vmem:[%s7357_s27] ss:$0 sm:$0xff] }
 0x1d8   :  { %v303_v15 = vmul.f32 %v301_v13, %v301_v13 }
 0x1da   :  { %v307_v16 = vsel %vm293_vm2, %v303_v15, 0.0 }
 0x1db   :  { %308 = vadd.xlane.f32.xlu0 %v307_v16 }
 0x264   :  { %v306_v32 = vpop.xlane.xlu0 %305 }
 0x265   :  { %v310_v33 = vmul.f32 0.03125, %v306_v32 }
 0x267   :  { %v312_v34 = vadd.f32 1e-12, %v310_v33 }
 0x268   :  { %v309_v35 = vpop.xlane.xlu0 %308 }
 0x269   :  { %7086 = vrsqrt.f32 %v312_v34  ;;  %v311_v36 = vmul.f32 0.03125, %v309_v35 }
 0x26b   :  { %v313_v37 = vadd.f32 1e-12, %v311_v36 }
 0x26d   :  { %7088 = vrsqrt.f32 %v313_v37 }
 0x273   :  { %v7087_v38 = vpop.eup %7086 }
 0x274   :  { %v316_v40 = vmul.f32 %v7087_v38, %v300_v9 }
 0x276   :  { %v324_v42 = vmul.f32 %v5584_v39, %v316_v40 }
 0x277   :  { %v7089_v43 = vpop.eup %7088 }
 0x278   :  { %v7501_v44 = vadd.f32 %v5585_v41, %v324_v42  ;;  %v317_v45 = vmul.f32 %v7089_v43, %v301_v13  ;;  %v5603_v42 = vld [vmem:[%s7332_s24 + $0x28] sm:$0xff] }
 0x27a   :  { %v325_v48 = vmul.f32 %v5584_v39, %v317_v45  ;;  %6167 = vmatprep.mubr.msk.f32.mxu1 %vm289_vm1, %v7501_v44  ;;  %6236 = vmatprep.mubr.msk.f32.mxu0 %vm289_vm1, %v7501_v44 }
 0x27c   :  { %v7509_v49 = vadd.f32 %v5585_v41, %v325_v48  ;;  %v5602_v41 = vld [vmem:[%s7332_s24 + $0x20] sm:$0xff]  ;;  %v5604_v48 = vld [vmem:[%s7332_s24 + $0x30] sm:$0xff] }
 0x27d   :  { %v6725_v43 = vpack.c.bf16 %v5603_v42, %v5602_v41  ;;  %v5659_v41 = vld [vmem:[%s7357_s27 + $0x2] ss:$0 sm:$0xff] }
 0x27e   :  { %6168 = vmatmul.mubr.msk.f32.vlgmr.msra.gmra.mrb[0].mxu1 %vm289_vm1, %v7509_v49  ;;  %6237 = vmatmul.mubr.msk.f32.vlgmr.msra.gmra.mrb[4].mxu0 %vm289_vm1, %v7509_v49 }
 0x27f   :  { %6700 = vmatpush3.bf16.msra.mxu1 %v6697_v31  ;;  %6178 = vmatprep.mubr.msk.f32.mxu1 %vm289_vm1, %v7501_v44 }
 0x280   :  { %6702 = vmatprep.subr.bf16.mxu1 %v6701_v50 }
 0x283   :  { %6704 = vmatpush3.bf16.msra.mxu1 %v6701_v50  ;;  %v5605_v50 = vld [vmem:[%s7332_s24 + $0x38] sm:$0xff] }
 0x284   :  { %6706 = vmatprep.subr.bf16.mxu1 %v6705_v53  ;;  %v6729_v54 = vpack.c.bf16 %v5605_v50, %v5604_v48 }
 0x286   :  { %6179 = vmatmul.mubr.msk.f32.vlgmr.msra.gmra.mrb[2].mxu1 %vm289_vm1, %v7509_v49 }
 0x287   :  { %6708 = vmatpush3.bf16.msra.mxu1 %v6705_v53  ;;  %6189 = vmatprep.mubr.msk.f32.mxu1 %vm289_vm1, %v7501_v44 }
 0x288   :  { %6710 = vmatprep.subr.bf16.mxu1 %v6709_v56 }
 0x28b   :  { %6712 = vmatpush3.bf16.msra.mxu1 %v6709_v56  ;;  %v5611_v56 = vld [vmem:[%s7342_s6 + $0x28] sm:$0xff] }
 0x28e   :  { %6190 = vmatmul.mubr.msk.f32.vlgmr.msra.gmra.mrb[4].mxu1 %vm289_vm1, %v7509_v49 }
 0x351   :  { %v6169_v59 = vpop.f32.mrb[0].mxu1  ;;  %v6238_v60 = vpop.f32.mrb[4].mxu0 }
 0x352   :  { %v1061_v61 = vadd.f32 %v6238_v60, %v5623_v57  ;;  %v417_v62 = vpop.f32.mrb[1].mxu1  ;;  %v1055_v63 = vpop.f32.mrb[5].mxu0  ;;  %v423_v19 = vadd.f32 %v6169_v59, %v5586_v58  ;;  %v5613_v59 = vld [vmem:[%s7342_s6 + $0x38] sm:$0xff] }
 0x353   :  { %v418_v1 = vadd.f32 %v5586_v58, %v417_v62  ;;  %v1056_v2 = vadd.f32 %v5623_v57, %v1055_v63  ;;  %v6733_v57 = vpack.c.bf16 %v5611_v56, %v5610_v55  ;;  %v5612_v58 = vld [vmem:[%s7342_s6 + $0x30] sm:$0xff]  ;;  %v5607_v63 = vld [vmem:[%s7337_s30 + $0x1] ss:$0 sm:$0xff] }
 0x354   :  { %v6737_v60 = vpack.c.bf16 %v5613_v59, %v5612_v58  ;;  %v5633_v59 = vld [vmem:[%s8068_s5 + $0x8] sm:$0xff] }
 0x355   :  { %v6755_v6 = vpack.c.bf16 %v1061_v61, %v1056_v2  ;;  %6196 = vmatprep.mubr.msk.f32.mxu1 %vm598_vm4, %v418_v1 }
 0x357   :  { %6757 = vmatprep.subr.msk.bf16.mxu0 %vm7530_vm6, %v6755_v6 }
 0x358   :  { %6760 = vmatpush3.bf16.msk.msra.mxu0 %vm7530_vm6, %v6755_v6 }
 0x359   :  { %v6180_v8 = vpop.f32.mrb[2].mxu1  ;;  %6253 = vmatprep.subr.mxu0 %v5633_v59 }
 0x35a   :  { %v509_v9 = vadd.f32 %v6180_v8, %v5589_v7  ;;  %v503_v10 = vpop.f32.mrb[3].mxu1 }
 0x35b   :  { %v504_v11 = vadd.f32 %v5589_v7, %v503_v10  ;;  %v5615_v7 = vld [vmem:[%s7347_s12 + $0x1] ss:$0 sm:$0xff] }
 0x35d   :  { %v6713_v13 = vpack.c.bf16 %v509_v9, %v504_v11  ;;  %v5638_v11 = vld [vmem:[%s7332_s24 + $0x40] sm:$0xff] }
 0x35f   :  { %6715 = vmatprep.subr.msk.bf16.mxu1 %vm7542_vm7, %v6713_v13 }
 0x360   :  { %6718 = vmatpush3.bf16.xpose.msk.msra.mxu1 %vm7542_vm7, %v6713_v13  ;;  %v5639_v13 = vld [vmem:[%s7332_s24 + $0x48] sm:$0xff] }
 0x361   :  { %v6191_v15 = vpop.f32.mrb[4].mxu1 }
 0x362   :  { %v595_v16 = vadd.f32 %v6191_v15, %v5592_v14  ;;  %v589_v17 = vpop.f32.mrb[5].mxu1 }
 0x363   :  { %v590_v18 = vadd.f32 %v5592_v14, %v589_v17  ;;  %v5640_v17 = vld [vmem:[%s7332_s24 + $0x50] sm:$0xff] }
 0x365   :  { %v6719_v20 = vpack.c.bf16 %v595_v16, %v590_v18  ;;  %v6761_v16 = vpack.c.bf16 %v5639_v13, %v5638_v11  ;;  %v5641_v18 = vld [vmem:[%s7332_s24 + $0x58] sm:$0xff] }
 0x367   :  { %6197 = vmatmul.mubr.msk.f32.vlgmr.msra.gmra.mrb[6].mxu1 %vm598_vm4, %v423_v19  ;;  %6721 = vmatprep.subr.msk.bf16.mxu1 %vm7530_vm6, %v6719_v20 }
 0x368   :  { %6724 = vmatpush3.bf16.msk.msra.mxu1 %vm7530_vm6, %v6719_v20  ;;  %v6765_v20 = vpack.c.bf16 %v5641_v18, %v5640_v17 }
 0x369   :  { %6726 = vmatprep.subr.bf16.mxu1 %v6725_v43 }
 0x43a   :  { %v6198_v21 = vpop.f32.mrb[6].mxu1 }
 0x43b   :  { %v687_v23 = vmul.f32 0.35355338, %v6198_v21  ;;  %v677_v24 = vpop.f32.mrb[7].mxu1  ;;  %v5654_v21 = vld [vmem:[%s7352_s20 + $0x40] sm:$0xff] }
 0x43c   :  { %v686_v26 = vmul.f32 0.35355338, %v677_v24 }
 0x43d   :  { %v689_v27 = vadd.f32 %v687_v23, %v7557_v22  ;;  %v5655_v23 = vld [vmem:[%s7352_s20 + $0x48] sm:$0xff] }
 0x43e   :  { %v688_v28 = vadd.f32 %v686_v26, %v7560_v25  ;;  %v6777_v24 = vpack.c.bf16 %v5655_v23, %v5654_v21  ;;  %v5656_v26 = vld [vmem:[%s7352_s20 + $0x50] sm:$0xff] }
 0x43f   :  { %v695_v29 = vsel %vm694_vm8, %v689_v27, -inf }
 0x440   :  { %696 = vmax.xlane.f32.xlu0 %v695_v29  ;;  %v691_v30 = vsel %vm690_vm9, %v688_v28, -inf }
 0x441   :  { %692 = vmax.xlane.f32.xlu1 %v691_v30 }
 0x4cd   :  { %v697_v31 = vpop.xlane.xlu0 %696 }
 0x4ce   :  { %v699_v32 = vsub.f32 %v689_v27, %v697_v31  ;;  %v693_v33 = vpop.xlane.xlu1 %692  ;;  %v5657_v27 = vld [vmem:[%s7352_s20 + $0x58] sm:$0xff] }
 0x4cf   :  { %v698_v34 = vsub.f32 %v688_v28, %v693_v33  ;;  %v6781_v28 = vpack.c.bf16 %v5657_v27, %v5656_v26 }
 0x4d0   :  { %v702_v35 = vmul.f32 1.442695, %v699_v32 }
 0x4d1   :  { %v700_v36 = vmul.f32 1.442695, %v698_v34 }
 0x4d2   :  { %7090 = vpow2.f32 %v702_v35 }
 0x4d3   :  { %7092 = vpow2.f32 %v700_v36 }
 0x4dc   :  { %v7091_v37 = vpop.eup %7090 }
 0x4dd   :  { %v7093_v38 = vpop.eup %7092  ;;  %v707_v39 = vsel %vm694_vm8, %v7091_v37, 0.0 }
 0x4de   :  { %708 = vadd.xlane.f32.xlu0 %v707_v39  ;;  %v704_v40 = vsel %vm690_vm9, %v7093_v38, 0.0 }
 0x4df   :  { %705 = vadd.xlane.f32.xlu1 %v704_v40 }
 0x56b   :  { %v709_v45 = vpop.xlane.xlu0 %708 }
 0x56c   :  { %7094 = vrcp.f32 %v709_v45  ;;  %v706_v46 = vpop.xlane.xlu1 %705 }
 0x56d   :  { %7096 = vrcp.f32 %v706_v46 }
 0x576   :  { %v7095_v47 = vpop.eup %7094 }
 0x577   :  { %v7097_v51 = vpop.eup %7096  ;;  %v713_v53 = vmul.f32 %v7095_v47, %v7091_v37  ;;  %v5643_v37 = vld [vmem:[%s7337_s30 + $0x2] ss:$0 sm:$0xff] }
 0x578   :  { %v712_v52 = vmul.f32 %v7097_v51, %v7093_v38 }
 0x57a   :  { %6203 = vmatprep.mubr.msk.f32.mxu1 %vm690_vm9, %v712_v52 }
 0x57b   :  { %6204 = vmatmul.mubr.msk.f32.vlgmr.msra.gmra.mrb[8].mxu1 %vm690_vm9, %v713_v53 }
 0x57c   :  { %6728 = vmatpush3.bf16.msra.mxu1 %v6725_v43  ;;  %6214 = vmatprep.mubr.msk.f32.mxu1 %vm289_vm1, %v7501_v44 }
 0x57d   :  { %6730 = vmatprep.subr.bf16.mxu1 %v6729_v54 }
 0x580   :  { %6732 = vmatpush3.bf16.msra.mxu1 %v6729_v54 }
 0x581   :  { %6734 = vmatprep.subr.bf16.mxu1 %v6733_v57 }
 0x583   :  { %6215 = vmatmul.mubr.msk.f32.vlgmr.msra.gmra.mrb[10].mxu1 %vm289_vm1, %v7509_v49 }
 0x584   :  { %6736 = vmatpush3.bf16.msra.mxu1 %v6733_v57  ;;  %6225 = vmatprep.mubr.msk.f32.mxu1 %vm289_vm1, %v7501_v44 }
 0x585   :  { %6738 = vmatprep.subr.bf16.mxu1 %v6737_v60 }
 0x588   :  { %6740 = vmatpush3.bf16.msra.mxu1 %v6737_v60 }
 0x58b   :  { %6226 = vmatmul.mubr.msk.f32.vlgmr.msra.gmra.mrb[12].mxu1 %vm289_vm1, %v7509_v49 }
 0x64e   :  { %v7586_v61 = vpop.f32.mrb[8].mxu1 }
 0x64f   :  { %v7588_v62 = vpop.f32.mrb[9].mxu1 }
 0x656   :  { %v6216_v1 = vpop.f32.mrb[10].mxu1 }
 0x657   :  { %v879_v2 = vpop.f32.mrb[11].mxu1  ;;  %v885_v19 = vadd.f32 %v6216_v1, %v5607_v63 }
 0x658   :  { %v880_v6 = vadd.f32 %v5607_v63, %v879_v2 }
 0x65a   :  { %6243 = vmatprep.mubr.msk.f32.mxu1 %vm598_vm4, %v880_v6 }
 0x65e   :  { %v6227_v8 = vpop.f32.mrb[12].mxu1 }
 0x65f   :  { %v973_v9 = vadd.f32 %v6227_v8, %v5615_v7  ;;  %v967_v10 = vpop.f32.mrb[13].mxu1  ;;  %v799_v8 = vld [vmem:[%s8068_s5] sm:$0xff] }
 0x660   :  { %v968_v14 = vadd.f32 %v5615_v7, %v967_v10  ;;  %v5647_v10 = vld [vmem:[%s7342_s6 + $0x48] sm:$0xff] }
 0x662   :  { %v6749_v15 = vpack.c.bf16 %v973_v9, %v968_v14  ;;  %v5646_v9 = vld [vmem:[%s7342_s6 + $0x40] sm:$0xff] }
 0x663   :  { %v6769_v14 = vpack.c.bf16 %v5647_v10, %v5646_v9  ;;  %v5682_v9 = vld [vmem:[%s7342_s6 + $0x70] sm:$0xff]  ;;  %v5683_v10 = vld [vmem:[%s7342_s6 + $0x78] sm:$0xff] }
 0x664   :  { %6751 = vmatprep.subr.msk.bf16.mxu1 %vm7542_vm7, %v6749_v15 }
 0x665   :  { %6754 = vmatpush3.bf16.xpose.msk.msra.mxu1 %vm7542_vm7, %v6749_v15  ;;  %v5648_v15 = vld [vmem:[%s7342_s6 + $0x50] sm:$0xff] }
 0x666   :  { %6762 = vmatprep.subr.bf16.mxu1 %v6761_v16 }
 0x66c   :  { %6244 = vmatmul.mubr.msk.f32.vlgmr.msra.gmra.mrb[14].mxu1 %vm598_vm4, %v885_v19 }
 0x66d   :  { %6764 = vmatpush3.bf16.msra.mxu1 %v6761_v16  ;;  %6271 = vmatprep.mubr.msk.f32.mxu1 %vm289_vm1, %v7501_v44  ;;  %v5649_v16 = vld [vmem:[%s7342_s6 + $0x58] sm:$0xff] }
 0x66e   :  { %6766 = vmatprep.subr.bf16.mxu1 %v6765_v20  ;;  %v6773_v17 = vpack.c.bf16 %v5649_v16, %v5648_v15  ;;  %v5677_v15 = vld [vmem:[%s7337_s30 + $0x3] ss:$0 sm:$0xff] }
 0x671   :  { %6768 = vmatpush3.bf16.msra.mxu1 %v6765_v20 }
 0x672   :  { %6778 = vmatprep.subr.bf16.mxu1 %v6777_v24 }
 0x674   :  { %6272 = vmatmul.mubr.msk.f32.vlgmr.msra.gmra.mrb[16].mxu1 %vm289_vm1, %v7509_v49 }
 0x675   :  { %6780 = vmatpush3.bf16.msra.mxu1 %v6777_v24  ;;  %6293 = vmatprep.mubr.msk.f32.mxu1 %vm289_vm1, %v7501_v44 }
 0x676   :  { %6782 = vmatprep.subr.bf16.mxu1 %v6781_v28 }
 0x679   :  { %6784 = vmatpush3.bf16.msra.mxu1 %v6781_v28 }
 0x67c   :  { %6294 = vmatmul.mubr.msk.f32.vlgmr.msra.gmra.mrb[18].mxu1 %vm289_vm1, %v7509_v49 }
 0x73f   :  { %v6245_v29 = vpop.f32.mrb[14].mxu1 }
 0x740   :  { %v1152_v30 = vmul.f32 0.35355338, %v6245_v29  ;;  %v1142_v31 = vpop.f32.mrb[15].mxu1 }
 0x741   :  { %v1151_v32 = vmul.f32 0.35355338, %v1142_v31 }
 0x742   :  { %v1154_v33 = vadd.f32 %v1152_v30, %v7557_v22 }
 0x743   :  { %v1153_v34 = vadd.f32 %v1151_v32, %v7560_v25 }
 0x744   :  { %v1158_v35 = vsel %vm694_vm8, %v1154_v33, -inf }
 0x745   :  { %1159 = vmax.xlane.f32.xlu0 %v1158_v35  ;;  %v1155_v36 = vsel %vm690_vm9, %v1153_v34, -inf }
 0x746   :  { %1156 = vmax.xlane.f32.xlu1 %v1155_v36 }
 0x747   :  { %v6273_v38 = vpop.f32.mrb[16].mxu1 }
 0x748   :  { %v7619_v39 = vadd.f32 %v6273_v38, %v5643_v37  ;;  %v1504_v40 = vpop.f32.mrb[17].mxu1 }
 0x749   :  { %v1505_v18 = vadd.f32 %v5643_v37, %v1504_v40 }
 0x74f   :  { %v6295_v42 = vpop.f32.mrb[18].mxu1 }
 0x750   :  { %v1686_v43 = vadd.f32 %v6295_v42, %v5659_v41  ;;  %v1680_v45 = vpop.f32.mrb[19].mxu1 }
 0x751   :  { %v1681_v46 = vadd.f32 %v5659_v41, %v1680_v45  ;;  %v5673_v45 = vld [vmem:[%s7332_s24 + $0x68] sm:$0xff] }
 0x753   :  { %v6791_v47 = vpack.c.bf16 %v1686_v43, %v1681_v46  ;;  %v5672_v43 = vld [vmem:[%s7332_s24 + $0x60] sm:$0xff] }
 0x754   :  { %v6797_v46 = vpack.c.bf16 %v5673_v45, %v5672_v43 }
 0x755   :  { %6793 = vmatprep.subr.msk.bf16.mxu1 %vm7530_vm6, %v6791_v47 }
 0x756   :  { %6796 = vmatpush3.bf16.msk.msra.mxu1 %vm7530_vm6, %v6791_v47  ;;  %v5669_v47 = vld [vmem:[%s8068_s5 + $0x10] sm:$0xff] }
 0x757   :  { %6798 = vmatprep.subr.bf16.mxu1 %v6797_v46 }
 0x7d2   :  { %v1160_v48 = vpop.xlane.xlu0 %1159 }
 0x7d3   :  { %v1162_v50 = vsub.f32 %v1154_v33, %v1160_v48  ;;  %v1157_v51 = vpop.xlane.xlu1 %1156 }
 0x7d4   :  { %v1161_v52 = vsub.f32 %v1153_v34, %v1157_v51 }
 0x7d5   :  { %v1165_v53 = vmul.f32 1.442695, %v1162_v50 }
 0x7d6   :  { %v1163_v54 = vmul.f32 1.442695, %v1161_v52  ;;  %v5674_v52 = vld [vmem:[%s7332_s24 + $0x70] sm:$0xff] }
 0x7d7   :  { %7098 = vpow2.f32 %v1165_v53  ;;  %v5675_v53 = vld [vmem:[%s7332_s24 + $0x78] sm:$0xff] }
 0x7d8   :  { %7100 = vpow2.f32 %v1163_v54 }
 0x7e1   :  { %v7099_v55 = vpop.eup %7098 }
 0x7e2   :  { %v7101_v56 = vpop.eup %7100  ;;  %v1170_v57 = vsel %vm694_vm8, %v7099_v55, 0.0 }
 0x7e3   :  { %1171 = vadd.xlane.f32.xlu0 %v1170_v57  ;;  %v1167_v58 = vsel %vm690_vm9, %v7101_v56, 0.0  ;;  %v6801_v57 = vpack.c.bf16 %v5675_v53, %v5674_v52 }
 0x7e4   :  { %1168 = vadd.xlane.f32.xlu1 %v1167_v58  ;;  %v5688_v58 = vld [vmem:[%s7352_s20 + $0x60] sm:$0xff] }
 0x870   :  { %v1172_v60 = vpop.xlane.xlu0 %1171 }
 0x871   :  { %7102 = vrcp.f32 %v1172_v60  ;;  %v1169_v63 = vpop.xlane.xlu1 %1168 }
 0x872   :  { %7104 = vrcp.f32 %v1169_v63  ;;  %v5690_v63 = vld [vmem:[%s7352_s20 + $0x70] sm:$0xff] }
 0x87b   :  { %v7103_v1 = vpop.eup %7102 }
 0x87c   :  { %v7105_v2 = vpop.eup %7104  ;;  %v1176_v7 = vmul.f32 %v7103_v1, %v7099_v55  ;;  %v5691_v1 = vld [vmem:[%s7352_s20 + $0x78] sm:$0xff] }
 0x87d   :  { %v1175_v6 = vmul.f32 %v7105_v2, %v7101_v56  ;;  %v6817_v2 = vpack.c.bf16 %v5691_v1, %v5690_v63 }
 0x87f   :  { %6250 = vmatprep.mubr.msk.f32.mxu0 %vm690_vm9, %v1175_v6  ;;  %v5680_v6 = vld [vmem:[%s7342_s6 + $0x60] sm:$0xff] }
 0x880   :  { %6251 = vmatmul.mubr.msk.f32.vlgmr.msra.gmra.mrb[6].mxu0 %vm690_vm9, %v1176_v7  ;;  %v5681_v7 = vld [vmem:[%s7342_s6 + $0x68] sm:$0xff] }
 0x881   :  { %6254 = vmatpush3.msra.mxu0 %v5633_v59  ;;  %v5689_v59 = vld [vmem:[%s7352_s20 + $0x68] sm:$0xff] }
 0x882   :  { %6258 = vmatprep.subr.mxu0 %v799_v8  ;;  %v6813_v60 = vpack.c.bf16 %v5689_v59, %v5688_v58  ;;  %v5706_v58 = vld [vmem:[%s8069_s13] ss:$0 sm:$0xff] }
 0x953   :  { %v6252_v11 = vpop.f32.mrb[6].mxu0 }
 0x954   :  { %v1252_v13 = vpop.f32.mrb[7].mxu0 }
 0x955   :  { %6255 = vmatprep.mubr.msk.f32.mxu0 %vm598_vm4, %v1252_v13 }
 0x956   :  { %6256 = vmatmul.mubr.msk.f32.vlgmr.msra.gmra.mrb[8].mxu0 %vm598_vm4, %v6252_v11 }
 0x957   :  { %6259 = vmatpush3.msra.mxu0 %v799_v8  ;;  %6260 = vmatprep.mubr.msk.f32.mxu0 %vm598_vm4, %v7588_v62  ;;  %v5651_v62 = vld [vmem:[%s7347_s12 + $0x2] ss:$0 sm:$0xff]  ;;  %v6805_v8 = vpack.c.bf16 %v5681_v7, %v5680_v6 }
 0x958   :  { %6770 = vmatprep.subr.bf16.mxu0 %v6769_v14 }
 0x95e   :  { %6261 = vmatmul.mubr.msk.f32.vlgmr.msra.gmra.mrb[8].mxu0 %vm598_vm4, %v7586_v61 }
 0x95f   :  { %6772 = vmatpush3.bf16.msra.mxu0 %v6769_v14  ;;  %6282 = vmatprep.mubr.msk.f32.mxu0 %vm289_vm1, %v7501_v44  ;;  %v6809_v14 = vpack.c.bf16 %v5683_v10, %v5682_v9 }
 0x960   :  { %6774 = vmatprep.subr.bf16.mxu0 %v6773_v17 }
 0x963   :  { %6776 = vmatpush3.bf16.msra.mxu0 %v6773_v17 }
 0x966   :  { %6283 = vmatmul.mubr.msk.f32.vlgmr.msra.gmra.mrb[10].mxu0 %vm289_vm1, %v7509_v49 }
 0x967   :  { %6300 = vmatprep.mubr.msk.f32.mxu0 %vm598_vm4, %v1505_v18 }
 0xa39   :  { %v6284_v19 = vpop.f32.mrb[10].mxu0 }
 0xa3a   :  { %v1598_v20 = vadd.f32 %v6284_v19, %v5651_v62  ;;  %v1592_v21 = vpop.f32.mrb[11].mxu0  ;;  %v5693_v19 = vld [vmem:[%s7357_s27 + $0x3] ss:$0 sm:$0xff] }
 0xa3b   :  { %v1593_v23 = vadd.f32 %v5651_v62, %v1592_v21 }
 0xa3d   :  { %v6785_v24 = vpack.c.bf16 %v1598_v20, %v1593_v23 }
 0xa3f   :  { %6787 = vmatprep.subr.msk.bf16.mxu0 %vm7542_vm7, %v6785_v24 }
 0xa40   :  { %6790 = vmatpush3.bf16.xpose.msk.msra.mxu0 %vm7542_vm7, %v6785_v24 }
 0xa41   :  { %6310 = vmatprep.subr.mxu0 %v5669_v47 }
 0xa47   :  { %6301 = vmatmul.mubr.msk.f32.vlgmr.msra.gmra.mrb[12].mxu0 %vm598_vm4, %v7619_v39 }
 0xa48   :  { %6311 = vmatpush3.msra.mxu0 %v5669_v47  ;;  %v5703_v47 = vld [vmem:[%s8068_s5 + $0x18] sm:$0xff] }
 0xa49   :  { %6806 = vmatprep.subr.bf16.mxu0 %v6805_v8 }
 0xb1a   :  { %v6302_v61 = vpop.f32.mrb[12].mxu0 }
 0xb1b   :  { %v1777_v26 = vmul.f32 0.35355338, %v6302_v61  ;;  %v1767_v27 = vpop.f32.mrb[13].mxu0 }
 0xb1c   :  { %v1776_v28 = vmul.f32 0.35355338, %v1767_v27 }
 0xb1d   :  { %v1779_v29 = vadd.f32 %v1777_v26, %v7557_v22 }
 0xb1e   :  { %v1778_v30 = vadd.f32 %v1776_v28, %v7560_v25 }
 0xb1f   :  { %v1783_v31 = vsel %vm694_vm8, %v1779_v29, -inf }
 0xb20   :  { %1784 = vmax.xlane.f32.xlu0 %v1783_v31  ;;  %v1780_v32 = vsel %vm690_vm9, %v1778_v30, -inf }
 0xb21   :  { %1781 = vmax.xlane.f32.xlu1 %v1780_v32 }
 0xbad   :  { %v1785_v33 = vpop.xlane.xlu0 %1784 }
 0xbae   :  { %v1787_v34 = vsub.f32 %v1779_v29, %v1785_v33  ;;  %v1782_v35 = vpop.xlane.xlu1 %1781 }
 0xbaf   :  { %v1786_v36 = vsub.f32 %v1778_v30, %v1782_v35 }
 0xbb0   :  { %v1790_v37 = vmul.f32 1.442695, %v1787_v34 }
 0xbb1   :  { %v1788_v38 = vmul.f32 1.442695, %v1786_v36 }
 0xbb2   :  { %7106 = vpow2.f32 %v1790_v37 }
 0xbb3   :  { %7108 = vpow2.f32 %v1788_v38 }
 0xbbc   :  { %v7107_v39 = vpop.eup %7106 }
 0xbbd   :  { %v7109_v40 = vpop.eup %7108  ;;  %v1795_v41 = vsel %vm694_vm8, %v7107_v39, 0.0 }
 0xbbe   :  { %1796 = vadd.xlane.f32.xlu0 %v1795_v41  ;;  %v1792_v42 = vsel %vm690_vm9, %v7109_v40, 0.0 }
 0xbbf   :  { %1793 = vadd.xlane.f32.xlu1 %v1792_v42 }
 0xc4b   :  { %v1797_v48 = vpop.xlane.xlu0 %1796 }
 0xc4c   :  { %7110 = vrcp.f32 %v1797_v48  ;;  %v1794_v50 = vpop.xlane.xlu1 %1793 }
 0xc4d   :  { %7112 = vrcp.f32 %v1794_v50 }
 0xc56   :  { %v7111_v51 = vpop.eup %7110 }
 0xc57   :  { %v7113_v54 = vpop.eup %7112  ;;  %v1801_v56 = vmul.f32 %v7111_v51, %v7107_v39 }
 0xc58   :  { %v1800_v55 = vmul.f32 %v7113_v54, %v7109_v40 }
 0xc5a   :  { %6307 = vmatprep.mubr.msk.f32.mxu1 %vm690_vm9, %v1800_v55 }
 0xc5b   :  { %6308 = vmatmul.mubr.msk.f32.vlgmr.msra.gmra.mrb[20].mxu1 %vm690_vm9, %v1801_v56 }
 0xc5c   :  { %6800 = vmatpush3.bf16.msra.mxu1 %v6797_v46  ;;  %6323 = vmatprep.mubr.msk.f32.mxu1 %vm289_vm1, %v7501_v44 }
 0xc5d   :  { %6802 = vmatprep.subr.bf16.mxu1 %v6801_v57 }
 0xc60   :  { %6804 = vmatpush3.bf16.msra.mxu1 %v6801_v57 }
 0xc61   :  { %6814 = vmatprep.subr.bf16.mxu1 %v6813_v60 }
 0xc63   :  { %6324 = vmatmul.mubr.msk.f32.vlgmr.msra.gmra.mrb[22].mxu1 %vm289_vm1, %v7509_v49 }
 0xc64   :  { %6816 = vmatpush3.bf16.msra.mxu1 %v6813_v60  ;;  %6345 = vmatprep.mubr.msk.f32.mxu1 %vm289_vm1, %v7501_v44 }
 0xc65   :  { %6818 = vmatprep.subr.bf16.mxu1 %v6817_v2 }
 0xc68   :  { %6820 = vmatpush3.bf16.msra.mxu1 %v6817_v2 }
 0xc6b   :  { %6346 = vmatmul.mubr.msk.f32.vlgmr.msra.gmra.mrb[24].mxu1 %vm289_vm1, %v7509_v49 }
 0xd2e   :  { %v6309_v11 = vpop.f32.mrb[20].mxu1 }
 0xd2f   :  { %v1877_v13 = vpop.f32.mrb[21].mxu1 }
 0xd30   :  { %6312 = vmatprep.mubr.msk.f32.mxu0 %vm598_vm4, %v1877_v13 }
 0xd31   :  { %6313 = vmatmul.mubr.msk.f32.vlgmr.msra.gmra.mrb[8].mxu0 %vm598_vm4, %v6309_v11 }
 0xd32   :  { %6808 = vmatpush3.bf16.msra.mxu0 %v6805_v8  ;;  %6334 = vmatprep.mubr.msk.f32.mxu0 %vm289_vm1, %v7501_v44  ;;  %v5685_v44 = vld [vmem:[%s7347_s12 + $0x3] ss:$0 sm:$0xff] }
 0xd33   :  { %6810 = vmatprep.subr.bf16.mxu0 %v6809_v14 }
 0xd36   :  { %v6325_v16 = vpop.f32.mrb[22].mxu1  ;;  %6812 = vmatpush3.bf16.msra.mxu0 %v6809_v14 }
 0xd37   :  { %v2056_v17 = vadd.f32 %v6325_v16, %v5677_v15  ;;  %v2050_v18 = vpop.f32.mrb[23].mxu1 }
 0xd38   :  { %v2051_v62 = vadd.f32 %v5677_v15, %v2050_v18  ;;  %v2573_v18 = vld [vmem:[%s8070_s25 + $0x8] sm:$0xff] }
 0xd39   :  { %6335 = vmatmul.mubr.msk.f32.vlgmr.msra.gmra.mrb[14].mxu0 %vm289_vm1, %v7509_v49 }
 0xd3a   :  { %6352 = vmatprep.mubr.msk.f32.mxu0 %vm598_vm4, %v2051_v62 }
 0xd3e   :  { %v6347_v20 = vpop.f32.mrb[24].mxu1 }
 0xd3f   :  { %v2232_v21 = vadd.f32 %v6347_v20, %v5693_v19  ;;  %v2226_v23 = vpop.f32.mrb[25].mxu1  ;;  %v2575_v20 = vld [vmem:[%s8070_s25 + $0x18] sm:$0xff] }
 0xd40   :  { %v2227_v24 = vadd.f32 %v5693_v19, %v2226_v23  ;;  %v2574_v19 = vld [vmem:[%s8070_s25 + $0x10] sm:$0xff] }
 0xd42   :  { %v6827_v61 = vpack.c.bf16 %v2232_v21, %v2227_v24  ;;  %v6837_v21 = vpack.c.bf16 %v2575_v20, %v2574_v19 }
 0xd44   :  { %6829 = vmatprep.subr.msk.bf16.mxu1 %vm7530_vm6, %v6827_v61 }
 0xd45   :  { %6832 = vmatpush3.bf16.msk.msra.mxu1 %vm7530_vm6, %v6827_v61 }
 0xe0c   :  { %v6336_v26 = vpop.f32.mrb[14].mxu0 }
 0xe0d   :  { %v2144_v27 = vadd.f32 %v6336_v26, %v5685_v44  ;;  %v2138_v28 = vpop.f32.mrb[15].mxu0 }
 0xe0e   :  { %v2139_v29 = vadd.f32 %v5685_v44, %v2138_v28 }
 0xe10   :  { %v6821_v49 = vpack.c.bf16 %v2144_v27, %v2139_v29  ;;  %v5707_v29 = vld [vmem:[%s8071_s29] ss:$0 sm:$0xff] }
 0xe12   :  { %6823 = vmatprep.subr.msk.bf16.mxu0 %vm7542_vm7, %v6821_v49 }
 0xe13   :  { %6826 = vmatpush3.bf16.xpose.msk.msra.mxu0 %vm7542_vm7, %v6821_v49 }
 0xe14   :  { %6362 = vmatprep.subr.mxu0 %v5703_v47 }
 0xe1a   :  { %6353 = vmatmul.mubr.msk.f32.vlgmr.msra.gmra.mrb[16].mxu0 %vm598_vm4, %v2056_v17  ;;  %v2572_v17 = vld [vmem:[%s8070_s25] sm:$0xff] }
 0xe1b   :  { %6363 = vmatpush3.msra.mxu0 %v5703_v47  ;;  %v6833_v62 = vpack.c.bf16 %v2573_v18, %v2572_v17 }
 0xe1d   :  { %6834 = vmatprep.subr.bf16.mxu1 %v6833_v62 }
 0xeed   :  { %v6354_v30 = vpop.f32.mrb[16].mxu0 }
 0xeee   :  { %v2323_v31 = vmul.f32 0.35355338, %v6354_v30  ;;  %v2313_v32 = vpop.f32.mrb[17].mxu0 }
 0xeef   :  { %v2322_v33 = vmul.f32 0.35355338, %v2313_v32  ;;  %v5708_v32 = vld [vmem:[%s8072_s3] ss:$0 sm:$0xff] }
 0xef0   :  { %v2325_v34 = vadd.f32 %v2323_v31, %v7557_v22 }
 0xef1   :  { %v2324_v35 = vadd.f32 %v2322_v33, %v7560_v25 }
 0xef2   :  { %v2329_v36 = vsel %vm694_vm8, %v2325_v34, -inf }
 0xef3   :  { %2330 = vmax.xlane.f32.xlu0 %v2329_v36  ;;  %v2326_v37 = vsel %vm690_vm9, %v2324_v35, -inf }
 0xef4   :  { %2327 = vmax.xlane.f32.xlu1 %v2326_v37  ;;  %v2682_v37 = vld [vmem:[%s8073_s8] sm:$0xff] }
 0xf80   :  { %v2331_v38 = vpop.xlane.xlu0 %2330 }
 0xf81   :  { %v2333_v39 = vsub.f32 %v2325_v34, %v2331_v38  ;;  %v2328_v40 = vpop.xlane.xlu1 %2327  ;;  %v2683_v38 = vld [vmem:[%s8073_s8 + $0x8] sm:$0xff] }
 0xf82   :  { %v2332_v41 = vsub.f32 %v2324_v35, %v2328_v40  ;;  %v2684_v40 = vld [vmem:[%s8073_s8 + $0x10] sm:$0xff] }
 0xf83   :  { %v2336_v42 = vmul.f32 1.442695, %v2333_v39  ;;  %v6841_v39 = vpack.c.bf16 %v2683_v38, %v2682_v37  ;;  %v5722_v37 = vld [vmem:[%s7332_s24 + $0x98] sm:$0xff] }
 0xf84   :  { %v2334_v43 = vmul.f32 1.442695, %v2332_v41  ;;  %v2685_v41 = vld [vmem:[%s8073_s8 + $0x18] sm:$0xff] }
 0xf85   :  { %7114 = vpow2.f32 %v2336_v42  ;;  %v2686_v42 = vld [vmem:[%s8073_s8 + $0x20] sm:$0xff]  ;;  %6842 = vmatprep.subr.bf16.mxu0 %v6841_v39 }
 0xf86   :  { %7116 = vpow2.f32 %v2334_v43  ;;  %v6845_v43 = vpack.c.bf16 %v2685_v41, %v2684_v40  ;;  %v5738_v40 = vld [vmem:[%s7352_s20 + $0x98] sm:$0xff] }
 0xf8f   :  { %v7115_v45 = vpop.eup %7114 }
 0xf90   :  { %v7117_v46 = vpop.eup %7116  ;;  %v2341_v22 = vsel %vm694_vm8, %v7115_v45, 0.0 }
 0xf91   :  { %2342 = vadd.xlane.f32.xlu0 %v2341_v22  ;;  %v2338_v25 = vsel %vm690_vm9, %v7117_v46, 0.0  ;;  %v2688_v22 = vld [vmem:[%s8073_s8 + $0x30] sm:$0xff] }
 0xf92   :  { %2339 = vadd.xlane.f32.xlu1 %v2338_v25  ;;  %v2689_v25 = vld [vmem:[%s8073_s8 + $0x38] sm:$0xff] }
 0xf93   :  { %v6853_v47 = vpack.c.bf16 %v2689_v25, %v2688_v22 }
0x101e   :  { %v2343_v48 = vpop.xlane.xlu0 %2342 }
0x101f   :  { %7118 = vrcp.f32 %v2343_v48  ;;  %v2340_v50 = vpop.xlane.xlu1 %2339  ;;  %v5709_v48 = vld [vmem:[%s8074_s15] ss:$0 sm:$0xff] }
0x1020   :  { %7120 = vrcp.f32 %v2340_v50 }
0x1029   :  { %v7119_v51 = vpop.eup %7118 }
0x102a   :  { %v7121_v52 = vpop.eup %7120  ;;  %v2347_v54 = vmul.f32 %v7119_v51, %v7115_v45  ;;  %v2687_v45 = vld [vmem:[%s8073_s8 + $0x28] sm:$0xff] }
0x102b   :  { %v2346_v53 = vmul.f32 %v7121_v52, %v7117_v46  ;;  %v6849_v46 = vpack.c.bf16 %v2687_v45, %v2686_v42  ;;  %v5727_v42 = vld [vmem:[%s7342_s6 + $0x80] sm:$0xff] }
0x102d   :  { %6359 = vmatprep.mubr.msk.f32.mxu1 %vm690_vm9, %v2346_v53 }
0x102e   :  { %6360 = vmatmul.mubr.msk.f32.vlgmr.msra.gmra.mrb[26].mxu1 %vm690_vm9, %v2347_v54 }
0x102f   :  { %6836 = vmatpush3.bf16.msra.mxu1 %v6833_v62 }
0x1030   :  { %6838 = vmatprep.subr.bf16.mxu1 %v6837_v21 }
0x1033   :  { %6840 = vmatpush3.bf16.msra.mxu1 %v6837_v21 }
0x1101   :  { %v6361_v55 = vpop.f32.mrb[26].mxu1 }
0x1102   :  { %v2423_v56 = vpop.f32.mrb[27].mxu1 }
0x1103   :  { %6364 = vmatprep.mubr.msk.f32.mxu0 %vm598_vm4, %v2423_v56 }
0x1104   :  { %6365 = vmatmul.mubr.msk.f32.vlgmr.msra.gmra.mrb[8].mxu0 %vm598_vm4, %v6361_v55 }
0x1105   :  { %6844 = vmatpush3.bf16.msra.mxu0 %v6841_v39  ;;  %v5737_v39 = vld [vmem:[%s7352_s20 + $0x90] sm:$0xff] }
0x1106   :  { %6846 = vmatprep.subr.bf16.mxu0 %v6845_v43  ;;  %v6877_v41 = vpack.c.bf16 %v5738_v40, %v5737_v39  ;;  %v7826_v40 = vld [vmem:[%s8065_s0] sm:$0xff] }
0x1109   :  { %6848 = vmatpush3.bf16.msra.mxu0 %v6845_v43  ;;  %v5728_v43 = vld [vmem:[%s7342_s6 + $0x88] sm:$0xff] }
0x110a   :  { %6850 = vmatprep.subr.bf16.mxu0 %v6849_v46  ;;  %v6865_v45 = vpack.c.bf16 %v5728_v43, %v5727_v42 }
0x110d   :  { %6852 = vmatpush3.bf16.msra.mxu0 %v6849_v46 }
0x110e   :  { %6854 = vmatprep.subr.bf16.mxu0 %v6853_v47 }
0x1111   :  { %6856 = vmatpush3.bf16.msra.mxu0 %v6853_v47 }
0x11d7   :  { %v6366_v57 = vpop.f32.mrb[8].mxu0 }
0x11d8   :  { %v2518_v59 = vadd.f32 %v6366_v57, %v7481_v5  ;;  %v2506_v60 = vpop.f32.mrb[9].mxu0 }
0x11d9   :  { %v2517_v63 = vadd.f32 %v2506_v60, %v7476_v0 }
0x11da   :  { %v7716_v1 = vadd.f32 %v5706_v58, %v2518_v59 }
0x11db   :  { %v7718_v2 = vadd.f32 %v5706_v58, %v2517_v63 }
0x11dc   :  { %v2533_v6 = vsel %vm293_vm2, %v7716_v1, 0.0 }
0x11dd   :  { %2534 = vadd.xlane.f32.xlu0 %v2533_v6  ;;  %v2530_v7 = vsel %vm289_vm1, %v7718_v2, 0.0 }
0x11de   :  { %2531 = vadd.xlane.f32.xlu1 %v2530_v7 }
0x126a   :  { %v2535_v8 = vpop.xlane.xlu0 %2534 }
0x126b   :  { %v2537_v5 = vmul.f32 0.03125, %v2535_v8  ;;  %v2532_v9 = vpop.xlane.xlu1 %2531 }
0x126c   :  { %v2536_v0 = vmul.f32 0.03125, %v2532_v9 }
0x126d   :  { %v2539_v10 = vsub.f32 %v7716_v1, %v2537_v5 }
0x126e   :  { %v2538_v11 = vsub.f32 %v7718_v2, %v2536_v0 }
0x126f   :  { %v2541_v13 = vmul.f32 %v2539_v10, %v2539_v10 }
0x1270   :  { %v2540_v14 = vmul.f32 %v2538_v11, %v2538_v11 }
0x1271   :  { %v2545_v15 = vsel %vm293_vm2, %v2541_v13, 0.0 }
0x1272   :  { %2546 = vadd.xlane.f32.xlu0 %v2545_v15  ;;  %v2542_v16 = vsel %vm289_vm1, %v2540_v14, 0.0 }
0x1273   :  { %2543 = vadd.xlane.f32.xlu1 %v2542_v16  ;;  %v5714_v16 = vld [vmem:[%s8075_s16] ss:$0 sm:$0xff] }
0x12ff   :  { %v2547_v23 = vpop.xlane.xlu0 %2546 }
0x1300   :  { %v2549_v24 = vmul.f32 0.03125, %v2547_v23  ;;  %v2544_v61 = vpop.xlane.xlu1 %2543 }
0x1301   :  { %v2548_v44 = vmul.f32 0.03125, %v2544_v61 }
0x1302   :  { %v2551_v26 = vadd.f32 1e-12, %v2549_v24 }
0x1303   :  { %v2550_v27 = vadd.f32 1e-12, %v2548_v44 }
0x1304   :  { %7122 = vrsqrt.f32 %v2551_v26 }
0x1305   :  { %7124 = vrsqrt.f32 %v2550_v27 }
0x130e   :  { %v7123_v28 = vpop.eup %7122 }
0x130f   :  { %v7125_v49 = vpop.eup %7124  ;;  %v2555_v30 = vmul.f32 %v7123_v28, %v2539_v10 }
0x1310   :  { %v2554_v31 = vmul.f32 %v7125_v49, %v2538_v11 }
0x1311   :  { %v2563_v33 = vmul.f32 %v5707_v29, %v2555_v30  ;;  %v5719_v30 = vld [vmem:[%s7332_s24 + $0x80] sm:$0xff] }
0x1312   :  { %v2562_v34 = vmul.f32 %v5707_v29, %v2554_v31  ;;  %v5720_v31 = vld [vmem:[%s7332_s24 + $0x88] sm:$0xff] }
0x1313   :  { %v2571_v36 = vadd.f32 %v5708_v32, %v2563_v33  ;;  %v5735_v33 = vld [vmem:[%s7352_s20 + $0x80] sm:$0xff] }
0x1314   :  { %v2570_v35 = vadd.f32 %v5708_v32, %v2562_v34  ;;  %v6857_v32 = vpack.c.bf16 %v5720_v31, %v5719_v30  ;;  %v5736_v34 = vld [vmem:[%s7352_s20 + $0x88] sm:$0xff]  ;;  %v5769_v31 = vld [vmem:[%s7352_s20 + $0xb0] sm:$0xff] }
0x1316   :  { %6375 = vmatprep.mubr.msk.f32.mxu1 %vm289_vm1, %v2570_v35  ;;  %v6873_v35 = vpack.c.bf16 %v5736_v34, %v5735_v33  ;;  %6858 = vmatprep.subr.bf16.mxu1 %v6857_v32 }
0x1317   :  { %6376 = vmatmul.mubr.msk.f32.vlgmr.msra.gmra.mrb[28].mxu1 %vm289_vm1, %v2571_v36  ;;  %v5721_v36 = vld [vmem:[%s7332_s24 + $0x90] sm:$0xff] }
0x1318   :  { %6860 = vmatpush3.bf16.msra.mxu1 %v6857_v32  ;;  %6874 = vmatprep.subr.bf16.mxu0 %v6873_v35  ;;  %v6861_v38 = vpack.c.bf16 %v5722_v37, %v5721_v36  ;;  %v5770_v32 = vld [vmem:[%s7352_s20 + $0xb8] sm:$0xff] }
0x1319   :  { %v6913_v33 = vpack.c.bf16 %v5770_v32, %v5769_v31 }
0x131a   :  { %6862 = vmatprep.subr.bf16.mxu1 %v6861_v38 }
0x131c   :  { %6864 = vmatpush3.bf16.msra.mxu1 %v6861_v38  ;;  %v7822_v38 = vld [vmem:[%s8065_s0 + $0x8] sm:$0x3] }
0x131d   :  { %6866 = vmatprep.subr.bf16.mxu1 %v6865_v45 }
0x13ea   :  { %v6377_v50 = vpop.f32.mrb[28].mxu1 }
0x13eb   :  { %v2661_v51 = vadd.f32 %v6377_v50, %v5709_v48  ;;  %v2655_v52 = vpop.f32.mrb[29].mxu1 }
0x13ec   :  { %v2656_v53 = vadd.f32 %v5709_v48, %v2655_v52  ;;  %v5717_v52 = vld [vmem:[%s7322_s14 + $0x1] ss:$0 sm:$0xff]  ;;  %s8076_s14 = sld [smem:[#allocation19_spill]] }
0x13ed   :  { %v2667_v54 = vmul.f32 0.044715, %v2661_v51  ;;  %v2665_v11 = vmul.f32 0.5, %v2661_v51 }
0x13ee   :  { %v2666_v55 = vmul.f32 0.044715, %v2656_v53  ;;  %v2664_v0 = vmul.f32 0.5, %v2656_v53 }
0x13ef   :  { %v2669_v56 = vmul.f32 %v2667_v54, %v2661_v51 }
0x13f0   :  { %v2668_v57 = vmul.f32 %v2666_v55, %v2656_v53 }
0x13f1   :  { %v2671_v58 = vmul.f32 %v2669_v56, %v2661_v51  ;;  %v5718_v56 = vld [vmem:[%s7327_s19 + $0x1] ss:$0 sm:$0xff]  ;;  %s8077_s19 = sld [smem:[#allocation20_spill]] }
0x13f2   :  { %v2670_v59 = vmul.f32 %v2668_v57, %v2656_v53 }
0x13f3   :  { %v2673_v60 = vadd.f32 %v2671_v58, %v2661_v51 }
0x13f4   :  { %v2672_v63 = vadd.f32 %v2670_v59, %v2656_v53  ;;  %v5729_v59 = vld [vmem:[%s7342_s6 + $0x90] sm:$0xff] }
0x13f5   :  { %v2675_v6 = vmul.f32 0.7978846, %v2673_v60  ;;  %v5730_v60 = vld [vmem:[%s7342_s6 + $0x98] sm:$0xff] }
0x13f6   :  { %v2674_v7 = vmul.f32 0.7978846, %v2672_v63 }
0x13f7   :  { %7126 = vtanh.f32 %v2675_v6 }
0x13f8   :  { %7128 = vtanh.f32 %v2674_v7  ;;  %v6869_v7 = vpack.c.bf16 %v5730_v60, %v5729_v59 }
0x1401   :  { %v7127_v8 = vpop.eup %7126 }
0x1402   :  { %v7129_v5 = vpop.eup %7128  ;;  %v2679_v9 = vadd.f32 1.0, %v7127_v8  ;;  %v5740_v8 = vld [vmem:[%s7357_s27 + $0x4] ss:$0 sm:$0xff] }
0x1403   :  { %v2678_v10 = vadd.f32 1.0, %v7129_v5  ;;  %v5724_v5 = vld [vmem:[%s7337_s30 + $0x4] ss:$0 sm:$0xff] }
0x1404   :  { %v2681_v14 = vmul.f32 %v2679_v9, %v2665_v11 }
0x1405   :  { %v2680_v13 = vmul.f32 %v2678_v10, %v2664_v0 }
0x1407   :  { %6394 = vmatprep.mubr.msk.f32.mxu0 %vm162_vm0, %v2680_v13 }
0x1408   :  { %6395 = vmatmul.mubr.msk.f32.vlgmr.msra.gmra.mrb[18].mxu0 %vm162_vm0, %v2681_v14 }
0x1409   :  { %6876 = vmatpush3.bf16.msra.mxu0 %v6873_v35 }
0x140a   :  { %6878 = vmatprep.subr.bf16.mxu0 %v6877_v41 }
0x140d   :  { %6880 = vmatpush3.bf16.msra.mxu0 %v6877_v41 }
0x14db   :  { %v6396_v15 = vpop.f32.mrb[18].mxu0 }
0x14dc   :  { %v2772_v17 = vadd.f32 %v6396_v15, %v7716_v1  ;;  %v2762_v18 = vpop.f32.mrb[19].mxu0 }
0x14dd   :  { %v2771_v62 = vadd.f32 %v2762_v18, %v7718_v2 }
0x14de   :  { %v7750_v19 = vadd.f32 %v5714_v16, %v2772_v17  ;;  %v5732_v17 = vld [vmem:[%s7347_s12 + $0x4] ss:$0 sm:$0xff] }
0x14df   :  { %v7752_v20 = vadd.f32 %v5714_v16, %v2771_v62 }
0x14e0   :  { %v2789_v21 = vsel %vm293_vm2, %v7750_v19, 0.0 }
0x14e1   :  { %2790 = vadd.xlane.f32.xlu0 %v2789_v21  ;;  %v2786_v23 = vsel %vm289_vm1, %v7752_v20, 0.0 }
0x14e2   :  { %2787 = vadd.xlane.f32.xlu1 %v2786_v23  ;;  %v5751_v23 = vld [vmem:[%s7332_s24 + $0xa0] sm:$0xff] }
0x156e   :  { %v2791_v24 = vpop.xlane.xlu0 %2790 }
0x156f   :  { %v2793_v1 = vmul.f32 0.03125, %v2791_v24  ;;  %v2788_v61 = vpop.xlane.xlu1 %2787  ;;  %v5752_v24 = vld [vmem:[%s7332_s24 + $0xa8] sm:$0xff] }
0x1570   :  { %v2792_v2 = vmul.f32 0.03125, %v2788_v61 }
0x1571   :  { %v2795_v44 = vsub.f32 %v7750_v19, %v2793_v1 }
0x1572   :  { %v2794_v26 = vsub.f32 %v7752_v20, %v2792_v2  ;;  %v6893_v2 = vpack.c.bf16 %v5752_v24, %v5751_v23 }
0x1573   :  { %v2797_v27 = vmul.f32 %v2795_v44, %v2795_v44 }
0x1574   :  { %v2796_v28 = vmul.f32 %v2794_v26, %v2794_v26 }
0x1575   :  { %v2801_v29 = vsel %vm293_vm2, %v2797_v27, 0.0 }
0x1576   :  { %2802 = vadd.xlane.f32.xlu0 %v2801_v29  ;;  %v2798_v49 = vsel %vm289_vm1, %v2796_v28, 0.0  ;;  %v5767_v29 = vld [vmem:[%s7352_s20 + $0xa0] sm:$0xff] }
0x1577   :  { %2799 = vadd.xlane.f32.xlu1 %v2798_v49  ;;  %v5768_v49 = vld [vmem:[%s7352_s20 + $0xa8] sm:$0xff] }
0x1578   :  { %v6909_v30 = vpack.c.bf16 %v5768_v49, %v5767_v29 }
0x1603   :  { %v2803_v46 = vpop.xlane.xlu0 %2802 }
0x1604   :  { %v2805_v22 = vmul.f32 0.03125, %v2803_v46  ;;  %v2800_v25 = vpop.xlane.xlu1 %2799 }
0x1605   :  { %v2804_v47 = vmul.f32 0.03125, %v2800_v25 }
0x1606   :  { %v2807_v48 = vadd.f32 1e-12, %v2805_v22 }
0x1607   :  { %v2806_v50 = vadd.f32 1e-12, %v2804_v47  ;;  %v5772_v47 = vld [vmem:[%s7357_s27 + $0x5] ss:$0 sm:$0xff] }
0x1608   :  { %7130 = vrsqrt.f32 %v2807_v48 }
0x1609   :  { %7132 = vrsqrt.f32 %v2806_v50 }
0x1612   :  { %v7131_v51 = vpop.eup %7130 }
0x1613   :  { %v7133_v53 = vpop.eup %7132  ;;  %v2811_v54 = vmul.f32 %v7131_v51, %v2795_v44  ;;  %v5753_v44 = vld [vmem:[%s7332_s24 + $0xb0] sm:$0xff] }
0x1614   :  { %v2810_v55 = vmul.f32 %v7133_v53, %v2794_v26  ;;  %v5754_v26 = vld [vmem:[%s7332_s24 + $0xb8] sm:$0xff] }
0x1615   :  { %v2819_v57 = vmul.f32 %v5717_v52, %v2811_v54  ;;  %v6897_v28 = vpack.c.bf16 %v5754_v26, %v5753_v44 }
0x1616   :  { %v2818_v58 = vmul.f32 %v5717_v52, %v2810_v55 }
0x1617   :  { %v7778_v6 = vadd.f32 %v5718_v56, %v2819_v57 }
0x1618   :  { %v7776_v63 = vadd.f32 %v5718_v56, %v2818_v58 }
0x161a   :  { %6405 = vmatprep.mubr.msk.f32.mxu1 %vm289_vm1, %v7776_v63  ;;  %6427 = vmatprep.mubr.msk.f32.mxu0 %vm289_vm1, %v7776_v63 }
0x161b   :  { %6406 = vmatmul.mubr.msk.f32.vlgmr.msra.gmra.mrb[30].mxu1 %vm289_vm1, %v7778_v6  ;;  %6428 = vmatmul.mubr.msk.f32.vlgmr.msra.gmra.mrb[20].mxu0 %vm289_vm1, %v7778_v6 }
0x161c   :  { %6868 = vmatpush3.bf16.msra.mxu1 %v6865_v45  ;;  %6416 = vmatprep.mubr.msk.f32.mxu1 %vm289_vm1, %v7776_v63  ;;  %v5756_v45 = vld [vmem:[%s7337_s30 + $0x5] ss:$0 sm:$0xff] }
0x161d   :  { %6870 = vmatprep.subr.bf16.mxu1 %v6869_v7 }
0x1620   :  { %6872 = vmatpush3.bf16.msra.mxu1 %v6869_v7 }
0x1623   :  { %6417 = vmatmul.mubr.msk.f32.vlgmr.msra.gmra.mrb[32].mxu1 %vm289_vm1, %v7778_v6 }
0x16ee   :  { %v6407_v9 = vpop.f32.mrb[30].mxu1  ;;  %v6429_v0 = vpop.f32.mrb[20].mxu0 }
0x16ef   :  { %v3095_v10 = vadd.f32 %v6429_v0, %v5740_v8  ;;  %v2913_v11 = vpop.f32.mrb[31].mxu1  ;;  %v3089_v13 = vpop.f32.mrb[21].mxu0  ;;  %v2919_v27 = vadd.f32 %v6407_v9, %v5724_v5  ;;  %v5759_v9 = vld [vmem:[%s7342_s6 + $0xa0] sm:$0xff]  ;;  %v5760_v0 = vld [vmem:[%s7342_s6 + $0xa8] sm:$0xff] }
0x16f0   :  { %v2914_v14 = vadd.f32 %v5724_v5, %v2913_v11  ;;  %v3090_v15 = vadd.f32 %v5740_v8, %v3089_v13 }
0x16f2   :  { %v6887_v16 = vpack.c.bf16 %v3095_v10, %v3090_v15  ;;  %6434 = vmatprep.mubr.msk.f32.mxu1 %vm598_vm4, %v2914_v14  ;;  %v6901_v10 = vpack.c.bf16 %v5760_v0, %v5759_v9  ;;  %v5761_v15 = vld [vmem:[%s7342_s6 + $0xb0] sm:$0xff]  ;;  %v5806_v0 = vld [vmem:[%s7352_s20 + $0xd8] sm:$0xff] }
0x16f3   :  { %v5805_v9 = vld [vmem:[%s7352_s20 + $0xd0] sm:$0xff] }
0x16f4   :  { %6889 = vmatprep.subr.msk.bf16.mxu0 %vm7530_vm6, %v6887_v16 }
0x16f5   :  { %6892 = vmatpush3.bf16.msk.msra.mxu0 %vm7530_vm6, %v6887_v16  ;;  %v5762_v16 = vld [vmem:[%s7342_s6 + $0xb8] sm:$0xff] }
0x16f6   :  { %v6418_v18 = vpop.f32.mrb[32].mxu1  ;;  %6902 = vmatprep.subr.bf16.mxu0 %v6901_v10 }
0x16f7   :  { %v3007_v62 = vadd.f32 %v6418_v18, %v5732_v17  ;;  %v3001_v21 = vpop.f32.mrb[33].mxu1 }
0x16f8   :  { %v3002_v1 = vadd.f32 %v5732_v17, %v3001_v21  ;;  %v6905_v21 = vpack.c.bf16 %v5762_v16, %v5761_v15 }
0x16fa   :  { %v6881_v61 = vpack.c.bf16 %v3007_v62, %v3002_v1 }
0x16fc   :  { %6883 = vmatprep.subr.msk.bf16.mxu1 %vm7542_vm7, %v6881_v61 }
0x16fd   :  { %6886 = vmatpush3.bf16.xpose.msk.msra.mxu1 %vm7542_vm7, %v6881_v61  ;;  %v5764_v61 = vld [vmem:[%s7347_s12 + $0x5] ss:$0 sm:$0xff] }
0x16fe   :  { %6894 = vmatprep.subr.bf16.mxu1 %v6893_v2 }
0x1704   :  { %6435 = vmatmul.mubr.msk.f32.vlgmr.msra.gmra.mrb[34].mxu1 %vm598_vm4, %v2919_v27 }
0x1705   :  { %6896 = vmatpush3.bf16.msra.mxu1 %v6893_v2  ;;  %6452 = vmatprep.mubr.msk.f32.mxu1 %vm289_vm1, %v7776_v63 }
0x1706   :  { %6898 = vmatprep.subr.bf16.mxu1 %v6897_v28 }
0x1709   :  { %6900 = vmatpush3.bf16.msra.mxu1 %v6897_v28 }
0x170a   :  { %6910 = vmatprep.subr.bf16.mxu1 %v6909_v30 }
0x170c   :  { %6453 = vmatmul.mubr.msk.f32.vlgmr.msra.gmra.mrb[36].mxu1 %vm289_vm1, %v7778_v6 }
0x170d   :  { %6912 = vmatpush3.bf16.msra.mxu1 %v6909_v30  ;;  %6474 = vmatprep.mubr.msk.f32.mxu1 %vm289_vm1, %v7776_v63 }
0x170e   :  { %6914 = vmatprep.subr.bf16.mxu1 %v6913_v33 }
0x1711   :  { %6916 = vmatpush3.bf16.msra.mxu1 %v6913_v33 }
0x1714   :  { %6475 = vmatmul.mubr.msk.f32.vlgmr.msra.gmra.mrb[38].mxu1 %vm289_vm1, %v7778_v6 }
0x17d7   :  { %v6436_v34 = vpop.f32.mrb[34].mxu1 }
0x17d8   :  { %v3186_v35 = vmul.f32 0.35355338, %v6436_v34  ;;  %v3176_v36 = vpop.f32.mrb[35].mxu1 }
0x17d9   :  { %v3185_v37 = vmul.f32 0.35355338, %v3176_v36 }
0x17da   :  { %v3188_v39 = vadd.f32 %v7822_v38, %v3186_v35 }
0x17db   :  { %v3187_v41 = vadd.f32 %v7826_v40, %v3185_v37 }
0x17dc   :  { %v3192_v42 = vsel %vm694_vm8, %v3188_v39, -inf }
0x17dd   :  { %3193 = vmax.xlane.f32.xlu0 %v3192_v42  ;;  %v3189_v43 = vsel %vm690_vm9, %v3187_v41, -inf }
0x17de   :  { %3190 = vmax.xlane.f32.xlu1 %v3189_v43 }
0x17df   :  { %v6454_v46 = vpop.f32.mrb[36].mxu1 }
0x17e0   :  { %v3382_v22 = vadd.f32 %v6454_v46, %v5756_v45  ;;  %v3376_v25 = vpop.f32.mrb[37].mxu1 }
0x17e1   :  { %v3377_v23 = vadd.f32 %v5756_v45, %v3376_v25 }
0x17e7   :  { %v6476_v48 = vpop.f32.mrb[38].mxu1 }
0x17e8   :  { %v3558_v50 = vadd.f32 %v6476_v48, %v5772_v47  ;;  %v3552_v51 = vpop.f32.mrb[39].mxu1  ;;  %v5788_v48 = vld [vmem:[%s7332_s24 + $0xc8] sm:$0xff] }
0x17e9   :  { %v3553_v52 = vadd.f32 %v5772_v47, %v3552_v51  ;;  %v5787_v47 = vld [vmem:[%s7332_s24 + $0xc0] sm:$0xff]  ;;  %v5782_v51 = vld [vmem:[%s8068_s5 + $0x28] sm:$0xff] }
0x17eb   :  { %v6923_v53 = vpack.c.bf16 %v3558_v50, %v3553_v52  ;;  %v6929_v50 = vpack.c.bf16 %v5788_v48, %v5787_v47 }
0x17ed   :  { %6925 = vmatprep.subr.msk.bf16.mxu1 %vm7530_vm6, %v6923_v53 }
0x17ee   :  { %6928 = vmatpush3.bf16.msk.msra.mxu1 %vm7530_vm6, %v6923_v53 }
0x17ef   :  { %6930 = vmatprep.subr.bf16.mxu1 %v6929_v50 }
0x186a   :  { %v3194_v54 = vpop.xlane.xlu0 %3193 }
0x186b   :  { %v3196_v55 = vsub.f32 %v3188_v39, %v3194_v54  ;;  %v3191_v56 = vpop.xlane.xlu1 %3190 }
0x186c   :  { %v3195_v57 = vsub.f32 %v3187_v41, %v3191_v56  ;;  %v5790_v56 = vld [vmem:[%s7332_s24 + $0xd8] sm:$0xff] }
0x186d   :  { %v3199_v58 = vmul.f32 1.442695, %v3196_v55  ;;  %v5789_v55 = vld [vmem:[%s7332_s24 + $0xd0] sm:$0xff] }
0x186e   :  { %v3197_v59 = vmul.f32 1.442695, %v3195_v57 }
0x186f   :  { %7134 = vpow2.f32 %v3199_v58 }
0x1870   :  { %7136 = vpow2.f32 %v3197_v59 }
0x1879   :  { %v7135_v60 = vpop.eup %7134 }
0x187a   :  { %v7137_v7 = vpop.eup %7136  ;;  %v3204_v8 = vsel %vm694_vm8, %v7135_v60, 0.0 }
0x187b   :  { %3205 = vadd.xlane.f32.xlu0 %v3204_v8  ;;  %v3201_v5 = vsel %vm690_vm9, %v7137_v7, 0.0  ;;  %v5804_v8 = vld [vmem:[%s7352_s20 + $0xc8] sm:$0xff] }
0x187c   :  { %3202 = vadd.xlane.f32.xlu1 %v3201_v5 }
0x1908   :  { %v3206_v11 = vpop.xlane.xlu0 %3205 }
0x1909   :  { %7138 = vrcp.f32 %v3206_v11  ;;  %v3203_v13 = vpop.xlane.xlu1 %3202  ;;  %v5750_v11 = vld [vmem:[%s8068_s5 + $0x20] sm:$0xff] }
0x190a   :  { %7140 = vrcp.f32 %v3203_v13  ;;  %v5795_v13 = vld [vmem:[%s7342_s6 + $0xc0] sm:$0xff] }
0x1913   :  { %v7139_v14 = vpop.eup %7138 }
0x1914   :  { %v7141_v17 = vpop.eup %7140  ;;  %v3210_v62 = vmul.f32 %v7139_v14, %v7135_v60  ;;  %v6933_v60 = vpack.c.bf16 %v5790_v56, %v5789_v55  ;;  %v5796_v14 = vld [vmem:[%s7342_s6 + $0xc8] sm:$0xff]  ;;  %v5821_v56 = vld [vmem:[%s7332_s24 + $0xe0] sm:$0xff] }
0x1915   :  { %v3209_v18 = vmul.f32 %v7141_v17, %v7137_v7  ;;  %v5803_v7 = vld [vmem:[%s7352_s20 + $0xc0] sm:$0xff]  ;;  %v6937_v17 = vpack.c.bf16 %v5796_v14, %v5795_v13 }
0x1916   :  { %v6945_v5 = vpack.c.bf16 %v5804_v8, %v5803_v7  ;;  %v5837_v14 = vld [vmem:[%s7352_s20 + $0xe0] sm:$0xff] }
0x1917   :  { %6441 = vmatprep.mubr.msk.f32.mxu0 %vm690_vm9, %v3209_v18  ;;  %v5792_v18 = vld [vmem:[%s7337_s30 + $0x6] ss:$0 sm:$0xff] }
0x1918   :  { %6442 = vmatmul.mubr.msk.f32.vlgmr.msra.gmra.mrb[22].mxu0 %vm690_vm9, %v3210_v62  ;;  %v5797_v62 = vld [vmem:[%s7342_s6 + $0xd0] sm:$0xff] }
0x1919   :  { %6904 = vmatpush3.bf16.msra.mxu0 %v6901_v10  ;;  %6463 = vmatprep.mubr.msk.f32.mxu0 %vm289_vm1, %v7776_v63  ;;  %v6949_v10 = vpack.c.bf16 %v5806_v0, %v5805_v9  ;;  %v5824_v9 = vld [vmem:[%s7332_s24 + $0xf8] sm:$0xff] }
0x191a   :  { %6906 = vmatprep.subr.bf16.mxu0 %v6905_v21 }
0x191d   :  { %6908 = vmatpush3.bf16.msra.mxu0 %v6905_v21  ;;  %v5798_v21 = vld [vmem:[%s7342_s6 + $0xd8] sm:$0xff] }
0x1920   :  { %6464 = vmatmul.mubr.msk.f32.vlgmr.msra.gmra.mrb[24].mxu0 %vm289_vm1, %v7778_v6 }
0x1921   :  { %6481 = vmatprep.mubr.msk.f32.mxu0 %vm598_vm4, %v3377_v23 }
0x19eb   :  { %v7850_v24 = vpop.f32.mrb[22].mxu0 }
0x19ec   :  { %v7852_v1 = vpop.f32.mrb[23].mxu0 }
0x19f3   :  { %v6465_v2 = vpop.f32.mrb[24].mxu0 }
0x19f4   :  { %v3470_v44 = vadd.f32 %v6465_v2, %v5764_v61  ;;  %v3464_v26 = vpop.f32.mrb[25].mxu0 }
0x19f5   :  { %v3465_v27 = vadd.f32 %v5764_v61, %v3464_v26  ;;  %v5808_v26 = vld [vmem:[%s7357_s27 + $0x6] ss:$0 sm:$0xff] }
0x19f7   :  { %v6917_v28 = vpack.c.bf16 %v3470_v44, %v3465_v27  ;;  %v6941_v44 = vpack.c.bf16 %v5798_v21, %v5797_v62  ;;  %v5829_v21 = vld [vmem:[%s7342_s6 + $0xe0] sm:$0xff] }
0x19f9   :  { %6919 = vmatprep.subr.msk.bf16.mxu0 %vm7542_vm7, %v6917_v28 }
0x19fa   :  { %6922 = vmatpush3.bf16.xpose.msk.msra.mxu0 %vm7542_vm7, %v6917_v28 }
0x19fb   :  { %6491 = vmatprep.subr.mxu0 %v5782_v51 }
0x1a01   :  { %6482 = vmatmul.mubr.msk.f32.vlgmr.msra.gmra.mrb[26].mxu0 %vm598_vm4, %v3382_v22 }
0x1a02   :  { %6492 = vmatpush3.msra.mxu0 %v5782_v51 }
0x1a03   :  { %6496 = vmatprep.subr.mxu0 %v5750_v11 }
0x1ad4   :  { %v6483_v29 = vpop.f32.mrb[26].mxu0 }
0x1ad5   :  { %v3649_v49 = vmul.f32 0.35355338, %v6483_v29  ;;  %v3639_v30 = vpop.f32.mrb[27].mxu0 }
0x1ad6   :  { %v3648_v31 = vmul.f32 0.35355338, %v3639_v30 }
0x1ad7   :  { %v3651_v32 = vadd.f32 %v7822_v38, %v3649_v49 }
0x1ad8   :  { %v3650_v33 = vadd.f32 %v7826_v40, %v3648_v31 }
0x1ad9   :  { %v3655_v34 = vsel %vm694_vm8, %v3651_v32, -inf }
0x1ada   :  { %3656 = vmax.xlane.f32.xlu0 %v3655_v34  ;;  %v3652_v35 = vsel %vm690_vm9, %v3650_v33, -inf }
0x1adb   :  { %3653 = vmax.xlane.f32.xlu1 %v3652_v35 }
0x1b67   :  { %v3657_v36 = vpop.xlane.xlu0 %3656 }
0x1b68   :  { %v3659_v37 = vsub.f32 %v3651_v32, %v3657_v36  ;;  %v3654_v39 = vpop.xlane.xlu1 %3653 }
0x1b69   :  { %v3658_v41 = vsub.f32 %v3650_v33, %v3654_v39 }
0x1b6a   :  { %v3662_v42 = vmul.f32 1.442695, %v3659_v37 }
0x1b6b   :  { %v3660_v43 = vmul.f32 1.442695, %v3658_v41 }
0x1b6c   :  { %7142 = vpow2.f32 %v3662_v42 }
0x1b6d   :  { %7144 = vpow2.f32 %v3660_v43 }
0x1b76   :  { %v7143_v45 = vpop.eup %7142 }
0x1b77   :  { %v7145_v46 = vpop.eup %7144  ;;  %v3667_v22 = vsel %vm694_vm8, %v7143_v45, 0.0 }
0x1b78   :  { %3668 = vadd.xlane.f32.xlu0 %v3667_v22  ;;  %v3664_v25 = vsel %vm690_vm9, %v7145_v46, 0.0 }
0x1b79   :  { %3665 = vadd.xlane.f32.xlu1 %v3664_v25 }
0x1c05   :  { %v3669_v52 = vpop.xlane.xlu0 %3668 }
0x1c06   :  { %7146 = vrcp.f32 %v3669_v52  ;;  %v3666_v53 = vpop.xlane.xlu1 %3665 }
0x1c07   :  { %7148 = vrcp.f32 %v3666_v53 }
0x1c10   :  { %v7147_v54 = vpop.eup %7146 }
0x1c11   :  { %v7149_v57 = vpop.eup %7148  ;;  %v3673_v59 = vmul.f32 %v7147_v54, %v7143_v45 }
0x1c12   :  { %v3672_v58 = vmul.f32 %v7149_v57, %v7145_v46  ;;  %v5822_v57 = vld [vmem:[%s7332_s24 + $0xe8] sm:$0xff] }
0x1c14   :  { %6488 = vmatprep.mubr.msk.f32.mxu1 %vm690_vm9, %v3672_v58  ;;  %v6965_v58 = vpack.c.bf16 %v5822_v57, %v5821_v56 }
0x1c15   :  { %6489 = vmatmul.mubr.msk.f32.vlgmr.msra.gmra.mrb[40].mxu1 %vm690_vm9, %v3673_v59  ;;  %v5818_v59 = vld [vmem:[%s8068_s5 + $0x30] sm:$0xff] }
0x1c16   :  { %6932 = vmatpush3.bf16.msra.mxu1 %v6929_v50  ;;  %6509 = vmatprep.mubr.msk.f32.mxu1 %vm289_vm1, %v7776_v63 }
0x1c17   :  { %6934 = vmatprep.subr.bf16.mxu1 %v6933_v60 }
0x1c1a   :  { %6936 = vmatpush3.bf16.msra.mxu1 %v6933_v60 }
0x1c1b   :  { %6946 = vmatprep.subr.bf16.mxu1 %v6945_v5 }
0x1c1d   :  { %6510 = vmatmul.mubr.msk.f32.vlgmr.msra.gmra.mrb[42].mxu1 %vm289_vm1, %v7778_v6 }
0x1c1e   :  { %6948 = vmatpush3.bf16.msra.mxu1 %v6945_v5  ;;  %6531 = vmatprep.mubr.msk.f32.mxu1 %vm289_vm1, %v7776_v63  ;;  %v5823_v5 = vld [vmem:[%s7332_s24 + $0xf0] sm:$0xff]  ;;  %s8078_s24 = sld [smem:[#allocation10_spill]] }
0x1c1f   :  { %6950 = vmatprep.subr.bf16.mxu1 %v6949_v10  ;;  %v6969_v13 = vpack.c.bf16 %v5824_v9, %v5823_v5 }
0x1c22   :  { %6952 = vmatpush3.bf16.msra.mxu1 %v6949_v10 }
0x1c25   :  { %6532 = vmatmul.mubr.msk.f32.vlgmr.msra.gmra.mrb[44].mxu1 %vm289_vm1, %v7778_v6 }
0x1ce8   :  { %v6490_v15 = vpop.f32.mrb[40].mxu1 }
0x1ce9   :  { %v3749_v16 = vpop.f32.mrb[41].mxu1 }
0x1cea   :  { %6493 = vmatprep.mubr.msk.f32.mxu0 %vm598_vm4, %v3749_v16 }
0x1ceb   :  { %6494 = vmatmul.mubr.msk.f32.vlgmr.msra.gmra.mrb[28].mxu0 %vm598_vm4, %v6490_v15  ;;  %v5838_v15 = vld [vmem:[%s7352_s20 + $0xe8] sm:$0xff] }
0x1cec   :  { %6497 = vmatpush3.msra.mxu0 %v5750_v11  ;;  %6498 = vmatprep.mubr.msk.f32.mxu0 %vm598_vm4, %v7852_v1  ;;  %v6981_v16 = vpack.c.bf16 %v5838_v15, %v5837_v14 }
0x1ced   :  { %6938 = vmatprep.subr.bf16.mxu0 %v6937_v17 }
0x1cf0   :  { %v6511_v23 = vpop.f32.mrb[42].mxu1 }
0x1cf1   :  { %v4007_v61 = vadd.f32 %v6511_v23, %v5792_v18  ;;  %v4001_v2 = vpop.f32.mrb[43].mxu1  ;;  %v5830_v23 = vld [vmem:[%s7342_s6 + $0xe8] sm:$0xff] }
0x1cf2   :  { %v4002_v29 = vadd.f32 %v5792_v18, %v4001_v2  ;;  %v5840_v18 = vld [vmem:[%s7352_s20 + $0xf8] sm:$0xff]  ;;  %v5831_v2 = vld [vmem:[%s7342_s6 + $0xf0] sm:$0xff] }
0x1cf3   :  { %6499 = vmatmul.mubr.msk.f32.vlgmr.msra.gmra.mrb[28].mxu0 %vm598_vm4, %v7850_v24  ;;  %v5800_v24 = vld [vmem:[%s7347_s12 + $0x6] ss:$0 sm:$0xff] }
0x1cf4   :  { %6940 = vmatpush3.bf16.msra.mxu0 %v6937_v17  ;;  %6520 = vmatprep.mubr.msk.f32.mxu0 %vm289_vm1, %v7776_v63  ;;  %v5839_v17 = vld [vmem:[%s7352_s20 + $0xf0] sm:$0xff] }
0x1cf5   :  { %6942 = vmatprep.subr.bf16.mxu0 %v6941_v44  ;;  %v6985_v62 = vpack.c.bf16 %v5840_v18, %v5839_v17 }
0x1cf8   :  { %6944 = vmatpush3.bf16.msra.mxu0 %v6941_v44  ;;  %v6533_v1 = vpop.f32.mrb[44].mxu1  ;;  %v5832_v44 = vld [vmem:[%s7342_s6 + $0xf8] sm:$0xff] }
0x1cf9   :  { %v4183_v27 = vadd.f32 %v6533_v1, %v5808_v26  ;;  %v4177_v28 = vpop.f32.mrb[45].mxu1 }
0x1cfa   :  { %v4178_v49 = vadd.f32 %v5808_v26, %v4177_v28  ;;  %v5826_v28 = vld [vmem:[%s7337_s30 + $0x7] ss:$0 sm:$0xff]  ;;  %s8079_s30 = sld [smem:[#allocation8_spill]] }
0x1cfb   :  { %6521 = vmatmul.mubr.msk.f32.vlgmr.msra.gmra.mrb[30].mxu0 %vm289_vm1, %v7778_v6 }
0x1cfc   :  { %v6959_v30 = vpack.c.bf16 %v4183_v27, %v4178_v49  ;;  %6538 = vmatprep.mubr.msk.f32.mxu0 %vm598_vm4, %v4002_v29  ;;  %v6977_v27 = vpack.c.bf16 %v5832_v44, %v5831_v2 }
0x1cfe   :  { %6961 = vmatprep.subr.msk.bf16.mxu1 %vm7530_vm6, %v6959_v30 }
0x1cff   :  { %6964 = vmatpush3.bf16.msk.msra.mxu1 %vm7530_vm6, %v6959_v30 }
0x1d00   :  { %6966 = vmatprep.subr.bf16.mxu1 %v6965_v58 }
0x1dce   :  { %v6522_v31 = vpop.f32.mrb[30].mxu0 }
0x1dcf   :  { %v4095_v32 = vadd.f32 %v6522_v31, %v5800_v24  ;;  %v4089_v33 = vpop.f32.mrb[31].mxu0  ;;  %v5842_v31 = vld [vmem:[%s7357_s27 + $0x7] ss:$0 sm:$0xff] }
0x1dd0   :  { %v4090_v34 = vadd.f32 %v5800_v24, %v4089_v33 }
0x1dd2   :  { %v6953_v35 = vpack.c.bf16 %v4095_v32, %v4090_v34 }
0x1dd4   :  { %6955 = vmatprep.subr.msk.bf16.mxu0 %vm7542_vm7, %v6953_v35 }
0x1dd5   :  { %6958 = vmatpush3.bf16.xpose.msk.msra.mxu0 %vm7542_vm7, %v6953_v35 }
0x1dd6   :  { %6548 = vmatprep.subr.mxu0 %v5818_v59 }
0x1ddc   :  { %6539 = vmatmul.mubr.msk.f32.vlgmr.msra.gmra.mrb[32].mxu0 %vm598_vm4, %v4007_v61  ;;  %v6973_v61 = vpack.c.bf16 %v5830_v23, %v5829_v21 }
0x1ddd   :  { %6549 = vmatpush3.msra.mxu0 %v5818_v59 }
0x1dde   :  { %6974 = vmatprep.subr.bf16.mxu0 %v6973_v61 }
0x1eaf   :  { %v6540_v36 = vpop.f32.mrb[32].mxu0 }
0x1eb0   :  { %v4274_v37 = vmul.f32 0.35355338, %v6540_v36  ;;  %v4264_v39 = vpop.f32.mrb[33].mxu0 }
0x1eb1   :  { %v4273_v41 = vmul.f32 0.35355338, %v4264_v39 }
0x1eb2   :  { %v4276_v42 = vadd.f32 %v7822_v38, %v4274_v37 }
0x1eb3   :  { %v4275_v43 = vadd.f32 %v7826_v40, %v4273_v41 }
0x1eb4   :  { %v4280_v45 = vsel %vm694_vm8, %v4276_v42, -inf }
0x1eb5   :  { %4281 = vmax.xlane.f32.xlu0 %v4280_v45  ;;  %v4277_v46 = vsel %vm690_vm9, %v4275_v43, -inf }
0x1eb6   :  { %4278 = vmax.xlane.f32.xlu1 %v4277_v46 }
0x1f42   :  { %v4282_v22 = vpop.xlane.xlu0 %4281 }
0x1f43   :  { %v4284_v25 = vsub.f32 %v4276_v42, %v4282_v22  ;;  %v4279_v47 = vpop.xlane.xlu1 %4278 }
0x1f44   :  { %v4283_v48 = vsub.f32 %v4275_v43, %v4279_v47 }
0x1f45   :  { %v4287_v50 = vmul.f32 1.442695, %v4284_v25 }
0x1f46   :  { %v4285_v51 = vmul.f32 1.442695, %v4283_v48 }
0x1f47   :  { %7150 = vpow2.f32 %v4287_v50 }
0x1f48   :  { %7152 = vpow2.f32 %v4285_v51 }
0x1f51   :  { %v7151_v52 = vpop.eup %7150 }
0x1f52   :  { %v7153_v53 = vpop.eup %7152  ;;  %v4292_v54 = vsel %vm694_vm8, %v7151_v52, 0.0 }
0x1f53   :  { %4293 = vadd.xlane.f32.xlu0 %v4292_v54  ;;  %v4289_v55 = vsel %vm690_vm9, %v7153_v53, 0.0 }
0x1f54   :  { %4290 = vadd.xlane.f32.xlu1 %v4289_v55 }
0x1fe0   :  { %v4294_v60 = vpop.xlane.xlu0 %4293 }
0x1fe1   :  { %7154 = vrcp.f32 %v4294_v60  ;;  %v4291_v7 = vpop.xlane.xlu1 %4290 }
0x1fe2   :  { %7156 = vrcp.f32 %v4291_v7 }
0x1feb   :  { %v7155_v8 = vpop.eup %7154 }
0x1fec   :  { %v7157_v0 = vpop.eup %7156  ;;  %v4298_v11 = vmul.f32 %v7155_v8, %v7151_v52 }
0x1fed   :  { %v4297_v10 = vmul.f32 %v7157_v0, %v7153_v53 }
0x1fef   :  { %6545 = vmatprep.mubr.msk.f32.mxu1 %vm690_vm9, %v4297_v10 }
0x1ff0   :  { %6546 = vmatmul.mubr.msk.f32.vlgmr.msra.gmra.mrb[46].mxu1 %vm690_vm9, %v4298_v11 }
0x1ff1   :  { %6968 = vmatpush3.bf16.msra.mxu1 %v6965_v58  ;;  %6561 = vmatprep.mubr.msk.f32.mxu1 %vm289_vm1, %v7776_v63  ;;  %v5852_v58 = vld [vmem:[%s8068_s5 + $0x38] sm:$0xff] }
0x1ff2   :  { %6970 = vmatprep.subr.bf16.mxu1 %v6969_v13 }
0x1ff5   :  { %6972 = vmatpush3.bf16.msra.mxu1 %v6969_v13  ;;  %v5856_v13 = vld [vmem:[%s8069_s13 + $0x1] ss:$0 sm:$0xff] }
0x1ff6   :  { %6982 = vmatprep.subr.bf16.mxu1 %v6981_v16 }
0x1ff8   :  { %6562 = vmatmul.mubr.msk.f32.vlgmr.msra.gmra.mrb[48].mxu1 %vm289_vm1, %v7778_v6 }
0x1ff9   :  { %6984 = vmatpush3.bf16.msra.mxu1 %v6981_v16  ;;  %6583 = vmatprep.mubr.msk.f32.mxu1 %vm289_vm1, %v7776_v63 }
0x1ffa   :  { %6986 = vmatprep.subr.bf16.mxu1 %v6985_v62 }
0x1ffd   :  { %6988 = vmatpush3.bf16.msra.mxu1 %v6985_v62 }
0x2000   :  { %6584 = vmatmul.mubr.msk.f32.vlgmr.msra.gmra.mrb[50].mxu1 %vm289_vm1, %v7778_v6 }
0x20c3   :  { %v6547_v26 = vpop.f32.mrb[46].mxu1 }
0x20c4   :  { %v4374_v1 = vpop.f32.mrb[47].mxu1 }
0x20c5   :  { %6550 = vmatprep.mubr.msk.f32.mxu0 %vm598_vm4, %v4374_v1 }
0x20c6   :  { %6551 = vmatmul.mubr.msk.f32.vlgmr.msra.gmra.mrb[28].mxu0 %vm598_vm4, %v6547_v26 }
0x20c7   :  { %6976 = vmatpush3.bf16.msra.mxu0 %v6973_v61  ;;  %6572 = vmatprep.mubr.msk.f32.mxu0 %vm289_vm1, %v7776_v63  ;;  %v5834_v63 = vld [vmem:[%s7347_s12 + $0x7] ss:$0 sm:$0xff] }
0x20c8   :  { %6978 = vmatprep.subr.bf16.mxu0 %v6977_v27 }
0x20cb   :  { %v6563_v29 = vpop.f32.mrb[48].mxu1  ;;  %6980 = vmatpush3.bf16.msra.mxu0 %v6977_v27 }
0x20cc   :  { %v4553_v49 = vadd.f32 %v6563_v29, %v5826_v28  ;;  %v4547_v30 = vpop.f32.mrb[49].mxu1  ;;  %v5861_v29 = vld [vmem:[%s8070_s25 + $0x20] sm:$0xff] }
0x20cd   :  { %v4548_v24 = vadd.f32 %v5826_v28, %v4547_v30 }
0x20ce   :  { %6573 = vmatmul.mubr.msk.f32.vlgmr.msra.gmra.mrb[34].mxu0 %vm289_vm1, %v7778_v6 }
0x20cf   :  { %6590 = vmatprep.mubr.msk.f32.mxu0 %vm598_vm4, %v4548_v24  ;;  %v5863_v24 = vld [vmem:[%s8070_s25 + $0x30] sm:$0xff] }
0x20d3   :  { %v6585_v32 = vpop.f32.mrb[50].mxu1 }
0x20d4   :  { %v4729_v33 = vadd.f32 %v6585_v32, %v5842_v31  ;;  %v4723_v34 = vpop.f32.mrb[51].mxu1 }
0x20d5   :  { %v4724_v35 = vadd.f32 %v5842_v31, %v4723_v34  ;;  %v5864_v31 = vld [vmem:[%s8070_s25 + $0x38] sm:$0xff] }
0x20d6   :  { %v7005_v32 = vpack.c.bf16 %v5864_v31, %v5863_v24 }
0x20d7   :  { %v6995_v36 = vpack.c.bf16 %v4729_v33, %v4724_v35 }
0x20d9   :  { %6997 = vmatprep.subr.msk.bf16.mxu1 %vm7530_vm6, %v6995_v36 }
0x20da   :  { %7000 = vmatpush3.bf16.msk.msra.mxu1 %vm7530_vm6, %v6995_v36 }
0x21a1   :  { %v6574_v37 = vpop.f32.mrb[34].mxu0 }
0x21a2   :  { %v4641_v39 = vadd.f32 %v6574_v37, %v5834_v63  ;;  %v4635_v41 = vpop.f32.mrb[35].mxu0 }
0x21a3   :  { %v4636_v42 = vadd.f32 %v5834_v63, %v4635_v41  ;;  %v5859_v41 = vld [vmem:[%s8071_s29 + $0x1] ss:$0 sm:$0xff] }
0x21a5   :  { %v6989_v6 = vpack.c.bf16 %v4641_v39, %v4636_v42 }
0x21a7   :  { %6991 = vmatprep.subr.msk.bf16.mxu0 %vm7542_vm7, %v6989_v6 }
0x21a8   :  { %6994 = vmatpush3.bf16.xpose.msk.msra.mxu0 %vm7542_vm7, %v6989_v6 }
0x21a9   :  { %6600 = vmatprep.subr.mxu0 %v5852_v58 }
0x21af   :  { %6591 = vmatmul.mubr.msk.f32.vlgmr.msra.gmra.mrb[36].mxu0 %vm598_vm4, %v4553_v49  ;;  %v5862_v49 = vld [vmem:[%s8070_s25 + $0x28] sm:$0xff] }
0x21b0   :  { %6601 = vmatpush3.msra.mxu0 %v5852_v58  ;;  %v7001_v30 = vpack.c.bf16 %v5862_v49, %v5861_v29  ;;  %v5866_v58 = vld [vmem:[%s8074_s15 + $0x1] ss:$0 sm:$0xff] }
0x21b2   :  { %7002 = vmatprep.subr.bf16.mxu1 %v7001_v30 }
0x2282   :  { %v6592_v43 = vpop.f32.mrb[36].mxu0 }
0x2283   :  { %v4820_v45 = vmul.f32 0.35355338, %v6592_v43  ;;  %v4810_v46 = vpop.f32.mrb[37].mxu0 }
0x2284   :  { %v4819_v22 = vmul.f32 0.35355338, %v4810_v46 }
0x2285   :  { %v4822_v25 = vadd.f32 %v7822_v38, %v4820_v45  ;;  %v5860_v45 = vld [vmem:[%s8072_s3 + $0x1] ss:$0 sm:$0xff] }
0x2286   :  { %v4821_v47 = vadd.f32 %v7826_v40, %v4819_v22 }
0x2287   :  { %v4826_v48 = vsel %vm694_vm8, %v4822_v25, -inf }
0x2288   :  { %4827 = vmax.xlane.f32.xlu0 %v4826_v48  ;;  %v4823_v50 = vsel %vm690_vm9, %v4821_v47, -inf  ;;  %v5869_v48 = vld [vmem:[%s8073_s8 + $0x40] sm:$0xff] }
0x2289   :  { %4824 = vmax.xlane.f32.xlu1 %v4823_v50  ;;  %v5870_v50 = vld [vmem:[%s8073_s8 + $0x48] sm:$0xff] }
0x2315   :  { %v4828_v51 = vpop.xlane.xlu0 %4827 }
0x2316   :  { %v4830_v12 = vsub.f32 %v4822_v25, %v4828_v51  ;;  %v4825_v52 = vpop.xlane.xlu1 %4824  ;;  %v7009_v51 = vpack.c.bf16 %v5870_v50, %v5869_v48  ;;  %v5881_v48 = vld [vmem:[%s8076_s14] ss:$0 sm:$0xff] }
0x2317   :  { %v4829_v53 = vsub.f32 %v4821_v47, %v4825_v52  ;;  %v5872_v52 = vld [vmem:[%s8073_s8 + $0x58] sm:$0xff] }
0x2318   :  { %v4833_v54 = vmul.f32 1.442695, %v4830_v12  ;;  %v5871_v12 = vld [vmem:[%s8073_s8 + $0x50] sm:$0xff]  ;;  %7010 = vmatprep.subr.bf16.mxu0 %v7009_v51 }
0x2319   :  { %v4831_v55 = vmul.f32 1.442695, %v4829_v53  ;;  %v5873_v53 = vld [vmem:[%s8073_s8 + $0x60] sm:$0xff] }
0x231a   :  { %7158 = vpow2.f32 %v4833_v54  ;;  %v7013_v54 = vpack.c.bf16 %v5872_v52, %v5871_v12  ;;  %v5882_v52 = vld [vmem:[%s8077_s19] ss:$0 sm:$0xff] }
0x231b   :  { %7160 = vpow2.f32 %v4831_v55  ;;  %v5874_v55 = vld [vmem:[%s8073_s8 + $0x68] sm:$0xff] }
0x2324   :  { %v7159_v56 = vpop.eup %7158 }
0x2325   :  { %v7161_v57 = vpop.eup %7160  ;;  %v4838_v38 = vsel %vm694_vm8, %v7159_v56, 0.0 }
0x2326   :  { %4839 = vadd.xlane.f32.xlu0 %v4838_v38  ;;  %v4835_v40 = vsel %vm690_vm9, %v7161_v57, 0.0  ;;  %v5876_v38 = vld [vmem:[%s8073_s8 + $0x78] sm:$0xff] }
0x2327   :  { %4836 = vadd.xlane.f32.xlu1 %v4835_v40 }
0x23b3   :  { %v4840_v59 = vpop.xlane.xlu0 %4839 }
0x23b4   :  { %7162 = vrcp.f32 %v4840_v59  ;;  %v4837_v60 = vpop.xlane.xlu1 %4836 }
0x23b5   :  { %7164 = vrcp.f32 %v4837_v60 }
0x23be   :  { %v7163_v7 = vpop.eup %7162 }
0x23bf   :  { %v7165_v8 = vpop.eup %7164  ;;  %v4844_v9 = vmul.f32 %v7163_v7, %v7159_v56  ;;  %v7017_v56 = vpack.c.bf16 %v5874_v55, %v5873_v53 }
0x23c0   :  { %v4843_v5 = vmul.f32 %v7165_v8, %v7161_v57  ;;  %v5875_v57 = vld [vmem:[%s8073_s8 + $0x70] sm:$0xff] }
0x23c1   :  { %v7021_v40 = vpack.c.bf16 %v5876_v38, %v5875_v57  ;;  %v5407_v57 = vld [vmem:[%s7412_s21] sm:$0xff]  ;;  %v5408_v38 = vld [vmem:[%s7412_s21 + $0x8] sm:$0xff] }
0x23c2   :  { %6597 = vmatprep.mubr.msk.f32.mxu1 %vm690_vm9, %v4843_v5 }
0x23c3   :  { %6598 = vmatmul.mubr.msk.f32.vlgmr.msra.gmra.mrb[52].mxu1 %vm690_vm9, %v4844_v9 }
0x23c4   :  { %7004 = vmatpush3.bf16.msra.mxu1 %v7001_v30 }
0x23c5   :  { %7006 = vmatprep.subr.bf16.mxu1 %v7005_v32 }
0x23c8   :  { %7008 = vmatpush3.bf16.msra.mxu1 %v7005_v32 }
0x23c9   :  { %7025 = vmatprep.subr.bf16.mxu1 %v7262_v3 }
0x2496   :  { %v6599_v0 = vpop.f32.mrb[52].mxu1 }
0x2497   :  { %v4920_v10 = vpop.f32.mrb[53].mxu1 }
0x2498   :  { %6602 = vmatprep.mubr.msk.f32.mxu0 %vm598_vm4, %v4920_v10 }
0x2499   :  { %6603 = vmatmul.mubr.msk.f32.vlgmr.msra.gmra.mrb[28].mxu0 %vm598_vm4, %v6599_v0 }
0x249a   :  { %7012 = vmatpush3.bf16.msra.mxu0 %v7009_v51 }
0x249b   :  { %7014 = vmatprep.subr.bf16.mxu0 %v7013_v54 }
0x249e   :  { %7016 = vmatpush3.bf16.msra.mxu0 %v7013_v54 }
0x249f   :  { %7018 = vmatprep.subr.bf16.mxu0 %v7017_v56 }
0x24a2   :  { %7020 = vmatpush3.bf16.msra.mxu0 %v7017_v56 }
0x24a3   :  { %7022 = vmatprep.subr.bf16.mxu0 %v7021_v40 }
0x24a6   :  { %7024 = vmatpush3.bf16.msra.mxu0 %v7021_v40 }
0x256c   :  { %v6604_v11 = vpop.f32.mrb[28].mxu0 }
0x256d   :  { %v5015_v14 = vadd.f32 %v6604_v11, %v7750_v19  ;;  %v5003_v15 = vpop.f32.mrb[29].mxu0 }
0x256e   :  { %v5014_v16 = vadd.f32 %v5003_v15, %v7752_v20 }
0x256f   :  { %v7975_v17 = vadd.f32 %v5856_v13, %v5015_v14 }
0x2570   :  { %v7977_v18 = vadd.f32 %v5856_v13, %v5014_v16 }
0x2571   :  { %v5033_v62 = vsel %vm293_vm2, %v7975_v17, 0.0 }
0x2572   :  { %5034 = vadd.xlane.f32.xlu0 %v5033_v62  ;;  %v5030_v21 = vsel %vm289_vm1, %v7977_v18, 0.0 }
0x2573   :  { %5031 = vadd.xlane.f32.xlu1 %v5030_v21 }
0x25ff   :  { %v5035_v23 = vpop.xlane.xlu0 %5034 }
0x2600   :  { %v5037_v19 = vmul.f32 0.03125, %v5035_v23  ;;  %v5032_v61 = vpop.xlane.xlu1 %5031 }
0x2601   :  { %v5036_v20 = vmul.f32 0.03125, %v5032_v61 }
0x2602   :  { %v5039_v2 = vsub.f32 %v7975_v17, %v5037_v19 }
0x2603   :  { %v5038_v44 = vsub.f32 %v7977_v18, %v5036_v20 }
0x2604   :  { %v5041_v26 = vmul.f32 %v5039_v2, %v5039_v2 }
0x2605   :  { %v5040_v1 = vmul.f32 %v5038_v44, %v5038_v44 }
0x2606   :  { %v5045_v27 = vsel %vm293_vm2, %v5041_v26, 0.0 }
0x2607   :  { %5046 = vadd.xlane.f32.xlu0 %v5045_v27  ;;  %v5042_v28 = vsel %vm289_vm1, %v5040_v1, 0.0  ;;  %v5880_v27 = vld [vmem:[%s8075_s16 + $0x1] ss:$0 sm:$0xff] }
0x2608   :  { %5043 = vadd.xlane.f32.xlu1 %v5042_v28 }
0x2694   :  { %v5047_v33 = vpop.xlane.xlu0 %5046 }
0x2695   :  { %v5049_v34 = vmul.f32 0.03125, %v5047_v33  ;;  %v5044_v35 = vpop.xlane.xlu1 %5043 }
0x2696   :  { %v5048_v36 = vmul.f32 0.03125, %v5044_v35 }
0x2697   :  { %v5051_v63 = vadd.f32 1e-12, %v5049_v34 }
0x2698   :  { %v5050_v37 = vadd.f32 1e-12, %v5048_v36 }
0x2699   :  { %7166 = vrsqrt.f32 %v5051_v63 }
0x269a   :  { %7168 = vrsqrt.f32 %v5050_v37 }
0x26a3   :  { %v7167_v39 = vpop.eup %7166 }
0x26a4   :  { %v7169_v42 = vpop.eup %7168  ;;  %v5055_v6 = vmul.f32 %v7167_v39, %v5039_v2 }
0x26a5   :  { %v5054_v43 = vmul.f32 %v7169_v42, %v5038_v44  ;;  %v7266_v42 = vmov 0.0  }
0x26a6   :  { %v5063_v46 = vmul.f32 %v5859_v41, %v5055_v6 }
0x26a7   :  { %v5062_v22 = vmul.f32 %v5859_v41, %v5054_v43 }
0x26a8   :  { %v5071_v47 = vadd.f32 %v5860_v45, %v5063_v46 }
0x26a9   :  { %v5070_v25 = vadd.f32 %v5860_v45, %v5062_v22 }
0x26ab   :  { %6613 = vmatprep.mubr.msk.f32.mxu1 %vm289_vm1, %v5070_v25 }
0x26ac   :  { %6614 = vmatmul.mubr.msk.f32.vlgmr.msra.gmra.mrb[54].mxu1 %vm289_vm1, %v5071_v47 }
0x26ad   :  { %6639 = vmatprep.mubr.msk.f32.mxu1 %vm7265_vm10, %v7266_v42 }
0x277f   :  { %v6615_v59 = vpop.f32.mrb[54].mxu1 }
0x2780   :  { %v5163_v60 = vadd.f32 %v6615_v59, %v5866_v58  ;;  %v5157_v7 = vpop.f32.mrb[55].mxu1  ;;  %v7030_v59 = vpack.c.bf16 %v5408_v38, %v5407_v57 }
0x2781   :  { %v5158_v8 = vadd.f32 %v5866_v58, %v5157_v7  ;;  %v5330_v58 = vld [vmem:[%s8078_s24] sm:$0x3]  ;;  %v5410_v7 = vld [vmem:[%s7412_s21 + $0x18] sm:$0xff] }
0x2782   :  { %v5169_v5 = vmul.f32 0.044715, %v5163_v60  ;;  %v5167_v2 = vmul.f32 0.5, %v5163_v60 }
0x2783   :  { %v5168_v9 = vmul.f32 0.044715, %v5158_v8  ;;  %v5166_v61 = vmul.f32 0.5, %v5158_v8 }
0x2784   :  { %v5171_v0 = vmul.f32 %v5169_v5, %v5163_v60 }
0x2785   :  { %v5170_v10 = vmul.f32 %v5168_v9, %v5158_v8  ;;  %v5885_v9 = vld [vmem:[%s7417_s17] ss:$0 sm:$0xff] }
0x2786   :  { %v5173_v11 = vmul.f32 %v5171_v0, %v5163_v60 }
0x2787   :  { %v5172_v13 = vmul.f32 %v5170_v10, %v5158_v8  ;;  %v5505_v10 = vld [vmem:[%s8079_s30] sm:$0x3] }
0x2788   :  { %v5175_v14 = vadd.f32 %v5173_v11, %v5163_v60  ;;  %v5409_v60 = vld [vmem:[%s7412_s21 + $0x10] sm:$0xff]  ;;  %s7267_s21 = smov [#allocation2]  }
0x2789   :  { %v5174_v15 = vadd.f32 %v5172_v13, %v5158_v8  ;;  %v7033_v8 = vpack.c.bf16 %v5410_v7, %v5409_v60  ;;  %s5528_s17 = sshll.u32 %s7267_s21, 4  ;;  %s5529_s17 = int_to_ptr.vmem [resolvable:$true] %s5528_s17 }
0x278a   :  { %v5177_v16 = vmul.f32 0.7978846, %v5175_v14  ;;  %s7184_s6 = scalar_lea.vmem %s5529_s17, 32  ;;  %p7189_p1 = scmp.lt.s32.totalorder %s5529_s17, %s5529_s17 }
0x278b   :  { %v5176_v62 = vmul.f32 0.7978846, %v5174_v15  ;;  %p7185_p0 = scmp.ne.s32.totalorder %s5529_s17, %s7184_s6  ;;  %p7190_p2 = scmp.lt.s32.totalorder %s7184_s6, %s7184_s6 }
0x278c   :  { %7170 = vtanh.f32 %v5177_v16 }
0x278d   :  { %7172 = vtanh.f32 %v5176_v62  ;;  %p7191_p3 = por %p7190_p2, %p7189_p1 }
0x278f   :  { %p7192_p4 = pnand %p7191_p3, %p7185_p0 }
0x2796   :  { %v7171_v21 = vpop.eup %7170 }
0x2797   :  { %v7173_v23 = vpop.eup %7172  ;;  %v5181_v19 = vadd.f32 1.0, %v7171_v21 }
0x2798   :  { %v5180_v20 = vadd.f32 1.0, %v7173_v23 }
0x2799   :  { %v5183_v26 = vmul.f32 %v5181_v19, %v5167_v2 }
0x279a   :  { %v5182_v44 = vmul.f32 %v5180_v20, %v5166_v61 }
0x279c   :  { %6632 = vmatprep.mubr.msk.f32.mxu0 %vm162_vm0, %v5182_v44 }
0x279d   :  { %6633 = vmatmul.mubr.msk.f32.vlgmr.msra.gmra.mrb[38].mxu0 %vm162_vm0, %v5183_v26 }
0x2870   :  { %v6634_v1 = vpop.f32.mrb[38].mxu0 }
0x2871   :  { %v5275_v28 = vadd.f32 %v6634_v1, %v7975_v17  ;;  %v5265_v29 = vpop.f32.mrb[39].mxu0 }
0x2872   :  { %v5274_v49 = vadd.f32 %v5265_v29, %v7977_v18 }
0x2873   :  { %v5285_v30 = vadd.f32 %v5880_v27, %v5275_v28 }
0x2874   :  { %v5284_v24 = vadd.f32 %v5880_v27, %v5274_v49 }
0x2875   :  { %v5291_v31 = vsel %vm293_vm2, %v5285_v30, 0.0 }
0x2876   :  { %5292 = vadd.xlane.f32.xlu0 %v5291_v31  ;;  %v5288_v32 = vsel %vm289_vm1, %v5284_v24, 0.0 }
0x2877   :  { %5289 = vadd.xlane.f32.xlu1 %v5288_v32 }
0x2903   :  { %v5293_v33 = vpop.xlane.xlu0 %5292 }
0x2904   :  { %v5295_v34 = vmul.f32 0.03125, %v5293_v33  ;;  %v5290_v35 = vpop.xlane.xlu1 %5289 }
0x2905   :  { %v5294_v36 = vmul.f32 0.03125, %v5290_v35 }
0x2906   :  { %v5297_v63 = vsub.f32 %v5285_v30, %v5295_v34 }
0x2907   :  { %v5296_v37 = vsub.f32 %v5284_v24, %v5294_v36 }
0x2908   :  { %v5299_v39 = vmul.f32 %v5297_v63, %v5297_v63 }
0x2909   :  { %v5298_v41 = vmul.f32 %v5296_v37, %v5296_v37 }
0x290a   :  { %v5303_v17 = vsel %vm293_vm2, %v5299_v39, 0.0 }
0x290b   :  { %5304 = vadd.xlane.f32.xlu0 %v5303_v17  ;;  %v5300_v18 = vsel %vm289_vm1, %v5298_v41, 0.0 }
0x290c   :  { %5301 = vadd.xlane.f32.xlu1 %v5300_v18 }
0x2998   :  { %v5305_v6 = vpop.xlane.xlu0 %5304 }
0x2999   :  { %v5307_v43 = vmul.f32 0.03125, %v5305_v6  ;;  %v5302_v45 = vpop.xlane.xlu1 %5301 }
0x299a   :  { %v5306_v46 = vmul.f32 0.03125, %v5302_v45 }
0x299b   :  { %v5309_v22 = vadd.f32 1e-12, %v5307_v43 }
0x299c   :  { %v5308_v25 = vadd.f32 1e-12, %v5306_v46 }
0x299d   :  { %7174 = vrsqrt.f32 %v5309_v22 }
0x299e   :  { %7176 = vrsqrt.f32 %v5308_v25 }
0x29a7   :  { %v7175_v47 = vpop.eup %7174 }
0x29a8   :  { %v7177_v50 = vpop.eup %7176  ;;  %v5313_v51 = vmul.f32 %v7175_v47, %v5297_v63 }
0x29a9   :  { %v5312_v12 = vmul.f32 %v7177_v50, %v5296_v37 }
0x29aa   :  { %v5321_v53 = vmul.f32 %v5881_v48, %v5313_v51 }
0x29ab   :  { %v5320_v54 = vmul.f32 %v5881_v48, %v5312_v12 }
0x29ac   :  { %v5329_v55 = vadd.f32 %v5882_v52, %v5321_v53 }
0x29ad   :  { %v5328_v56 = vadd.f32 %v5882_v52, %v5320_v54 }
0x29af   :  { %v7026_v40 = vpack.c.bf16 %v5329_v55, %v5328_v56 }
0x29b1   :  { %7028 = vmatpush3.bf16.msk.msra.mxu1 %vm7530_vm6, %v7026_v40 }
0x29b2   :  { %7029 = vmatprep.subr.bf16.mxu1 %v7262_v3 }
0x29b4   :  { %6640 = vmatmul.mubr.msk.f32.vlgmr.msra.gmra.mrb[56].mxu1 %vm690_vm9, %v5330_v58 }
0x29b5   :  { %7031 = vmatpush3.bf16.msra.mxu1 %v7030_v59  ;;  %6650 = vmatprep.mubr.msk.f32.mxu1 %vm7265_vm10, %v7266_v42 }
0x29b6   :  { %7032 = vmatprep.subr.bf16.mxu1 %v7262_v3 }
0x29b9   :  { %7034 = vmatpush3.bf16.msra.mxu1 %v7033_v8 }
0x2a87   :  { %v5403_v5 = vpop.f32.mrb[56].mxu1 }
0x2a88   :  { %v6641_v4 = vpop.f32.mrb[57].mxu1  ;;  %6651 = vmatmul.mubr.msk.f32.vlgmr.msra.gmra.mrb[58].mxu1 %vm289_vm1, %v5403_v5 }
0x2b5b   :  { %v5487_v0 = vpop.f32.mrb[58].mxu1 }
0x2b5c   :  { %v5488_v11 = vadd.f32 %v5885_v9, %v5487_v0  ;;  %v6652_v13 = vpop.f32.mrb[59].mxu1 }
0x2b5e   :  { %v5493_v14 = vsel %vm5491_vm11, %v5488_v11, -inf  ;;  %5492 = vst.msk [vmem:[#allocation2] sm:$0x3] %vm5491_vm11, %v5488_v11  ;;  %v5506_v15 = vmul.f32 %v5505_v10, %v5488_v11 }
0x2b5f   :  { %5494 = vmax.xlane.f32.xlu1 %v5493_v14 }
0x2b60   :  { %v5507_v16 = vsel %vm5491_vm11, %v5506_v15, 0.0 }
0x2b63   :  { %5508 = vadd.xlane.f32.xlu1 %v5507_v16 }
0x2bec   :  { %v5495_v62 = vpop.xlane.xlu1 %5494 }
0x2bed   :  { %v5496_v21 = vsub.f32 %v5488_v11, %v5495_v62 }
0x2bef   :  { %v5497_v3 = vmul.f32 1.442695, %v5496_v21 }
0x2bf1   :  { %7178 = vpow2.f32 %v5497_v3 }
0x2bfb   :  { %v7179_v23 = vpop.eup %7178 }
0x2bfc   :  { %v5499_v19 = vsel %vm5491_vm11, %v7179_v23, 0.0 }
0x2bfd   :  { %5500 = vadd.xlane.f32.xlu0 %v5499_v19 }
0x2bfe   :  { %7195 = shalt.err (!%p7192_p4)
}
0x2bff   :  { %s7196_s12 = scalar_lea.hbm %s7422_s4, 32 }
0x2c00   :  { %p7197_p5 = scmp.ne.s32.totalorder %s7422_s4, %s7196_s12  ;;  %p7200_p6 = scmp.lt.u32.totalorder %s7196_s12, %s7422_s4 }
0x2c02   :  { %p7202_p7 = pnand %p7200_p6, %p7197_p5 }
0x2c04   :  { %7205 = shalt.err (!%p7202_p7)
}
0x2c05   :  { %5531 = dma.vmem_to_hbm [thread:$0]  %s5529_s17, 32, %s7422_s4, [#allocation3]   ;;  %v5509_v26 = vpop.xlane.xlu1 %5508  ;;  %vm5520_vm12 = vcmask 0  }
0x2c06   :  { %s7268_s20 = smov [#allocation4]  }
0x2c07   :  { %s5538_s27 = sshll.u32 %s7268_s20, 4  ;;  %s5539_s27 = int_to_ptr.vmem [resolvable:$true] %s5538_s27 }
0x2c08   :  { %s7206_s4 = scalar_lea.vmem %s5539_s27, 16  ;;  %s7210_s18 = scalar_lea.vmem %s5539_s27, 32 }
0x2c09   :  { %p7207_p8 = scmp.ne.s32.totalorder %s5539_s27, %s7206_s4  ;;  %p7211_p9 = scmp.lt.s32.totalorder %s5539_s27, %s5539_s27 }
0x2c0a   :  { %p7212_p10 = scmp.lt.s32.totalorder %s7210_s18, %s7206_s4 }
0x2c0c   :  { %p7213_p11 = por %p7212_p10, %p7211_p9 }
0x2c0e   :  { %p7214_p12 = pnand %p7213_p11, %p7207_p8 }
0x2c8a   :  { %v5501_v61 = vpop.xlane.xlu0 %5500 }
0x2c8b   :  { %7180 = vlog2.f32 %v5501_v61 }
0x2c95   :  { %v7181_v20 = vpop.eup %7180 }
0x2c96   :  { %v5503_v2 = vmul.f32 0.6931472, %v7181_v20 }
0x2c98   :  { %v5504_v44 = vadd.f32 %v5503_v2, %v5495_v62 }
0x2c9a   :  { %v5510_v1 = vsub.f32 %v5504_v44, %v5509_v26 }
0x2c9c   :  { %v5511_v27 = vsel %vm720_vm3, %v5510_v1, 0.0 }
0x2c9d   :  { %v5512_v28 = vrot.slane %v5511_v27, 4 }
0x2c9f   :  { %v5513_v29 = vadd.f32 %v5512_v28, %v5511_v27 }
0x2ca1   :  { %v5514_v49 = vrot.slane %v5513_v29, 2 }
0x2ca3   :  { %v5515_v30 = vadd.f32 %v5514_v49, %v5513_v29 }
0x2ca5   :  { %v5516_v24 = vrot.slane %v5515_v30, 1 }
0x2ca7   :  { %v5517_v31 = vadd.f32 %v5516_v24, %v5515_v30 }
0x2ca9   :  { %v5519_v32 = vmul.f32 0.5, %v5517_v31 }
0x2cab   :  { %5521 = vst.msk [vmem:[#allocation4] sm:$0x1] %vm5520_vm12, %v5519_v32 }
0x2cac   :  { %7217 = shalt.err (!%p7214_p12)
}
0x2cad   :  { %s7218_s22 = scalar_lea.hbm %s7427_s9, 16 }
0x2cae   :  { %p7219_p13 = scmp.ne.s32.totalorder %s7427_s9, %s7218_s22  ;;  %p7222_p0 = scmp.lt.u32.totalorder %s7218_s22, %s7427_s9 }
0x2cb0   :  { %p7224_p1 = pnand %p7222_p0, %p7219_p13 }
0x2cb2   :  { %7227 = shalt.err (!%p7224_p1)
}
0x2cb3   :  { %5541 = dma.vmem_to_hbm [thread:$0]  %s5539_s27, 16, %s7427_s9, [#allocation5]  }
0x2cb4   :  { %7228 = dma.done.wait [#allocation3], 32  }
0x2cb5   :  { %7229 = vsyncadd [#allocation3], 4294967264 }
0x2cb6   :  { %7230 = dma.done.wait [#allocation5], 16  }
0x2cb7   :  { %7231 = vsyncadd [#allocation5], 4294967280 }
0x2cb8   :  { %5548 = vsyncpa [#allocation3], 1 }
0x2cb9   :  { %5549 = vsyncpa [#allocation5], 1 }

</bundles_post_ra>
